<compile_context>
chip_gen: v5e
topology: v5e:2x2
jax: 0.10.0
libtpu: 0.0.40
codegen_flags: <defaults>
</compile_context>

<pallas_src>
import jax
import jax.numpy as jnp
from jax.experimental import pallas as pl
from jax.experimental.pallas import tpu as pltpu

EPS = 1e-5                    # nn.BatchNorm2d default eps
SLOPE = 0.2                   # LeakyReLU negative slope
LANES = 128
TARGET_TILE_ROWS = 1024       # output rows (M) per grid step; v7x-safe, sweep up on v5e/v6e
VMEM_LIMIT_BYTES = 48 * 1024 * 1024


def _round_up(x, m):
    return (x + m - 1) // m * m


def _cdiv(a, b):
    return -(-a // b)


# -----------------------------------------------------------------------------
# Pass 1: conv (+bias) (+LeakyReLU) (+masked BN partial sums), one H-tile per step.
# -----------------------------------------------------------------------------
def _make_conv_kernel(kh, tile_h, wo8, use_bias, use_lrelu, use_stats):
    tile_m = tile_h * wo8

    def kernel(*refs):
        i = 0
        mask_ref = None
        if use_stats:
            mask_ref = refs[i]; i += 1          # (1, 1, tile_m) f32 validity row
        x_ref = refs[i]; i += 1                 # (1, tile_h+kh-1, wo8, K) bf16
        w_ref = refs[i]; i += 1                 # (kh, K, coutp) bf16
        b_ref = None
        if use_bias:
            b_ref = refs[i]; i += 1             # (1, coutp) f32
        o_ref = refs[i]; i += 1                 # (1, tile_h, wo8, coutp)
        s_ref = refs[i] if use_stats else None  # (1, 2, coutp) f32

        coutp = o_ref.shape[-1]
        K = x_ref.shape[-1]

        # kh per-tap MXU matmuls (width taps already folded into K), f32 accumulation.
        # The dh slice is along a leading dim -> no relayout.
        acc = jnp.zeros((tile_m, coutp), jnp.float32)
        for dh in range(kh):
            lhs = x_ref[0, dh:dh + tile_h].reshape(tile_m, K)
            acc = acc + jnp.dot(lhs, w_ref[dh], preferred_element_type=jnp.float32)

        if use_bias:
            acc = acc + b_ref[...]

        if use_stats:
            # Masked per-tile partial sums for BatchNorm batch statistics.
            # Reduced on the MXU (keeps XLU/VPU free); the mask also excludes the
            # width/height padding rows from the statistics.
            m = mask_ref[0]                                              # (1, tile_m)
            s1 = jnp.dot(m, acc, preferred_element_type=jnp.float32)     # (1, coutp)
            s2 = jnp.dot(m, acc * acc, preferred_element_type=jnp.float32)
            s_ref[...] = jnp.concatenate([s1, s2], axis=0).reshape(1, 2, coutp)

        if use_lrelu:
            acc = jnp.maximum(acc, SLOPE * acc)

        o_ref[...] = acc.reshape(1, tile_h, wo8, coutp).astype(o_ref.dtype)

    return kernel


# -----------------------------------------------------------------------------
# Pass 2 (BN layers only): y*scale + shift, then LeakyReLU. Elementwise, gridded.
# -----------------------------------------------------------------------------
def _bn_apply_kernel(y_ref, scale_ref, shift_ref, o_ref):
    coutp = o_ref.shape[-1]
    y = y_ref[...].astype(jnp.float32)
    o = y * scale_ref[...].reshape(1, 1, 1, coutp) + shift_ref[...].reshape(1, 1, 1, coutp)
    o = jnp.maximum(o, SLOPE * o)
    o_ref[...] = o.astype(o_ref.dtype)


def _bn_lrelu_apply(y, scale, shift, tile_h, wo8, coutp):
    G = y.shape[0]
    cparams = pltpu.CompilerParams(dimension_semantics=("parallel",),
                                   vmem_limit_bytes=VMEM_LIMIT_BYTES)
    return pl.pallas_call(
        _bn_apply_kernel,
        grid=(G,),
        in_specs=[pl.BlockSpec((1, tile_h, wo8, coutp), lambda i: (i, 0, 0, 0)),
                  pl.BlockSpec((1, coutp), lambda i: (0, 0)),
                  pl.BlockSpec((1, coutp), lambda i: (0, 0))],
        out_shape=jax.ShapeDtypeStruct(y.shape, jnp.bfloat16),
        out_specs=pl.BlockSpec((1, tile_h, wo8, coutp), lambda i: (i, 0, 0, 0)),
        compiler_params=cparams,
    )(y, scale, shift)


# -----------------------------------------------------------------------------
# One PatchGAN layer in NHWC: Conv2d(k=4, stride, pad=1) [+bias][+BN][+LeakyReLU].
#   x: (N, H, W, Cin)    w: (Cout, Cin, 4, 4)  (PyTorch OIHW)
# -----------------------------------------------------------------------------
def _conv_layer(x, w, b=None, gamma=None, beta=None, *, stride=1, lrelu=True):
    N, H, W, Cin = x.shape
    Cout, _, KH, KW = w.shape
    Ho = (H + 2 - KH) // stride + 1
    Wo = (W + 2 - KW) // stride + 1
    Wo8 = _round_up(Wo, 8)                  # lane/sublane-friendly output width
    coutp = _round_up(Cout, LANES)          # lane-dense, unmasked stores

    if stride == 1:
        kh = kw = KH
        cin = Cin
        xs = jnp.pad(x, ((0, 0), (1, 1), (1, 1 + (Wo8 - Wo)), (0, 0)))
        wt_pre = jnp.transpose(w, (2, 3, 1, 0))                 # (kh, kw, cin, Cout)
    else:
        # stride 2: fold into a stride-1 2x2 conv over a 2x2 space-to-depth input.
        assert stride == 2 and KH == 4 and KW == 4 and H % 2 == 0 and W % 2 == 0
        kh = kw = 2
        cin = 4 * Cin
        xp = jnp.pad(x, ((0, 0), (1, 1), (1, 1 + 2 * (Wo8 - Wo)), (0, 0)))
        Hp2, Wp2 = xp.shape[1] // 2, xp.shape[2] // 2
        xs = xp.reshape(N, Hp2, 2, Wp2, 2, Cin).transpose(0, 1, 3, 2, 4, 5)
        xs = xs.reshape(N, Hp2, Wp2, cin)
        wt_pre = w.reshape(Cout, Cin, 2, 2, 2, 2).transpose(2, 4, 3, 5, 1, 0)
        wt_pre = wt_pre.reshape(kh, kw, cin, Cout)

    assert xs.shape[1] == Ho + kh - 1 and xs.shape[2] == Wo8 + kw - 1

    # Fold the width taps into the contraction dim: K = kw * cin.
    K = kw * cin
    xw = jnp.concatenate([xs[:, :, dw:dw + Wo8, :] for dw in range(kw)], axis=-1)

    # H-tiling with a replicated (kh-1)-row halo per tile -> non-overlapping blocks.
    tile_h = max(1, min(Ho, TARGET_TILE_ROWS // Wo8))
    n_h = _cdiv(Ho, tile_h)
    Ho_pad = n_h * tile_h
    xw = jnp.pad(xw, ((0, 0), (0, Ho_pad - Ho), (0, 0), (0, 0)))
    row_idx = (jnp.arange(n_h)[:, None] * tile_h
               + jnp.arange(tile_h + kh - 1)[None, :]).reshape(-1)
    xt = jnp.take(xw, row_idx, axis=1)
    xt = xt.reshape(N * n_h, tile_h + kh - 1, Wo8, K).astype(jnp.bfloat16)

    wt = wt_pre.reshape(kh, K, Cout)
    wt = jnp.pad(wt, ((0, 0), (0, 0), (0, coutp - Cout))).astype(jnp.bfloat16)

    use_bias = b is not None
    use_bn = gamma is not None
    G = N * n_h
    tile_m = tile_h * Wo8

    args, in_specs = [], []
    if use_bn:
        # Precomputed 0/1 validity row per tile (excludes width/height pad outputs).
        valid = ((jnp.arange(Ho_pad) < Ho)[:, None]
                 & (jnp.arange(Wo8) < Wo)[None, :]).astype(jnp.float32)
        mask = valid.reshape(n_h, 1, tile_m)
        mask = jnp.broadcast_to(mask[None], (N, n_h, 1, tile_m)).reshape(G, 1, tile_m)
        args.append(mask)
        in_specs.append(pl.BlockSpec((1, 1, tile_m), lambda i: (i, 0, 0)))
    args.append(xt)
    in_specs.append(pl.BlockSpec((1, tile_h + kh - 1, Wo8, K), lambda i: (i, 0, 0, 0)))
    args.append(wt)
    in_specs.append(pl.BlockSpec((kh, K, coutp), lambda i: (0, 0, 0)))
    if use_bias:
        bp = jnp.pad(b, (0, coutp - Cout)).reshape(1, coutp).astype(jnp.float32)
        args.append(bp)
        in_specs.append(pl.BlockSpec((1, coutp), lambda i: (0, 0)))

    # BN layers keep the pre-normalization activation in f32 (consumed once by
    # pass 2); bf16 between layers otherwise (next conv casts to bf16 anyway).
    out_dtype = jnp.float32 if (use_bn or not lrelu) else jnp.bfloat16
    out_shapes = [jax.ShapeDtypeStruct((G, tile_h, Wo8, coutp), out_dtype)]
    out_specs = [pl.BlockSpec((1, tile_h, Wo8, coutp), lambda i: (i, 0, 0, 0))]
    if use_bn:
        out_shapes.append(jax.ShapeDtypeStruct((G, 2, coutp), jnp.float32))
        out_specs.append(pl.BlockSpec((1, 2, coutp), lambda i: (i, 0, 0)))

    kernel = _make_conv_kernel(kh, tile_h, Wo8, use_bias, lrelu and not use_bn, use_bn)
    cparams = pltpu.CompilerParams(dimension_semantics=("parallel",),
                                   vmem_limit_bytes=VMEM_LIMIT_BYTES)
    outs = pl.pallas_call(
        kernel,
        grid=(G,),
        in_specs=in_specs,
        out_shape=tuple(out_shapes) if use_bn else out_shapes[0],
        out_specs=tuple(out_specs) if use_bn else out_specs[0],
        compiler_params=cparams,
    )(*args)

    if use_bn:
        y, stats = outs
        cnt = float(N * Ho * Wo)                       # valid element count
        s = jnp.sum(stats, axis=0)                     # (2, coutp) tiny XLA combine
        mean = s[0] / cnt
        var = s[1] / cnt - mean * mean                 # biased variance (PyTorch BN)
        gp = jnp.pad(gamma, (0, coutp - Cout)).astype(jnp.float32)
        bp = jnp.pad(beta, (0, coutp - Cout)).astype(jnp.float32)
        scale = gp * jax.lax.rsqrt(var + EPS)
        shift = bp - mean * scale
        y = _bn_lrelu_apply(y, scale.reshape(1, coutp), shift.reshape(1, coutp),
                            tile_h, Wo8, coutp)
    else:
        y = outs

    y = y.reshape(N, Ho_pad, Wo8, coutp)[:, :Ho, :Wo, :Cout]
    return y


# ----------------------------- model construction ---------------------------
def init_patchgan_params(key, input_nc, ndf=64, n_layers=3):
    """Mirror the PyTorch PatchGANDiscriminator constructor (norm = BatchNorm2d)."""
    keys = iter(jax.random.split(key, 4 * (n_layers + 2)))

    def conv_w(cout, cin):
        bound = 1.0 / (cin * 16) ** 0.5
        return jax.random.uniform(next(keys), (cout, cin, 4, 4), jnp.float32, -bound, bound)

    def conv_b(cout, cin):
        bound = 1.0 / (cin * 16) ** 0.5
        return jax.random.uniform(next(keys), (cout,), jnp.float32, -bound, bound)

    def bn_params(c):
        g = jax.random.uniform(next(keys), (c,), jnp.float32, 0.5, 1.5)
        be = jax.random.uniform(next(keys), (c,), jnp.float32, -0.5, 0.5)
        return g, be

    layers = [dict(w=conv_w(ndf, input_nc), b=conv_b(ndf, input_nc),
                   gamma=None, beta=None, stride=2, lrelu=True)]
    nf_mult = 1
    for n in range(1, n_layers):
        nf_prev, nf_mult = nf_mult, min(2 ** n, 8)
        g, be = bn_params(ndf * nf_mult)
        layers.append(dict(w=conv_w(ndf * nf_mult, ndf * nf_prev), b=None,
                           gamma=g, beta=be, stride=1, lrelu=True))
    nf_prev, nf_mult = nf_mult, min(2 ** n_layers, 8)
    g, be = bn_params(ndf * nf_mult)
    layers.append(dict(w=conv_w(ndf * nf_mult, ndf * nf_prev), b=None,
                       gamma=g, beta=be, stride=1, lrelu=True))
    layers.append(dict(w=conv_w(1, ndf * nf_mult), b=conv_b(1, ndf * nf_mult),
                       gamma=None, beta=None, stride=1, lrelu=False))
    return layers


def patchgan_forward(x_nchw, layers):
    """Pallas forward. x: (N, C, H, W) -> (N, 1, H', W')."""
    x = jnp.transpose(x_nchw, (0, 2, 3, 1)).astype(jnp.float32)      # NCHW -> NHWC
    for lyr in layers:
        x = _conv_layer(x, lyr["w"], b=lyr["b"], gamma=lyr["gamma"], beta=lyr["beta"],
                        stride=lyr["stride"], lrelu=lyr["lrelu"])
    return jnp.transpose(x, (0, 3, 1, 2)).astype(jnp.float32)        # NHWC -> NCHW


# --------------------- pure-JAX reference (correctness) ----------------------
def patchgan_reference(x_nchw, layers):
    x = x_nchw.astype(jnp.float32)
    for lyr in layers:
        y = jax.lax.conv_general_dilated(
            x, lyr["w"], (lyr["stride"],) * 2, [(1, 1), (1, 1)],
            dimension_numbers=("NCHW", "OIHW", "NCHW"),
            precision=jax.lax.Precision.HIGHEST)
        if lyr["b"] is not None:
            y = y + lyr["b"][None, :, None, None]
        if lyr["gamma"] is not None:   # training-mode BatchNorm2d (batch statistics)
            m = jnp.mean(y, axis=(0, 2, 3), keepdims=True)
            v = jnp.mean((y - m) ** 2, axis=(0, 2, 3), keepdims=True)
            y = (y - m) / jnp.sqrt(v + EPS)
            y = y * lyr["gamma"][None, :, None, None] + lyr["beta"][None, :, None, None]
        if lyr["lrelu"]:
            y = jnp.where(y >= 0, y, SLOPE * y)
        x = y
    return x


if __name__ == "__main__":
    N, input_nc, H, W = 2, 3, 16, 16
    ndf, n_layers = 16, 3           # small test width; structure identical to ndf=64

    key = jax.random.PRNGKey(0)
    kx, kp = jax.random.split(key)
    x = jax.random.normal(kx, (N, input_nc, H, W), jnp.float32)
    layers = init_patchgan_params(kp, input_nc, ndf=ndf, n_layers=n_layers)

    fwd = jax.jit(lambda inp: patchgan_forward(inp, layers))
    out = jax.block_until_ready(fwd(x))
    ref = patchgan_reference(x, layers)

    assert out.shape == ref.shape, (out.shape, ref.shape)
    max_err = float(jnp.max(jnp.abs(out - ref)))
    # bf16 MXU operands (f32 accumulation) vs f32 HIGHEST reference.
    assert jnp.allclose(out, ref, atol=5e-2, rtol=5e-2), f"max_err={max_err}"
    print("KERNEL_OK")
</pallas_src>

<mosaic_0001>
module attributes {stable_mosaic.version = 11 : i64} {
  func.func @kernel(%arg0: i32, %arg1: memref<1x9x8x24xbf16, #tpu.memory_space<vmem>>, %arg2: memref<2x24x128xbf16, #tpu.memory_space<vmem>>, %arg3: memref<1x128xf32, #tpu.memory_space<vmem>>, %arg4: memref<1x8x8x128xbf16, #tpu.memory_space<vmem>>) attributes {dimension_semantics = [#tpu.dimension_semantics<parallel>], iteration_bounds = array<i64: 2>, scalar_prefetch = 0 : i64, scratch_operands = 0 : i64, tpu.core_type = #tpu.core_type<tc>, window_params = [{transform_indices = @transform_0, window_bounds = array<i64: 1, 9, 8, 24>}, {pipeline_mode = #tpu.pipeline_mode<synchronous>, transform_indices = @transform_1, window_bounds = array<i64: 2, 24, 128>}, {pipeline_mode = #tpu.pipeline_mode<synchronous>, transform_indices = @transform_2, window_bounds = array<i64: 1, 128>}, {transform_indices = @transform_3, window_bounds = array<i64: 1, 8, 8, 128>}]} {
    %cst = arith.constant 0.000000e+00 : f32
    %0 = vector.broadcast %cst : f32 to vector<64x128xf32>
    %c0 = arith.constant 0 : index
    %c0_0 = arith.constant 0 : index
    %c0_1 = arith.constant 0 : index
    %c0_2 = arith.constant 0 : index
    %1 = vector.load %arg1[%c0, %c0_0, %c0_1, %c0_2] : memref<1x9x8x24xbf16, #tpu.memory_space<vmem>>, vector<1x8x8x24xbf16>
    %2 = vector.shape_cast %1 : vector<1x8x8x24xbf16> to vector<8x8x24xbf16>
    %3 = vector.shape_cast %2 : vector<8x8x24xbf16> to vector<64x24xbf16>
    %c0_3 = arith.constant 0 : index
    %c0_4 = arith.constant 0 : index
    %c0_5 = arith.constant 0 : index
    %4 = vector.load %arg2[%c0_3, %c0_4, %c0_5] : memref<2x24x128xbf16, #tpu.memory_space<vmem>>, vector<1x24x128xbf16>
    %5 = vector.shape_cast %4 : vector<1x24x128xbf16> to vector<24x128xbf16>
    %cst_6 = arith.constant dense<0.000000e+00> : vector<64x128xf32>
    %6 = tpu.matmul %3, %5, %cst_6 {dimension_numbers = #tpu.dot_dimension_numbers<[1], [0], [0], [1], [0, 0, 1, 1], [], []>} : vector<64x24xbf16>, vector<24x128xbf16>, vector<64x128xf32> -> vector<64x128xf32>
    %7 = arith.addf %0, %6 : vector<64x128xf32>
    %c0_7 = arith.constant 0 : index
    %c1 = arith.constant 1 : index
    %c0_8 = arith.constant 0 : index
    %c0_9 = arith.constant 0 : index
    %8 = vector.load %arg1[%c0_7, %c1, %c0_8, %c0_9] : memref<1x9x8x24xbf16, #tpu.memory_space<vmem>>, vector<1x8x8x24xbf16>
    %9 = vector.shape_cast %8 : vector<1x8x8x24xbf16> to vector<8x8x24xbf16>
    %10 = vector.shape_cast %9 : vector<8x8x24xbf16> to vector<64x24xbf16>
    %c1_10 = arith.constant 1 : index
    %c0_11 = arith.constant 0 : index
    %c0_12 = arith.constant 0 : index
    %11 = vector.load %arg2[%c1_10, %c0_11, %c0_12] : memref<2x24x128xbf16, #tpu.memory_space<vmem>>, vector<1x24x128xbf16>
    %12 = vector.shape_cast %11 : vector<1x24x128xbf16> to vector<24x128xbf16>
    %cst_13 = arith.constant dense<0.000000e+00> : vector<64x128xf32>
    %13 = tpu.matmul %10, %12, %cst_13 {dimension_numbers = #tpu.dot_dimension_numbers<[1], [0], [0], [1], [0, 0, 1, 1], [], []>} : vector<64x24xbf16>, vector<24x128xbf16>, vector<64x128xf32> -> vector<64x128xf32>
    %14 = arith.addf %7, %13 : vector<64x128xf32>
    %c0_14 = arith.constant 0 : index
    %c0_15 = arith.constant 0 : index
    %15 = vector.load %arg3[%c0_14, %c0_15] : memref<1x128xf32, #tpu.memory_space<vmem>>, vector<1x128xf32>
    %16 = vector.broadcast %15 : vector<1x128xf32> to vector<64x128xf32>
    %17 = arith.addf %14, %16 : vector<64x128xf32>
    %cst_16 = arith.constant 2.000000e-01 : f32
    %18 = vector.broadcast %cst_16 : f32 to vector<64x128xf32>
    %19 = arith.mulf %18, %17 : vector<64x128xf32>
    %20 = arith.maximumf %17, %19 : vector<64x128xf32>
    %21 = vector.shape_cast %20 : vector<64x128xf32> to vector<1x8x8x128xf32>
    %22 = arith.truncf %21 : vector<1x8x8x128xf32> to vector<1x8x8x128xbf16>
    %c0_17 = arith.constant 0 : index
    %c0_18 = arith.constant 0 : index
    %c0_19 = arith.constant 0 : index
    %c0_20 = arith.constant 0 : index
    %23 = vector.load %arg4[%c0_17, %c0_18, %c0_19, %c0_20] : memref<1x8x8x128xbf16, #tpu.memory_space<vmem>>, vector<1x8x8x128xbf16>
    tpu.vector_store %arg4[%c0_17, %c0_18, %c0_19, %c0_20], %22 {strides = array<i32>} : memref<1x8x8x128xbf16, #tpu.memory_space<vmem>>, vector<1x8x8x128xbf16>,
    return
  }
  func.func @transform_0(%arg0: i32) -> (i32, i32, i32, i32) {
    %c0_i32 = arith.constant 0 : i32
    %c0_i32_0 = arith.constant 0 : i32
    %c0_i32_1 = arith.constant 0 : i32
    %c0_i32_2 = arith.constant 0 : i32
    return %arg0, %c0_i32, %c0_i32_0, %c0_i32_1 : i32, i32, i32, i32
  }
  func.func @transform_1(%arg0: i32) -> (i32, i32, i32) {
    %c0_i32 = arith.constant 0 : i32
    %c0_i32_0 = arith.constant 0 : i32
    %c0_i32_1 = arith.constant 0 : i32
    %c0_i32_2 = arith.constant 0 : i32
    return %c0_i32, %c0_i32_0, %c0_i32_1 : i32, i32, i32
  }
  func.func @transform_2(%arg0: i32) -> (i32, i32) {
    %c0_i32 = arith.constant 0 : i32
    %c0_i32_0 = arith.constant 0 : i32
    %c0_i32_1 = arith.constant 0 : i32
    return %c0_i32, %c0_i32_0 : i32, i32
  }
  func.func @transform_3(%arg0: i32) -> (i32, i32, i32, i32) {
    %c0_i32 = arith.constant 0 : i32
    %c0_i32_0 = arith.constant 0 : i32
    %c0_i32_1 = arith.constant 0 : i32
    %c0_i32_2 = arith.constant 0 : i32
    return %arg0, %c0_i32, %c0_i32_0, %c0_i32_1 : i32, i32, i32, i32
  }
}

module attributes {stable_mosaic.version = 11 : i64} {
  func.func @_bn_apply_kernel(%arg0: i32, %arg1: memref<1x7x8x128xf32, #tpu.memory_space<vmem>>, %arg2: memref<1x128xf32, #tpu.memory_space<vmem>>, %arg3: memref<1x128xf32, #tpu.memory_space<vmem>>, %arg4: memref<1x7x8x128xbf16, #tpu.memory_space<vmem>>) attributes {dimension_semantics = [#tpu.dimension_semantics<parallel>], iteration_bounds = array<i64: 2>, scalar_prefetch = 0 : i64, scratch_operands = 0 : i64, tpu.core_type = #tpu.core_type<tc>, window_params = [{transform_indices = @transform_0, window_bounds = array<i64: 1, 7, 8, 128>}, {pipeline_mode = #tpu.pipeline_mode<synchronous>, transform_indices = @transform_1, window_bounds = array<i64: 1, 128>}, {pipeline_mode = #tpu.pipeline_mode<synchronous>, transform_indices = @transform_2, window_bounds = array<i64: 1, 128>}, {transform_indices = @transform_3, window_bounds = array<i64: 1, 7, 8, 128>}]} {
    %c0 = arith.constant 0 : index
    %c0_0 = arith.constant 0 : index
    %c0_1 = arith.constant 0 : index
    %c0_2 = arith.constant 0 : index
    %0 = vector.load %arg1[%c0, %c0_0, %c0_1, %c0_2] : memref<1x7x8x128xf32, #tpu.memory_space<vmem>>, vector<1x7x8x128xf32>
    %c0_3 = arith.constant 0 : index
    %c0_4 = arith.constant 0 : index
    %1 = vector.load %arg2[%c0_3, %c0_4] : memref<1x128xf32, #tpu.memory_space<vmem>>, vector<1x128xf32>
    %2 = vector.shape_cast %1 : vector<1x128xf32> to vector<1x1x1x128xf32>
    %3 = vector.broadcast %2 : vector<1x1x1x128xf32> to vector<1x7x8x128xf32>
    %4 = arith.mulf %0, %3 : vector<1x7x8x128xf32>
    %c0_5 = arith.constant 0 : index
    %c0_6 = arith.constant 0 : index
    %5 = vector.load %arg3[%c0_5, %c0_6] : memref<1x128xf32, #tpu.memory_space<vmem>>, vector<1x128xf32>
    %6 = vector.shape_cast %5 : vector<1x128xf32> to vector<1x1x1x128xf32>
    %7 = vector.broadcast %6 : vector<1x1x1x128xf32> to vector<1x7x8x128xf32>
    %8 = arith.addf %4, %7 : vector<1x7x8x128xf32>
    %cst = arith.constant 2.000000e-01 : f32
    %9 = vector.broadcast %cst : f32 to vector<1x7x8x128xf32>
    %10 = arith.mulf %9, %8 : vector<1x7x8x128xf32>
    %11 = arith.maximumf %8, %10 : vector<1x7x8x128xf32>
    %12 = arith.truncf %11 : vector<1x7x8x128xf32> to vector<1x7x8x128xbf16>
    %c0_7 = arith.constant 0 : index
    %c0_8 = arith.constant 0 : index
    %c0_9 = arith.constant 0 : index
    %c0_10 = arith.constant 0 : index
    %13 = vector.load %arg4[%c0_7, %c0_8, %c0_9, %c0_10] : memref<1x7x8x128xbf16, #tpu.memory_space<vmem>>, vector<1x7x8x128xbf16>
    tpu.vector_store %arg4[%c0_7, %c0_8, %c0_9, %c0_10], %12 {strides = array<i32>} : memref<1x7x8x128xbf16, #tpu.memory_space<vmem>>, vector<1x7x8x128xbf16>,
    return
  }
  func.func @transform_0(%arg0: i32) -> (i32, i32, i32, i32) {
    %c0_i32 = arith.constant 0 : i32
    %c0_i32_0 = arith.constant 0 : i32
    %c0_i32_1 = arith.constant 0 : i32
    %c0_i32_2 = arith.constant 0 : i32
    return %arg0, %c0_i32, %c0_i32_0, %c0_i32_1 : i32, i32, i32, i32
  }
  func.func @transform_1(%arg0: i32) -> (i32, i32) {
    %c0_i32 = arith.constant 0 : i32
    %c0_i32_0 = arith.constant 0 : i32
    %c0_i32_1 = arith.constant 0 : i32
    return %c0_i32, %c0_i32_0 : i32, i32
  }
  func.func @transform_2(%arg0: i32) -> (i32, i32) {
    %c0_i32 = arith.constant 0 : i32
    %c0_i32_0 = arith.constant 0 : i32
    %c0_i32_1 = arith.constant 0 : i32
    return %c0_i32, %c0_i32_0 : i32, i32
  }
  func.func @transform_3(%arg0: i32) -> (i32, i32, i32, i32) {
    %c0_i32 = arith.constant 0 : i32
    %c0_i32_0 = arith.constant 0 : i32
    %c0_i32_1 = arith.constant 0 : i32
    %c0_i32_2 = arith.constant 0 : i32
    return %arg0, %c0_i32, %c0_i32_0, %c0_i32_1 : i32, i32, i32, i32
  }
}

module attributes {stable_mosaic.version = 11 : i64} {
  func.func @kernel(%arg0: i32, %arg1: memref<1x1x56xf32, #tpu.memory_space<vmem>>, %arg2: memref<1x10x8x64xbf16, #tpu.memory_space<vmem>>, %arg3: memref<4x64x128xbf16, #tpu.memory_space<vmem>>, %arg4: memref<1x7x8x128xf32, #tpu.memory_space<vmem>>, %arg5: memref<1x2x128xf32, #tpu.memory_space<vmem>>) attributes {dimension_semantics = [#tpu.dimension_semantics<parallel>], iteration_bounds = array<i64: 2>, scalar_prefetch = 0 : i64, scratch_operands = 0 : i64, tpu.core_type = #tpu.core_type<tc>, window_params = [{transform_indices = @transform_0, window_bounds = array<i64: 1, 1, 56>}, {transform_indices = @transform_1, window_bounds = array<i64: 1, 10, 8, 64>}, {pipeline_mode = #tpu.pipeline_mode<synchronous>, transform_indices = @transform_2, window_bounds = array<i64: 4, 64, 128>}, {transform_indices = @transform_3, window_bounds = array<i64: 1, 7, 8, 128>}, {transform_indices = @transform_4, window_bounds = array<i64: 1, 2, 128>}]} {
    %cst = arith.constant 0.000000e+00 : f32
    %0 = vector.broadcast %cst : f32 to vector<56x128xf32>
    %c0 = arith.constant 0 : index
    %c0_0 = arith.constant 0 : index
    %c0_1 = arith.constant 0 : index
    %c0_2 = arith.constant 0 : index
    %1 = vector.load %arg2[%c0, %c0_0, %c0_1, %c0_2] : memref<1x10x8x64xbf16, #tpu.memory_space<vmem>>, vector<1x7x8x64xbf16>
    %2 = vector.shape_cast %1 : vector<1x7x8x64xbf16> to vector<7x8x64xbf16>
    %3 = vector.shape_cast %2 : vector<7x8x64xbf16> to vector<56x64xbf16>
    %c0_3 = arith.constant 0 : index
    %c0_4 = arith.constant 0 : index
    %c0_5 = arith.constant 0 : index
    %4 = vector.load %arg3[%c0_3, %c0_4, %c0_5] : memref<4x64x128xbf16, #tpu.memory_space<vmem>>, vector<1x64x128xbf16>
    %5 = vector.shape_cast %4 : vector<1x64x128xbf16> to vector<64x128xbf16>
    %cst_6 = arith.constant dense<0.000000e+00> : vector<56x128xf32>
    %6 = tpu.matmul %3, %5, %cst_6 {dimension_numbers = #tpu.dot_dimension_numbers<[1], [0], [0], [1], [0, 0, 1, 1], [], []>} : vector<56x64xbf16>, vector<64x128xbf16>, vector<56x128xf32> -> vector<56x128xf32>
    %7 = arith.addf %0, %6 : vector<56x128xf32>
    %c0_7 = arith.constant 0 : index
    %c1 = arith.constant 1 : index
    %c0_8 = arith.constant 0 : index
    %c0_9 = arith.constant 0 : index
    %8 = vector.load %arg2[%c0_7, %c1, %c0_8, %c0_9] : memref<1x10x8x64xbf16, #tpu.memory_space<vmem>>, vector<1x7x8x64xbf16>
    %9 = vector.shape_cast %8 : vector<1x7x8x64xbf16> to vector<7x8x64xbf16>
    %10 = vector.shape_cast %9 : vector<7x8x64xbf16> to vector<56x64xbf16>
    %c1_10 = arith.constant 1 : index
    %c0_11 = arith.constant 0 : index
    %c0_12 = arith.constant 0 : index
    %11 = vector.load %arg3[%c1_10, %c0_11, %c0_12] : memref<4x64x128xbf16, #tpu.memory_space<vmem>>, vector<1x64x128xbf16>
    %12 = vector.shape_cast %11 : vector<1x64x128xbf16> to vector<64x128xbf16>
    %cst_13 = arith.constant dense<0.000000e+00> : vector<56x128xf32>
    %13 = tpu.matmul %10, %12, %cst_13 {dimension_numbers = #tpu.dot_dimension_numbers<[1], [0], [0], [1], [0, 0, 1, 1], [], []>} : vector<56x64xbf16>, vector<64x128xbf16>, vector<56x128xf32> -> vector<56x128xf32>
    %14 = arith.addf %7, %13 : vector<56x128xf32>
    %c0_14 = arith.constant 0 : index
    %c2 = arith.constant 2 : index
    %c0_15 = arith.constant 0 : index
    %c0_16 = arith.constant 0 : index
    %15 = vector.load %arg2[%c0_14, %c2, %c0_15, %c0_16] : memref<1x10x8x64xbf16, #tpu.memory_space<vmem>>, vector<1x7x8x64xbf16>
    %16 = vector.shape_cast %15 : vector<1x7x8x64xbf16> to vector<7x8x64xbf16>
    %17 = vector.shape_cast %16 : vector<7x8x64xbf16> to vector<56x64xbf16>
    %c2_17 = arith.constant 2 : index
    %c0_18 = arith.constant 0 : index
    %c0_19 = arith.constant 0 : index
    %18 = vector.load %arg3[%c2_17, %c0_18, %c0_19] : memref<4x64x128xbf16, #tpu.memory_space<vmem>>, vector<1x64x128xbf16>
    %19 = vector.shape_cast %18 : vector<1x64x128xbf16> to vector<64x128xbf16>
    %cst_20 = arith.constant dense<0.000000e+00> : vector<56x128xf32>
    %20 = tpu.matmul %17, %19, %cst_20 {dimension_numbers = #tpu.dot_dimension_numbers<[1], [0], [0], [1], [0, 0, 1, 1], [], []>} : vector<56x64xbf16>, vector<64x128xbf16>, vector<56x128xf32> -> vector<56x128xf32>
    %21 = arith.addf %14, %20 : vector<56x128xf32>
    %c0_21 = arith.constant 0 : index
    %c3 = arith.constant 3 : index
    %c0_22 = arith.constant 0 : index
    %c0_23 = arith.constant 0 : index
    %22 = vector.load %arg2[%c0_21, %c3, %c0_22, %c0_23] : memref<1x10x8x64xbf16, #tpu.memory_space<vmem>>, vector<1x7x8x64xbf16>
    %23 = vector.shape_cast %22 : vector<1x7x8x64xbf16> to vector<7x8x64xbf16>
    %24 = vector.shape_cast %23 : vector<7x8x64xbf16> to vector<56x64xbf16>
    %c3_24 = arith.constant 3 : index
    %c0_25 = arith.constant 0 : index
    %c0_26 = arith.constant 0 : index
    %25 = vector.load %arg3[%c3_24, %c0_25, %c0_26] : memref<4x64x128xbf16, #tpu.memory_space<vmem>>, vector<1x64x128xbf16>
    %26 = vector.shape_cast %25 : vector<1x64x128xbf16> to vector<64x128xbf16>
    %cst_27 = arith.constant dense<0.000000e+00> : vector<56x128xf32>
    %27 = tpu.matmul %24, %26, %cst_27 {dimension_numbers = #tpu.dot_dimension_numbers<[1], [0], [0], [1], [0, 0, 1, 1], [], []>} : vector<56x64xbf16>, vector<64x128xbf16>, vector<56x128xf32> -> vector<56x128xf32>
    %28 = arith.addf %21, %27 : vector<56x128xf32>
    %c0_28 = arith.constant 0 : index
    %c0_29 = arith.constant 0 : index
    %c0_30 = arith.constant 0 : index
    %29 = vector.load %arg1[%c0_28, %c0_29, %c0_30] : memref<1x1x56xf32, #tpu.memory_space<vmem>>, vector<1x1x56xf32>
    %30 = vector.shape_cast %29 : vector<1x1x56xf32> to vector<1x56xf32>
    %cst_31 = arith.constant dense<0.000000e+00> : vector<1x128xf32>
    %31 = tpu.matmul %30, %28, %cst_31 {dimension_numbers = #tpu.dot_dimension_numbers<[1], [0], [0], [1], [0, 0, 1, 1], [], []>} : vector<1x56xf32>, vector<56x128xf32>, vector<1x128xf32> -> vector<1x128xf32>
    %32 = arith.mulf %28, %28 : vector<56x128xf32>
    %cst_32 = arith.constant dense<0.000000e+00> : vector<1x128xf32>
    %33 = tpu.matmul %30, %32, %cst_32 {dimension_numbers = #tpu.dot_dimension_numbers<[1], [0], [0], [1], [0, 0, 1, 1], [], []>} : vector<1x56xf32>, vector<56x128xf32>, vector<1x128xf32> -> vector<1x128xf32>
    %34 = tpu.concatenate %31, %33 in 0 : vector<1x128xf32>, vector<1x128xf32> -> vector<2x128xf32>
    %35 = vector.shape_cast %34 : vector<2x128xf32> to vector<1x2x128xf32>
    %c0_33 = arith.constant 0 : index
    %c0_34 = arith.constant 0 : index
    %c0_35 = arith.constant 0 : index
    %36 = vector.load %arg5[%c0_33, %c0_34, %c0_35] : memref<1x2x128xf32, #tpu.memory_space<vmem>>, vector<1x2x128xf32>
    tpu.vector_store %arg5[%c0_33, %c0_34, %c0_35], %35 {strides = array<i32>} : memref<1x2x128xf32, #tpu.memory_space<vmem>>, vector<1x2x128xf32>,
    %37 = vector.shape_cast %28 : vector<56x128xf32> to vector<1x7x8x128xf32>
    %c0_36 = arith.constant 0 : index
    %c0_37 = arith.constant 0 : index
    %c0_38 = arith.constant 0 : index
    %c0_39 = arith.constant 0 : index
    %38 = vector.load %arg4[%c0_36, %c0_37, %c0_38, %c0_39] : memref<1x7x8x128xf32, #tpu.memory_space<vmem>>, vector<1x7x8x128xf32>
    tpu.vector_store %arg4[%c0_36, %c0_37, %c0_38, %c0_39], %37 {strides = array<i32>} : memref<1x7x8x128xf32, #tpu.memory_space<vmem>>, vector<1x7x8x128xf32>,
    return
  }
  func.func @transform_0(%arg0: i32) -> (i32, i32, i32) {
    %c0_i32 = arith.constant 0 : i32
    %c0_i32_0 = arith.constant 0 : i32
    %c0_i32_1 = arith.constant 0 : i32
    return %arg0, %c0_i32, %c0_i32_0 : i32, i32, i32
  }
  func.func @transform_1(%arg0: i32) -> (i32, i32, i32, i32) {
    %c0_i32 = arith.constant 0 : i32
    %c0_i32_0 = arith.constant 0 : i32
    %c0_i32_1 = arith.constant 0 : i32
    %c0_i32_2 = arith.constant 0 : i32
    return %arg0, %c0_i32, %c0_i32_0, %c0_i32_1 : i32, i32, i32, i32
  }
  func.func @transform_2(%arg0: i32) -> (i32, i32, i32) {
    %c0_i32 = arith.constant 0 : i32
    %c0_i32_0 = arith.constant 0 : i32
    %c0_i32_1 = arith.constant 0 : i32
    %c0_i32_2 = arith.constant 0 : i32
    return %c0_i32, %c0_i32_0, %c0_i32_1 : i32, i32, i32
  }
  func.func @transform_3(%arg0: i32) -> (i32, i32, i32, i32) {
    %c0_i32 = arith.constant 0 : i32
    %c0_i32_0 = arith.constant 0 : i32
    %c0_i32_1 = arith.constant 0 : i32
    %c0_i32_2 = arith.constant 0 : i32
    return %arg0, %c0_i32, %c0_i32_0, %c0_i32_1 : i32, i32, i32, i32
  }
  func.func @transform_4(%arg0: i32) -> (i32, i32, i32) {
    %c0_i32 = arith.constant 0 : i32
    %c0_i32_0 = arith.constant 0 : i32
    %c0_i32_1 = arith.constant 0 : i32
    return %arg0, %c0_i32, %c0_i32_0 : i32, i32, i32
  }
}

module attributes {stable_mosaic.version = 11 : i64} {
  func.func @_bn_apply_kernel(%arg0: i32, %arg1: memref<1x6x8x128xf32, #tpu.memory_space<vmem>>, %arg2: memref<1x128xf32, #tpu.memory_space<vmem>>, %arg3: memref<1x128xf32, #tpu.memory_space<vmem>>, %arg4: memref<1x6x8x128xbf16, #tpu.memory_space<vmem>>) attributes {dimension_semantics = [#tpu.dimension_semantics<parallel>], iteration_bounds = array<i64: 2>, scalar_prefetch = 0 : i64, scratch_operands = 0 : i64, tpu.core_type = #tpu.core_type<tc>, window_params = [{transform_indices = @transform_0, window_bounds = array<i64: 1, 6, 8, 128>}, {pipeline_mode = #tpu.pipeline_mode<synchronous>, transform_indices = @transform_1, window_bounds = array<i64: 1, 128>}, {pipeline_mode = #tpu.pipeline_mode<synchronous>, transform_indices = @transform_2, window_bounds = array<i64: 1, 128>}, {transform_indices = @transform_3, window_bounds = array<i64: 1, 6, 8, 128>}]} {
    %c0 = arith.constant 0 : index
    %c0_0 = arith.constant 0 : index
    %c0_1 = arith.constant 0 : index
    %c0_2 = arith.constant 0 : index
    %0 = vector.load %arg1[%c0, %c0_0, %c0_1, %c0_2] : memref<1x6x8x128xf32, #tpu.memory_space<vmem>>, vector<1x6x8x128xf32>
    %c0_3 = arith.constant 0 : index
    %c0_4 = arith.constant 0 : index
    %1 = vector.load %arg2[%c0_3, %c0_4] : memref<1x128xf32, #tpu.memory_space<vmem>>, vector<1x128xf32>
    %2 = vector.shape_cast %1 : vector<1x128xf32> to vector<1x1x1x128xf32>
    %3 = vector.broadcast %2 : vector<1x1x1x128xf32> to vector<1x6x8x128xf32>
    %4 = arith.mulf %0, %3 : vector<1x6x8x128xf32>
    %c0_5 = arith.constant 0 : index
    %c0_6 = arith.constant 0 : index
    %5 = vector.load %arg3[%c0_5, %c0_6] : memref<1x128xf32, #tpu.memory_space<vmem>>, vector<1x128xf32>
    %6 = vector.shape_cast %5 : vector<1x128xf32> to vector<1x1x1x128xf32>
    %7 = vector.broadcast %6 : vector<1x1x1x128xf32> to vector<1x6x8x128xf32>
    %8 = arith.addf %4, %7 : vector<1x6x8x128xf32>
    %cst = arith.constant 2.000000e-01 : f32
    %9 = vector.broadcast %cst : f32 to vector<1x6x8x128xf32>
    %10 = arith.mulf %9, %8 : vector<1x6x8x128xf32>
    %11 = arith.maximumf %8, %10 : vector<1x6x8x128xf32>
    %12 = arith.truncf %11 : vector<1x6x8x128xf32> to vector<1x6x8x128xbf16>
    %c0_7 = arith.constant 0 : index
    %c0_8 = arith.constant 0 : index
    %c0_9 = arith.constant 0 : index
    %c0_10 = arith.constant 0 : index
    %13 = vector.load %arg4[%c0_7, %c0_8, %c0_9, %c0_10] : memref<1x6x8x128xbf16, #tpu.memory_space<vmem>>, vector<1x6x8x128xbf16>
    tpu.vector_store %arg4[%c0_7, %c0_8, %c0_9, %c0_10], %12 {strides = array<i32>} : memref<1x6x8x128xbf16, #tpu.memory_space<vmem>>, vector<1x6x8x128xbf16>,
    return
  }
  func.func @transform_0(%arg0: i32) -> (i32, i32, i32, i32) {
    %c0_i32 = arith.constant 0 : i32
    %c0_i32_0 = arith.constant 0 : i32
    %c0_i32_1 = arith.constant 0 : i32
    %c0_i32_2 = arith.constant 0 : i32
    return %arg0, %c0_i32, %c0_i32_0, %c0_i32_1 : i32, i32, i32, i32
  }
  func.func @transform_1(%arg0: i32) -> (i32, i32) {
    %c0_i32 = arith.constant 0 : i32
    %c0_i32_0 = arith.constant 0 : i32
    %c0_i32_1 = arith.constant 0 : i32
    return %c0_i32, %c0_i32_0 : i32, i32
  }
  func.func @transform_2(%arg0: i32) -> (i32, i32) {
    %c0_i32 = arith.constant 0 : i32
    %c0_i32_0 = arith.constant 0 : i32
    %c0_i32_1 = arith.constant 0 : i32
    return %c0_i32, %c0_i32_0 : i32, i32
  }
  func.func @transform_3(%arg0: i32) -> (i32, i32, i32, i32) {
    %c0_i32 = arith.constant 0 : i32
    %c0_i32_0 = arith.constant 0 : i32
    %c0_i32_1 = arith.constant 0 : i32
    %c0_i32_2 = arith.constant 0 : i32
    return %arg0, %c0_i32, %c0_i32_0, %c0_i32_1 : i32, i32, i32, i32
  }
}

module attributes {stable_mosaic.version = 11 : i64} {
  func.func @kernel(%arg0: i32, %arg1: memref<1x1x48xf32, #tpu.memory_space<vmem>>, %arg2: memref<1x9x8x128xbf16, #tpu.memory_space<vmem>>, %arg3: memref<4x128x128xbf16, #tpu.memory_space<vmem>>, %arg4: memref<1x6x8x128xf32, #tpu.memory_space<vmem>>, %arg5: memref<1x2x128xf32, #tpu.memory_space<vmem>>) attributes {dimension_semantics = [#tpu.dimension_semantics<parallel>], iteration_bounds = array<i64: 2>, scalar_prefetch = 0 : i64, scratch_operands = 0 : i64, tpu.core_type = #tpu.core_type<tc>, window_params = [{transform_indices = @transform_0, window_bounds = array<i64: 1, 1, 48>}, {transform_indices = @transform_1, window_bounds = array<i64: 1, 9, 8, 128>}, {pipeline_mode = #tpu.pipeline_mode<synchronous>, transform_indices = @transform_2, window_bounds = array<i64: 4, 128, 128>}, {transform_indices = @transform_3, window_bounds = array<i64: 1, 6, 8, 128>}, {transform_indices = @transform_4, window_bounds = array<i64: 1, 2, 128>}]} {
    %cst = arith.constant 0.000000e+00 : f32
    %0 = vector.broadcast %cst : f32 to vector<48x128xf32>
    %c0 = arith.constant 0 : index
    %c0_0 = arith.constant 0 : index
    %c0_1 = arith.constant 0 : index
    %c0_2 = arith.constant 0 : index
    %1 = vector.load %arg2[%c0, %c0_0, %c0_1, %c0_2] : memref<1x9x8x128xbf16, #tpu.memory_space<vmem>>, vector<1x6x8x128xbf16>
    %2 = vector.shape_cast %1 : vector<1x6x8x128xbf16> to vector<6x8x128xbf16>
    %3 = vector.shape_cast %2 : vector<6x8x128xbf16> to vector<48x128xbf16>
    %c0_3 = arith.constant 0 : index
    %c0_4 = arith.constant 0 : index
    %c0_5 = arith.constant 0 : index
    %4 = vector.load %arg3[%c0_3, %c0_4, %c0_5] : memref<4x128x128xbf16, #tpu.memory_space<vmem>>, vector<1x128x128xbf16>
    %5 = vector.shape_cast %4 : vector<1x128x128xbf16> to vector<128x128xbf16>
    %cst_6 = arith.constant dense<0.000000e+00> : vector<48x128xf32>
    %6 = tpu.matmul %3, %5, %cst_6 {dimension_numbers = #tpu.dot_dimension_numbers<[1], [0], [0], [1], [0, 0, 1, 1], [], []>} : vector<48x128xbf16>, vector<128x128xbf16>, vector<48x128xf32> -> vector<48x128xf32>
    %7 = arith.addf %0, %6 : vector<48x128xf32>
    %c0_7 = arith.constant 0 : index
    %c1 = arith.constant 1 : index
    %c0_8 = arith.constant 0 : index
    %c0_9 = arith.constant 0 : index
    %8 = vector.load %arg2[%c0_7, %c1, %c0_8, %c0_9] : memref<1x9x8x128xbf16, #tpu.memory_space<vmem>>, vector<1x6x8x128xbf16>
    %9 = vector.shape_cast %8 : vector<1x6x8x128xbf16> to vector<6x8x128xbf16>
    %10 = vector.shape_cast %9 : vector<6x8x128xbf16> to vector<48x128xbf16>
    %c1_10 = arith.constant 1 : index
    %c0_11 = arith.constant 0 : index
    %c0_12 = arith.constant 0 : index
    %11 = vector.load %arg3[%c1_10, %c0_11, %c0_12] : memref<4x128x128xbf16, #tpu.memory_space<vmem>>, vector<1x128x128xbf16>
    %12 = vector.shape_cast %11 : vector<1x128x128xbf16> to vector<128x128xbf16>
    %cst_13 = arith.constant dense<0.000000e+00> : vector<48x128xf32>
    %13 = tpu.matmul %10, %12, %cst_13 {dimension_numbers = #tpu.dot_dimension_numbers<[1], [0], [0], [1], [0, 0, 1, 1], [], []>} : vector<48x128xbf16>, vector<128x128xbf16>, vector<48x128xf32> -> vector<48x128xf32>
    %14 = arith.addf %7, %13 : vector<48x128xf32>
    %c0_14 = arith.constant 0 : index
    %c2 = arith.constant 2 : index
    %c0_15 = arith.constant 0 : index
    %c0_16 = arith.constant 0 : index
    %15 = vector.load %arg2[%c0_14, %c2, %c0_15, %c0_16] : memref<1x9x8x128xbf16, #tpu.memory_space<vmem>>, vector<1x6x8x128xbf16>
    %16 = vector.shape_cast %15 : vector<1x6x8x128xbf16> to vector<6x8x128xbf16>
    %17 = vector.shape_cast %16 : vector<6x8x128xbf16> to vector<48x128xbf16>
    %c2_17 = arith.constant 2 : index
    %c0_18 = arith.constant 0 : index
    %c0_19 = arith.constant 0 : index
    %18 = vector.load %arg3[%c2_17, %c0_18, %c0_19] : memref<4x128x128xbf16, #tpu.memory_space<vmem>>, vector<1x128x128xbf16>
    %19 = vector.shape_cast %18 : vector<1x128x128xbf16> to vector<128x128xbf16>
    %cst_20 = arith.constant dense<0.000000e+00> : vector<48x128xf32>
    %20 = tpu.matmul %17, %19, %cst_20 {dimension_numbers = #tpu.dot_dimension_numbers<[1], [0], [0], [1], [0, 0, 1, 1], [], []>} : vector<48x128xbf16>, vector<128x128xbf16>, vector<48x128xf32> -> vector<48x128xf32>
    %21 = arith.addf %14, %20 : vector<48x128xf32>
    %c0_21 = arith.constant 0 : index
    %c3 = arith.constant 3 : index
    %c0_22 = arith.constant 0 : index
    %c0_23 = arith.constant 0 : index
    %22 = vector.load %arg2[%c0_21, %c3, %c0_22, %c0_23] : memref<1x9x8x128xbf16, #tpu.memory_space<vmem>>, vector<1x6x8x128xbf16>
    %23 = vector.shape_cast %22 : vector<1x6x8x128xbf16> to vector<6x8x128xbf16>
    %24 = vector.shape_cast %23 : vector<6x8x128xbf16> to vector<48x128xbf16>
    %c3_24 = arith.constant 3 : index
    %c0_25 = arith.constant 0 : index
    %c0_26 = arith.constant 0 : index
    %25 = vector.load %arg3[%c3_24, %c0_25, %c0_26] : memref<4x128x128xbf16, #tpu.memory_space<vmem>>, vector<1x128x128xbf16>
    %26 = vector.shape_cast %25 : vector<1x128x128xbf16> to vector<128x128xbf16>
    %cst_27 = arith.constant dense<0.000000e+00> : vector<48x128xf32>
    %27 = tpu.matmul %24, %26, %cst_27 {dimension_numbers = #tpu.dot_dimension_numbers<[1], [0], [0], [1], [0, 0, 1, 1], [], []>} : vector<48x128xbf16>, vector<128x128xbf16>, vector<48x128xf32> -> vector<48x128xf32>
    %28 = arith.addf %21, %27 : vector<48x128xf32>
    %c0_28 = arith.constant 0 : index
    %c0_29 = arith.constant 0 : index
    %c0_30 = arith.constant 0 : index
    %29 = vector.load %arg1[%c0_28, %c0_29, %c0_30] : memref<1x1x48xf32, #tpu.memory_space<vmem>>, vector<1x1x48xf32>
    %30 = vector.shape_cast %29 : vector<1x1x48xf32> to vector<1x48xf32>
    %cst_31 = arith.constant dense<0.000000e+00> : vector<1x128xf32>
    %31 = tpu.matmul %30, %28, %cst_31 {dimension_numbers = #tpu.dot_dimension_numbers<[1], [0], [0], [1], [0, 0, 1, 1], [], []>} : vector<1x48xf32>, vector<48x128xf32>, vector<1x128xf32> -> vector<1x128xf32>
    %32 = arith.mulf %28, %28 : vector<48x128xf32>
    %cst_32 = arith.constant dense<0.000000e+00> : vector<1x128xf32>
    %33 = tpu.matmul %30, %32, %cst_32 {dimension_numbers = #tpu.dot_dimension_numbers<[1], [0], [0], [1], [0, 0, 1, 1], [], []>} : vector<1x48xf32>, vector<48x128xf32>, vector<1x128xf32> -> vector<1x128xf32>
    %34 = tpu.concatenate %31, %33 in 0 : vector<1x128xf32>, vector<1x128xf32> -> vector<2x128xf32>
    %35 = vector.shape_cast %34 : vector<2x128xf32> to vector<1x2x128xf32>
    %c0_33 = arith.constant 0 : index
    %c0_34 = arith.constant 0 : index
    %c0_35 = arith.constant 0 : index
    %36 = vector.load %arg5[%c0_33, %c0_34, %c0_35] : memref<1x2x128xf32, #tpu.memory_space<vmem>>, vector<1x2x128xf32>
    tpu.vector_store %arg5[%c0_33, %c0_34, %c0_35], %35 {strides = array<i32>} : memref<1x2x128xf32, #tpu.memory_space<vmem>>, vector<1x2x128xf32>,
    %37 = vector.shape_cast %28 : vector<48x128xf32> to vector<1x6x8x128xf32>
    %c0_36 = arith.constant 0 : index
    %c0_37 = arith.constant 0 : index
    %c0_38 = arith.constant 0 : index
    %c0_39 = arith.constant 0 : index
    %38 = vector.load %arg4[%c0_36, %c0_37, %c0_38, %c0_39] : memref<1x6x8x128xf32, #tpu.memory_space<vmem>>, vector<1x6x8x128xf32>
    tpu.vector_store %arg4[%c0_36, %c0_37, %c0_38, %c0_39], %37 {strides = array<i32>} : memref<1x6x8x128xf32, #tpu.memory_space<vmem>>, vector<1x6x8x128xf32>,
    return
  }
  func.func @transform_0(%arg0: i32) -> (i32, i32, i32) {
    %c0_i32 = arith.constant 0 : i32
    %c0_i32_0 = arith.constant 0 : i32
    %c0_i32_1 = arith.constant 0 : i32
    return %arg0, %c0_i32, %c0_i32_0 : i32, i32, i32
  }
  func.func @transform_1(%arg0: i32) -> (i32, i32, i32, i32) {
    %c0_i32 = arith.constant 0 : i32
    %c0_i32_0 = arith.constant 0 : i32
    %c0_i32_1 = arith.constant 0 : i32
    %c0_i32_2 = arith.constant 0 : i32
    return %arg0, %c0_i32, %c0_i32_0, %c0_i32_1 : i32, i32, i32, i32
  }
  func.func @transform_2(%arg0: i32) -> (i32, i32, i32) {
    %c0_i32 = arith.constant 0 : i32
    %c0_i32_0 = arith.constant 0 : i32
    %c0_i32_1 = arith.constant 0 : i32
    %c0_i32_2 = arith.constant 0 : i32
    return %c0_i32, %c0_i32_0, %c0_i32_1 : i32, i32, i32
  }
  func.func @transform_3(%arg0: i32) -> (i32, i32, i32, i32) {
    %c0_i32 = arith.constant 0 : i32
    %c0_i32_0 = arith.constant 0 : i32
    %c0_i32_1 = arith.constant 0 : i32
    %c0_i32_2 = arith.constant 0 : i32
    return %arg0, %c0_i32, %c0_i32_0, %c0_i32_1 : i32, i32, i32, i32
  }
  func.func @transform_4(%arg0: i32) -> (i32, i32, i32) {
    %c0_i32 = arith.constant 0 : i32
    %c0_i32_0 = arith.constant 0 : i32
    %c0_i32_1 = arith.constant 0 : i32
    return %arg0, %c0_i32, %c0_i32_0 : i32, i32, i32
  }
}

module attributes {stable_mosaic.version = 11 : i64} {
  func.func @_bn_apply_kernel(%arg0: i32, %arg1: memref<1x5x8x128xf32, #tpu.memory_space<vmem>>, %arg2: memref<1x128xf32, #tpu.memory_space<vmem>>, %arg3: memref<1x128xf32, #tpu.memory_space<vmem>>, %arg4: memref<1x5x8x128xbf16, #tpu.memory_space<vmem>>) attributes {dimension_semantics = [#tpu.dimension_semantics<parallel>], iteration_bounds = array<i64: 2>, scalar_prefetch = 0 : i64, scratch_operands = 0 : i64, tpu.core_type = #tpu.core_type<tc>, window_params = [{transform_indices = @transform_0, window_bounds = array<i64: 1, 5, 8, 128>}, {pipeline_mode = #tpu.pipeline_mode<synchronous>, transform_indices = @transform_1, window_bounds = array<i64: 1, 128>}, {pipeline_mode = #tpu.pipeline_mode<synchronous>, transform_indices = @transform_2, window_bounds = array<i64: 1, 128>}, {transform_indices = @transform_3, window_bounds = array<i64: 1, 5, 8, 128>}]} {
    %c0 = arith.constant 0 : index
    %c0_0 = arith.constant 0 : index
    %c0_1 = arith.constant 0 : index
    %c0_2 = arith.constant 0 : index
    %0 = vector.load %arg1[%c0, %c0_0, %c0_1, %c0_2] : memref<1x5x8x128xf32, #tpu.memory_space<vmem>>, vector<1x5x8x128xf32>
    %c0_3 = arith.constant 0 : index
    %c0_4 = arith.constant 0 : index
    %1 = vector.load %arg2[%c0_3, %c0_4] : memref<1x128xf32, #tpu.memory_space<vmem>>, vector<1x128xf32>
    %2 = vector.shape_cast %1 : vector<1x128xf32> to vector<1x1x1x128xf32>
    %3 = vector.broadcast %2 : vector<1x1x1x128xf32> to vector<1x5x8x128xf32>
    %4 = arith.mulf %0, %3 : vector<1x5x8x128xf32>
    %c0_5 = arith.constant 0 : index
    %c0_6 = arith.constant 0 : index
    %5 = vector.load %arg3[%c0_5, %c0_6] : memref<1x128xf32, #tpu.memory_space<vmem>>, vector<1x128xf32>
    %6 = vector.shape_cast %5 : vector<1x128xf32> to vector<1x1x1x128xf32>
    %7 = vector.broadcast %6 : vector<1x1x1x128xf32> to vector<1x5x8x128xf32>
    %8 = arith.addf %4, %7 : vector<1x5x8x128xf32>
    %cst = arith.constant 2.000000e-01 : f32
    %9 = vector.broadcast %cst : f32 to vector<1x5x8x128xf32>
    %10 = arith.mulf %9, %8 : vector<1x5x8x128xf32>
    %11 = arith.maximumf %8, %10 : vector<1x5x8x128xf32>
    %12 = arith.truncf %11 : vector<1x5x8x128xf32> to vector<1x5x8x128xbf16>
    %c0_7 = arith.constant 0 : index
    %c0_8 = arith.constant 0 : index
    %c0_9 = arith.constant 0 : index
    %c0_10 = arith.constant 0 : index
    %13 = vector.load %arg4[%c0_7, %c0_8, %c0_9, %c0_10] : memref<1x5x8x128xbf16, #tpu.memory_space<vmem>>, vector<1x5x8x128xbf16>
    tpu.vector_store %arg4[%c0_7, %c0_8, %c0_9, %c0_10], %12 {strides = array<i32>} : memref<1x5x8x128xbf16, #tpu.memory_space<vmem>>, vector<1x5x8x128xbf16>,
    return
  }
  func.func @transform_0(%arg0: i32) -> (i32, i32, i32, i32) {
    %c0_i32 = arith.constant 0 : i32
    %c0_i32_0 = arith.constant 0 : i32
    %c0_i32_1 = arith.constant 0 : i32
    %c0_i32_2 = arith.constant 0 : i32
    return %arg0, %c0_i32, %c0_i32_0, %c0_i32_1 : i32, i32, i32, i32
  }
  func.func @transform_1(%arg0: i32) -> (i32, i32) {
    %c0_i32 = arith.constant 0 : i32
    %c0_i32_0 = arith.constant 0 : i32
    %c0_i32_1 = arith.constant 0 : i32
    return %c0_i32, %c0_i32_0 : i32, i32
  }
  func.func @transform_2(%arg0: i32) -> (i32, i32) {
    %c0_i32 = arith.constant 0 : i32
    %c0_i32_0 = arith.constant 0 : i32
    %c0_i32_1 = arith.constant 0 : i32
    return %c0_i32, %c0_i32_0 : i32, i32
  }
  func.func @transform_3(%arg0: i32) -> (i32, i32, i32, i32) {
    %c0_i32 = arith.constant 0 : i32
    %c0_i32_0 = arith.constant 0 : i32
    %c0_i32_1 = arith.constant 0 : i32
    %c0_i32_2 = arith.constant 0 : i32
    return %arg0, %c0_i32, %c0_i32_0, %c0_i32_1 : i32, i32, i32, i32
  }
}

module attributes {stable_mosaic.version = 11 : i64} {
  func.func @kernel(%arg0: i32, %arg1: memref<1x1x40xf32, #tpu.memory_space<vmem>>, %arg2: memref<1x8x8x256xbf16, #tpu.memory_space<vmem>>, %arg3: memref<4x256x128xbf16, #tpu.memory_space<vmem>>, %arg4: memref<1x5x8x128xf32, #tpu.memory_space<vmem>>, %arg5: memref<1x2x128xf32, #tpu.memory_space<vmem>>) attributes {dimension_semantics = [#tpu.dimension_semantics<parallel>], iteration_bounds = array<i64: 2>, scalar_prefetch = 0 : i64, scratch_operands = 0 : i64, tpu.core_type = #tpu.core_type<tc>, window_params = [{transform_indices = @transform_0, window_bounds = array<i64: 1, 1, 40>}, {transform_indices = @transform_1, window_bounds = array<i64: 1, 8, 8, 256>}, {pipeline_mode = #tpu.pipeline_mode<synchronous>, transform_indices = @transform_2, window_bounds = array<i64: 4, 256, 128>}, {transform_indices = @transform_3, window_bounds = array<i64: 1, 5, 8, 128>}, {transform_indices = @transform_4, window_bounds = array<i64: 1, 2, 128>}]} {
    %cst = arith.constant 0.000000e+00 : f32
    %0 = vector.broadcast %cst : f32 to vector<40x128xf32>
    %c0 = arith.constant 0 : index
    %c0_0 = arith.constant 0 : index
    %c0_1 = arith.constant 0 : index
    %c0_2 = arith.constant 0 : index
    %1 = vector.load %arg2[%c0, %c0_0, %c0_1, %c0_2] : memref<1x8x8x256xbf16, #tpu.memory_space<vmem>>, vector<1x5x8x256xbf16>
    %2 = vector.shape_cast %1 : vector<1x5x8x256xbf16> to vector<5x8x256xbf16>
    %3 = vector.shape_cast %2 : vector<5x8x256xbf16> to vector<40x256xbf16>
    %c0_3 = arith.constant 0 : index
    %c0_4 = arith.constant 0 : index
    %c0_5 = arith.constant 0 : index
    %4 = vector.load %arg3[%c0_3, %c0_4, %c0_5] : memref<4x256x128xbf16, #tpu.memory_space<vmem>>, vector<1x256x128xbf16>
    %5 = vector.shape_cast %4 : vector<1x256x128xbf16> to vector<256x128xbf16>
    %cst_6 = arith.constant dense<0.000000e+00> : vector<40x128xf32>
    %6 = tpu.matmul %3, %5, %cst_6 {dimension_numbers = #tpu.dot_dimension_numbers<[1], [0], [0], [1], [0, 0, 1, 1], [], []>} : vector<40x256xbf16>, vector<256x128xbf16>, vector<40x128xf32> -> vector<40x128xf32>
    %7 = arith.addf %0, %6 : vector<40x128xf32>
    %c0_7 = arith.constant 0 : index
    %c1 = arith.constant 1 : index
    %c0_8 = arith.constant 0 : index
    %c0_9 = arith.constant 0 : index
    %8 = vector.load %arg2[%c0_7, %c1, %c0_8, %c0_9] : memref<1x8x8x256xbf16, #tpu.memory_space<vmem>>, vector<1x5x8x256xbf16>
    %9 = vector.shape_cast %8 : vector<1x5x8x256xbf16> to vector<5x8x256xbf16>
    %10 = vector.shape_cast %9 : vector<5x8x256xbf16> to vector<40x256xbf16>
    %c1_10 = arith.constant 1 : index
    %c0_11 = arith.constant 0 : index
    %c0_12 = arith.constant 0 : index
    %11 = vector.load %arg3[%c1_10, %c0_11, %c0_12] : memref<4x256x128xbf16, #tpu.memory_space<vmem>>, vector<1x256x128xbf16>
    %12 = vector.shape_cast %11 : vector<1x256x128xbf16> to vector<256x128xbf16>
    %cst_13 = arith.constant dense<0.000000e+00> : vector<40x128xf32>
    %13 = tpu.matmul %10, %12, %cst_13 {dimension_numbers = #tpu.dot_dimension_numbers<[1], [0], [0], [1], [0, 0, 1, 1], [], []>} : vector<40x256xbf16>, vector<256x128xbf16>, vector<40x128xf32> -> vector<40x128xf32>
    %14 = arith.addf %7, %13 : vector<40x128xf32>
    %c0_14 = arith.constant 0 : index
    %c2 = arith.constant 2 : index
    %c0_15 = arith.constant 0 : index
    %c0_16 = arith.constant 0 : index
    %15 = vector.load %arg2[%c0_14, %c2, %c0_15, %c0_16] : memref<1x8x8x256xbf16, #tpu.memory_space<vmem>>, vector<1x5x8x256xbf16>
    %16 = vector.shape_cast %15 : vector<1x5x8x256xbf16> to vector<5x8x256xbf16>
    %17 = vector.shape_cast %16 : vector<5x8x256xbf16> to vector<40x256xbf16>
    %c2_17 = arith.constant 2 : index
    %c0_18 = arith.constant 0 : index
    %c0_19 = arith.constant 0 : index
    %18 = vector.load %arg3[%c2_17, %c0_18, %c0_19] : memref<4x256x128xbf16, #tpu.memory_space<vmem>>, vector<1x256x128xbf16>
    %19 = vector.shape_cast %18 : vector<1x256x128xbf16> to vector<256x128xbf16>
    %cst_20 = arith.constant dense<0.000000e+00> : vector<40x128xf32>
    %20 = tpu.matmul %17, %19, %cst_20 {dimension_numbers = #tpu.dot_dimension_numbers<[1], [0], [0], [1], [0, 0, 1, 1], [], []>} : vector<40x256xbf16>, vector<256x128xbf16>, vector<40x128xf32> -> vector<40x128xf32>
    %21 = arith.addf %14, %20 : vector<40x128xf32>
    %c0_21 = arith.constant 0 : index
    %c3 = arith.constant 3 : index
    %c0_22 = arith.constant 0 : index
    %c0_23 = arith.constant 0 : index
    %22 = vector.load %arg2[%c0_21, %c3, %c0_22, %c0_23] : memref<1x8x8x256xbf16, #tpu.memory_space<vmem>>, vector<1x5x8x256xbf16>
    %23 = vector.shape_cast %22 : vector<1x5x8x256xbf16> to vector<5x8x256xbf16>
    %24 = vector.shape_cast %23 : vector<5x8x256xbf16> to vector<40x256xbf16>
    %c3_24 = arith.constant 3 : index
    %c0_25 = arith.constant 0 : index
    %c0_26 = arith.constant 0 : index
    %25 = vector.load %arg3[%c3_24, %c0_25, %c0_26] : memref<4x256x128xbf16, #tpu.memory_space<vmem>>, vector<1x256x128xbf16>
    %26 = vector.shape_cast %25 : vector<1x256x128xbf16> to vector<256x128xbf16>
    %cst_27 = arith.constant dense<0.000000e+00> : vector<40x128xf32>
    %27 = tpu.matmul %24, %26, %cst_27 {dimension_numbers = #tpu.dot_dimension_numbers<[1], [0], [0], [1], [0, 0, 1, 1], [], []>} : vector<40x256xbf16>, vector<256x128xbf16>, vector<40x128xf32> -> vector<40x128xf32>
    %28 = arith.addf %21, %27 : vector<40x128xf32>
    %c0_28 = arith.constant 0 : index
    %c0_29 = arith.constant 0 : index
    %c0_30 = arith.constant 0 : index
    %29 = vector.load %arg1[%c0_28, %c0_29, %c0_30] : memref<1x1x40xf32, #tpu.memory_space<vmem>>, vector<1x1x40xf32>
    %30 = vector.shape_cast %29 : vector<1x1x40xf32> to vector<1x40xf32>
    %cst_31 = arith.constant dense<0.000000e+00> : vector<1x128xf32>
    %31 = tpu.matmul %30, %28, %cst_31 {dimension_numbers = #tpu.dot_dimension_numbers<[1], [0], [0], [1], [0, 0, 1, 1], [], []>} : vector<1x40xf32>, vector<40x128xf32>, vector<1x128xf32> -> vector<1x128xf32>
    %32 = arith.mulf %28, %28 : vector<40x128xf32>
    %cst_32 = arith.constant dense<0.000000e+00> : vector<1x128xf32>
    %33 = tpu.matmul %30, %32, %cst_32 {dimension_numbers = #tpu.dot_dimension_numbers<[1], [0], [0], [1], [0, 0, 1, 1], [], []>} : vector<1x40xf32>, vector<40x128xf32>, vector<1x128xf32> -> vector<1x128xf32>
    %34 = tpu.concatenate %31, %33 in 0 : vector<1x128xf32>, vector<1x128xf32> -> vector<2x128xf32>
    %35 = vector.shape_cast %34 : vector<2x128xf32> to vector<1x2x128xf32>
    %c0_33 = arith.constant 0 : index
    %c0_34 = arith.constant 0 : index
    %c0_35 = arith.constant 0 : index
    %36 = vector.load %arg5[%c0_33, %c0_34, %c0_35] : memref<1x2x128xf32, #tpu.memory_space<vmem>>, vector<1x2x128xf32>
    tpu.vector_store %arg5[%c0_33, %c0_34, %c0_35], %35 {strides = array<i32>} : memref<1x2x128xf32, #tpu.memory_space<vmem>>, vector<1x2x128xf32>,
    %37 = vector.shape_cast %28 : vector<40x128xf32> to vector<1x5x8x128xf32>
    %c0_36 = arith.constant 0 : index
    %c0_37 = arith.constant 0 : index
    %c0_38 = arith.constant 0 : index
    %c0_39 = arith.constant 0 : index
    %38 = vector.load %arg4[%c0_36, %c0_37, %c0_38, %c0_39] : memref<1x5x8x128xf32, #tpu.memory_space<vmem>>, vector<1x5x8x128xf32>
    tpu.vector_store %arg4[%c0_36, %c0_37, %c0_38, %c0_39], %37 {strides = array<i32>} : memref<1x5x8x128xf32, #tpu.memory_space<vmem>>, vector<1x5x8x128xf32>,
    return
  }
  func.func @transform_0(%arg0: i32) -> (i32, i32, i32) {
    %c0_i32 = arith.constant 0 : i32
    %c0_i32_0 = arith.constant 0 : i32
    %c0_i32_1 = arith.constant 0 : i32
    return %arg0, %c0_i32, %c0_i32_0 : i32, i32, i32
  }
  func.func @transform_1(%arg0: i32) -> (i32, i32, i32, i32) {
    %c0_i32 = arith.constant 0 : i32
    %c0_i32_0 = arith.constant 0 : i32
    %c0_i32_1 = arith.constant 0 : i32
    %c0_i32_2 = arith.constant 0 : i32
    return %arg0, %c0_i32, %c0_i32_0, %c0_i32_1 : i32, i32, i32, i32
  }
  func.func @transform_2(%arg0: i32) -> (i32, i32, i32) {
    %c0_i32 = arith.constant 0 : i32
    %c0_i32_0 = arith.constant 0 : i32
    %c0_i32_1 = arith.constant 0 : i32
    %c0_i32_2 = arith.constant 0 : i32
    return %c0_i32, %c0_i32_0, %c0_i32_1 : i32, i32, i32
  }
  func.func @transform_3(%arg0: i32) -> (i32, i32, i32, i32) {
    %c0_i32 = arith.constant 0 : i32
    %c0_i32_0 = arith.constant 0 : i32
    %c0_i32_1 = arith.constant 0 : i32
    %c0_i32_2 = arith.constant 0 : i32
    return %arg0, %c0_i32, %c0_i32_0, %c0_i32_1 : i32, i32, i32, i32
  }
  func.func @transform_4(%arg0: i32) -> (i32, i32, i32) {
    %c0_i32 = arith.constant 0 : i32
    %c0_i32_0 = arith.constant 0 : i32
    %c0_i32_1 = arith.constant 0 : i32
    return %arg0, %c0_i32, %c0_i32_0 : i32, i32, i32
  }
}

module attributes {stable_mosaic.version = 11 : i64} {
  func.func @kernel(%arg0: i32, %arg1: memref<1x7x8x512xbf16, #tpu.memory_space<vmem>>, %arg2: memref<4x512x128xbf16, #tpu.memory_space<vmem>>, %arg3: memref<1x128xf32, #tpu.memory_space<vmem>>, %arg4: memref<1x4x8x128xf32, #tpu.memory_space<vmem>>) attributes {dimension_semantics = [#tpu.dimension_semantics<parallel>], iteration_bounds = array<i64: 2>, scalar_prefetch = 0 : i64, scratch_operands = 0 : i64, tpu.core_type = #tpu.core_type<tc>, window_params = [{transform_indices = @transform_0, window_bounds = array<i64: 1, 7, 8, 512>}, {pipeline_mode = #tpu.pipeline_mode<synchronous>, transform_indices = @transform_1, window_bounds = array<i64: 4, 512, 128>}, {pipeline_mode = #tpu.pipeline_mode<synchronous>, transform_indices = @transform_2, window_bounds = array<i64: 1, 128>}, {transform_indices = @transform_3, window_bounds = array<i64: 1, 4, 8, 128>}]} {
    %cst = arith.constant 0.000000e+00 : f32
    %0 = vector.broadcast %cst : f32 to vector<32x128xf32>
    %c0 = arith.constant 0 : index
    %c0_0 = arith.constant 0 : index
    %c0_1 = arith.constant 0 : index
    %c0_2 = arith.constant 0 : index
    %1 = vector.load %arg1[%c0, %c0_0, %c0_1, %c0_2] : memref<1x7x8x512xbf16, #tpu.memory_space<vmem>>, vector<1x4x8x512xbf16>
    %2 = vector.shape_cast %1 : vector<1x4x8x512xbf16> to vector<4x8x512xbf16>
    %3 = vector.shape_cast %2 : vector<4x8x512xbf16> to vector<32x512xbf16>
    %c0_3 = arith.constant 0 : index
    %c0_4 = arith.constant 0 : index
    %c0_5 = arith.constant 0 : index
    %4 = vector.load %arg2[%c0_3, %c0_4, %c0_5] : memref<4x512x128xbf16, #tpu.memory_space<vmem>>, vector<1x512x128xbf16>
    %5 = vector.shape_cast %4 : vector<1x512x128xbf16> to vector<512x128xbf16>
    %cst_6 = arith.constant dense<0.000000e+00> : vector<32x128xf32>
    %6 = tpu.matmul %3, %5, %cst_6 {dimension_numbers = #tpu.dot_dimension_numbers<[1], [0], [0], [1], [0, 0, 1, 1], [], []>} : vector<32x512xbf16>, vector<512x128xbf16>, vector<32x128xf32> -> vector<32x128xf32>
    %7 = arith.addf %0, %6 : vector<32x128xf32>
    %c0_7 = arith.constant 0 : index
    %c1 = arith.constant 1 : index
    %c0_8 = arith.constant 0 : index
    %c0_9 = arith.constant 0 : index
    %8 = vector.load %arg1[%c0_7, %c1, %c0_8, %c0_9] : memref<1x7x8x512xbf16, #tpu.memory_space<vmem>>, vector<1x4x8x512xbf16>
    %9 = vector.shape_cast %8 : vector<1x4x8x512xbf16> to vector<4x8x512xbf16>
    %10 = vector.shape_cast %9 : vector<4x8x512xbf16> to vector<32x512xbf16>
    %c1_10 = arith.constant 1 : index
    %c0_11 = arith.constant 0 : index
    %c0_12 = arith.constant 0 : index
    %11 = vector.load %arg2[%c1_10, %c0_11, %c0_12] : memref<4x512x128xbf16, #tpu.memory_space<vmem>>, vector<1x512x128xbf16>
    %12 = vector.shape_cast %11 : vector<1x512x128xbf16> to vector<512x128xbf16>
    %cst_13 = arith.constant dense<0.000000e+00> : vector<32x128xf32>
    %13 = tpu.matmul %10, %12, %cst_13 {dimension_numbers = #tpu.dot_dimension_numbers<[1], [0], [0], [1], [0, 0, 1, 1], [], []>} : vector<32x512xbf16>, vector<512x128xbf16>, vector<32x128xf32> -> vector<32x128xf32>
    %14 = arith.addf %7, %13 : vector<32x128xf32>
    %c0_14 = arith.constant 0 : index
    %c2 = arith.constant 2 : index
    %c0_15 = arith.constant 0 : index
    %c0_16 = arith.constant 0 : index
    %15 = vector.load %arg1[%c0_14, %c2, %c0_15, %c0_16] : memref<1x7x8x512xbf16, #tpu.memory_space<vmem>>, vector<1x4x8x512xbf16>
    %16 = vector.shape_cast %15 : vector<1x4x8x512xbf16> to vector<4x8x512xbf16>
    %17 = vector.shape_cast %16 : vector<4x8x512xbf16> to vector<32x512xbf16>
    %c2_17 = arith.constant 2 : index
    %c0_18 = arith.constant 0 : index
    %c0_19 = arith.constant 0 : index
    %18 = vector.load %arg2[%c2_17, %c0_18, %c0_19] : memref<4x512x128xbf16, #tpu.memory_space<vmem>>, vector<1x512x128xbf16>
    %19 = vector.shape_cast %18 : vector<1x512x128xbf16> to vector<512x128xbf16>
    %cst_20 = arith.constant dense<0.000000e+00> : vector<32x128xf32>
    %20 = tpu.matmul %17, %19, %cst_20 {dimension_numbers = #tpu.dot_dimension_numbers<[1], [0], [0], [1], [0, 0, 1, 1], [], []>} : vector<32x512xbf16>, vector<512x128xbf16>, vector<32x128xf32> -> vector<32x128xf32>
    %21 = arith.addf %14, %20 : vector<32x128xf32>
    %c0_21 = arith.constant 0 : index
    %c3 = arith.constant 3 : index
    %c0_22 = arith.constant 0 : index
    %c0_23 = arith.constant 0 : index
    %22 = vector.load %arg1[%c0_21, %c3, %c0_22, %c0_23] : memref<1x7x8x512xbf16, #tpu.memory_space<vmem>>, vector<1x4x8x512xbf16>
    %23 = vector.shape_cast %22 : vector<1x4x8x512xbf16> to vector<4x8x512xbf16>
    %24 = vector.shape_cast %23 : vector<4x8x512xbf16> to vector<32x512xbf16>
    %c3_24 = arith.constant 3 : index
    %c0_25 = arith.constant 0 : index
    %c0_26 = arith.constant 0 : index
    %25 = vector.load %arg2[%c3_24, %c0_25, %c0_26] : memref<4x512x128xbf16, #tpu.memory_space<vmem>>, vector<1x512x128xbf16>
    %26 = vector.shape_cast %25 : vector<1x512x128xbf16> to vector<512x128xbf16>
    %cst_27 = arith.constant dense<0.000000e+00> : vector<32x128xf32>
    %27 = tpu.matmul %24, %26, %cst_27 {dimension_numbers = #tpu.dot_dimension_numbers<[1], [0], [0], [1], [0, 0, 1, 1], [], []>} : vector<32x512xbf16>, vector<512x128xbf16>, vector<32x128xf32> -> vector<32x128xf32>
    %28 = arith.addf %21, %27 : vector<32x128xf32>
    %c0_28 = arith.constant 0 : index
    %c0_29 = arith.constant 0 : index
    %29 = vector.load %arg3[%c0_28, %c0_29] : memref<1x128xf32, #tpu.memory_space<vmem>>, vector<1x128xf32>
    %30 = vector.broadcast %29 : vector<1x128xf32> to vector<32x128xf32>
    %31 = arith.addf %28, %30 : vector<32x128xf32>
    %32 = vector.shape_cast %31 : vector<32x128xf32> to vector<1x4x8x128xf32>
    %c0_30 = arith.constant 0 : index
    %c0_31 = arith.constant 0 : index
    %c0_32 = arith.constant 0 : index
    %c0_33 = arith.constant 0 : index
    %33 = vector.load %arg4[%c0_30, %c0_31, %c0_32, %c0_33] : memref<1x4x8x128xf32, #tpu.memory_space<vmem>>, vector<1x4x8x128xf32>
    tpu.vector_store %arg4[%c0_30, %c0_31, %c0_32, %c0_33], %32 {strides = array<i32>} : memref<1x4x8x128xf32, #tpu.memory_space<vmem>>, vector<1x4x8x128xf32>,
    return
  }
  func.func @transform_0(%arg0: i32) -> (i32, i32, i32, i32) {
    %c0_i32 = arith.constant 0 : i32
    %c0_i32_0 = arith.constant 0 : i32
    %c0_i32_1 = arith.constant 0 : i32
    %c0_i32_2 = arith.constant 0 : i32
    return %arg0, %c0_i32, %c0_i32_0, %c0_i32_1 : i32, i32, i32, i32
  }
  func.func @transform_1(%arg0: i32) -> (i32, i32, i32) {
    %c0_i32 = arith.constant 0 : i32
    %c0_i32_0 = arith.constant 0 : i32
    %c0_i32_1 = arith.constant 0 : i32
    %c0_i32_2 = arith.constant 0 : i32
    return %c0_i32, %c0_i32_0, %c0_i32_1 : i32, i32, i32
  }
  func.func @transform_2(%arg0: i32) -> (i32, i32) {
    %c0_i32 = arith.constant 0 : i32
    %c0_i32_0 = arith.constant 0 : i32
    %c0_i32_1 = arith.constant 0 : i32
    return %c0_i32, %c0_i32_0 : i32, i32
  }
  func.func @transform_3(%arg0: i32) -> (i32, i32, i32, i32) {
    %c0_i32 = arith.constant 0 : i32
    %c0_i32_0 = arith.constant 0 : i32
    %c0_i32_1 = arith.constant 0 : i32
    %c0_i32_2 = arith.constant 0 : i32
    return %arg0, %c0_i32, %c0_i32_0, %c0_i32_1 : i32, i32, i32, i32
  }
}

</mosaic_0001>

<bundles_post_ra>
// kernel: _lambda_.8
= control target key start
LH: loop header
LB: loop body
LE: loop exit
PB: predicated region body
PF: predicated region fallthrough
CT: control target
= control target key end

     0   :  { %s588_s12 = smov 0   ;;  %s638_s0 = inlined_call_operand.vmem [shape: bf16[2,9,8,24], index: 0, kind: input, shape index: {}]   ;;  %s639_s1 = inlined_call_operand.vmem [shape: bf16[2,24,128], index: 1, kind: input, shape index: {}]   ;;  %s640_s2 = inlined_call_operand.vmem [shape: f32[1,128], index: 2, kind: input, shape index: {}]   ;;  %s641_s3 = inlined_call_operand.vmem [shape: bf16[2,8,8,128], index: 3, kind: output, shape index: {}]  }
   0x1 LB: > { %s443_s13 = sadd.s32 4294967295, %s566_s12   ;;  %p447_p0 = scmp.ge.s32.totalorder %s566_s12, 1  ;;  %s566_s12 = sphi %s588_s12, %s13_s12  }
   0x2   : > { %p137_p1 = scmp.lt.s32.totalorder %s566_s12, 3 }
   0x4   : > { %p138_p2 = pnand %p447_p0, %p137_p1 }
   0x5   : > { %p161_p3 = scmp.lt.s32.totalorder (!%p138_p2), %s443_s13, 1 }
   0x6   : > { %141 = sbr.rel (%p138_p2) target bundleno = 192 (0xc0), region = 32 }
   0xb   : > { %v461_v0 = vld [vmem:[%s639_s1 + $0x14] sm:$0xf]  ;;  %v182_v1 = vld [vmem:[%s639_s1 + $0x8] sm:$0xf]  ;;  %vm238_vm0 = vcmask 1043456   ;;  %s643_s13 = smov (!%p161_p3, %s443_s13), 1 }
   0xc   : > { %v221_v2 = vunpack.c.l.b16 %v461_v0  ;;  %v296_v3 = vunpack.c.l.b16 %v182_v1  ;;  %s550_s18 = smul.u32 36, %s643_s13  ;;  %v522_v8 = vld [vmem:[%s639_s1 + $0xc] sm:$0xff]  ;;  %v517_v9 = vld [vmem:[%s639_s1] sm:$0xff]  ;;  %vm225_vm1 = vcmask 195584   ;;  %s512_s28 = sshll.u32 %s643_s13, 5 }
   0xd   : > { %v559_v21 = vld [vmem:[%s640_s2] ss:$0 sm:$0xff]  ;;  %s629_s4 = scalar_lea.vmem %s641_s3, %s512_s28 }
   0xe   : > { %v223_v4 = vpack.c.b16 %v221_v2, %v221_v2  ;;  %v298_v5 = vpack.c.b16 %v296_v3, %v296_v3  ;;  %s165_s25 = scalar_lea.vmem %s638_s0, %s550_s18 }
   0xf   : > { %v518_v10 = vld [vmem:[%s165_s25 + $0x4] sm:$0xff]  ;;  %v520_v11 = vld [vmem:[%s165_s25 + $0x14] sm:$0xff]  ;;  %v519_v14 = vld [vmem:[%s165_s25 + $0xc] sm:$0xff] }
  0x10   : > { %v240_v6 = vsel %vm238_vm0, %v223_v4, 0  ;;  %v313_v7 = vsel %vm238_vm0, %v298_v5, 0  ;;  %v513_v12 = vld [vmem:[%s165_s25] sm:$0xff]  ;;  %v515_v13 = vld [vmem:[%s165_s25 + $0x10] sm:$0xff]  ;;  %v514_v16 = vld [vmem:[%s165_s25 + $0x8] sm:$0xff] }
  0x11   : > { %248 = vmatpush.bf16.msra.mxu0 %v240_v6  ;;  %546 = vmatpush.bf16.msra.mxu2 %v240_v6  ;;  %v521_v15 = vld [vmem:[%s165_s25 + $0x1c] sm:$0xff] }
  0x12   : > { %321 = vmatpush.bf16.msra.mxu1 %v313_v7  ;;  %548 = vmatpush.bf16.msra.mxu3 %v313_v7  ;;  %v516_v17 = vld [vmem:[%s165_s25 + $0x18] sm:$0xff] }
  0x15   : > { %249 = vmatpush.bf16.msra.mxu0 %v522_v8  ;;  %547 = vmatpush.bf16.msra.mxu2 %v522_v8 }
  0x16   : > { %322 = vmatpush.bf16.msra.mxu1 %v517_v9  ;;  %549 = vmatpush.bf16.msra.mxu3 %v517_v9 }
  0x18   : > { %482 = vmatmul.msk.bf16.vlgmr.msra.gmra.mxu0 %vm225_vm1, %v518_v10  ;;  %484 = vmatmul.msk.bf16.vlgmr.msra.gmra.mxu2 %vm225_vm1, %v520_v11 }
  0x19   : > { %506 = vmatmul.msk.bf16.vlgmr.msra.gmra.mxu1 %vm225_vm1, %v513_v12  ;;  %508 = vmatmul.msk.bf16.vlgmr.msra.gmra.mxu3 %vm225_vm1, %v515_v13 }
  0x28   : > { %483 = vmatmul.msk.bf16.gmra.mxu0 %vm225_vm1, %v519_v14  ;;  %485 = vmatmul.msk.bf16.gmra.mxu2 %vm225_vm1, %v521_v15 }
  0x29   : > { %507 = vmatmul.msk.bf16.gmra.mxu1 %vm225_vm1, %v514_v16  ;;  %509 = vmatmul.msk.bf16.gmra.mxu3 %vm225_vm1, %v516_v17 }
  0x95   : > { %v251_v18 = vpop.f32.mrf.mxu0 }
  0x96   : > { %v324_v19 = vpop.f32.mrf.mxu1 }
  0x97   : > { %v325_v20 = vadd.f32 %v324_v19, %v251_v18 }
  0x99   : > { %v348_v24 = vadd.f32 %v559_v21, %v325_v20 }
  0x9b   : > { %v261_v22 = vpop.f32.mrf.mxu2  ;;  %v356_v29 = vmul.f32 0.2, %v348_v24 }
  0x9c   : > { %v334_v23 = vpop.f32.mrf.mxu3 }
  0x9d   : > { %v253_v25 = vpop.f32.mrf.mxu0  ;;  %v335_v27 = vadd.f32 %v334_v23, %v261_v22  ;;  %v364_v35 = vmax.f32 %v348_v24, %v356_v29 }
  0x9e   : > { %v326_v26 = vpop.f32.mrf.mxu1 }
  0x9f   : > { %v327_v28 = vadd.f32 %v326_v26, %v253_v25  ;;  %v352_v31 = vadd.f32 %v559_v21, %v335_v27 }
  0xa1   : > { %v349_v30 = vadd.f32 %v559_v21, %v327_v28  ;;  %v360_v40 = vmul.f32 0.2, %v352_v31 }
  0xa3   : > { %v357_v32 = vmul.f32 0.2, %v349_v30  ;;  %v263_v33 = vpop.f32.mrf.mxu2  ;;  %v368_v45 = vmax.f32 %v352_v31, %v360_v40 }
  0xa4   : > { %v336_v34 = vpop.f32.mrf.mxu3 }
  0xa5   : > { %v365_v36 = vmax.f32 %v349_v30, %v357_v32  ;;  %v337_v37 = vadd.f32 %v336_v34, %v263_v33  ;;  %v256_v38 = vpop.f32.mrf.mxu0 }
  0xa6   : > { %v329_v39 = vpop.f32.mrf.mxu1 }
  0xa7   : > { %v526_v41 = vpack.c.bf16 %v365_v36, %v364_v35  ;;  %v353_v42 = vadd.f32 %v559_v21, %v337_v37  ;;  %v330_v44 = vadd.f32 %v329_v39, %v256_v38 }
  0xa9   : > { %527 = vst [vmem:[%s629_s4] sm:$0xff] %v526_v41   ;;  %v361_v43 = vmul.f32 0.2, %v353_v42  ;;  %v350_v50 = vadd.f32 %v559_v21, %v330_v44 }
  0xab   : > { %v369_v46 = vmax.f32 %v353_v42, %v361_v43  ;;  %v266_v47 = vpop.f32.mrf.mxu2  ;;  %v358_v55 = vmul.f32 0.2, %v350_v50 }
  0xac   : > { %v339_v48 = vpop.f32.mrf.mxu3 }
  0xad   : > { %v536_v49 = vpack.c.bf16 %v369_v46, %v368_v45  ;;  %v258_v51 = vpop.f32.mrf.mxu0  ;;  %v340_v53 = vadd.f32 %v339_v48, %v266_v47  ;;  %v366_v61 = vmax.f32 %v350_v50, %v358_v55 }
  0xae   : > { %v331_v52 = vpop.f32.mrf.mxu1 }
  0xaf   : > { %544 = vst [vmem:[%s629_s4 + $0x10] sm:$0xff] %v536_v49   ;;  %v332_v54 = vadd.f32 %v331_v52, %v258_v51  ;;  %v354_v57 = vadd.f32 %v559_v21, %v340_v53 }
  0xb1   : > { %v351_v56 = vadd.f32 %v559_v21, %v332_v54  ;;  %v362_v0 = vmul.f32 0.2, %v354_v57 }
  0xb3   : > { %v359_v58 = vmul.f32 0.2, %v351_v56  ;;  %v268_v59 = vpop.f32.mrf.mxu2  ;;  %v370_v4 = vmax.f32 %v354_v57, %v362_v0 }
  0xb4   : > { %v341_v60 = vpop.f32.mrf.mxu3 }
  0xb5   : > { %v367_v62 = vmax.f32 %v351_v56, %v359_v58  ;;  %v342_v63 = vadd.f32 %v341_v60, %v268_v59 }
  0xb7   : > { %v531_v1 = vpack.c.bf16 %v367_v62, %v366_v61  ;;  %v355_v2 = vadd.f32 %v559_v21, %v342_v63 }
  0xb9   : > { %543 = vst [vmem:[%s629_s4 + $0x8] sm:$0xff] %v531_v1   ;;  %v363_v3 = vmul.f32 0.2, %v355_v2 }
  0xbb   : > { %v371_v5 = vmax.f32 %v355_v2, %v363_v3 }
  0xbd   : > { %v541_v6 = vpack.c.bf16 %v371_v5, %v370_v4 }
  0xbf   : > { %545 = vst [vmem:[%s629_s4 + $0x18] sm:$0xff] %v541_v6  }
  0xc0 PF: > { %s13_s12 = sadd.s32 1, %s566_s12  }
  0xc1   : > { %p10_p4 = scmp.ge.s32.totalorder %s13_s12, 4  }
  0xc3   :  { %12 = sbr.rel (!%p10_p4) target bundleno = 1 (0x1), region = 64 }

// kernel: _lambda_.10
= control target key start
LH: loop header
LB: loop body
LE: loop exit
PB: predicated region body
PF: predicated region fallthrough
CT: control target
= control target key end

     0   :  { %s349_s12 = smov 0   ;;  %s376_s0 = inlined_call_operand.vmem [shape: f32[2,7,8,128], index: 0, kind: input, shape index: {}]   ;;  %s377_s1 = inlined_call_operand.vmem [shape: f32[1,128], index: 1, kind: input, shape index: {}]   ;;  %s378_s2 = inlined_call_operand.vmem [shape: f32[1,128], index: 2, kind: input, shape index: {}]   ;;  %s379_s3 = inlined_call_operand.vmem [shape: bf16[2,7,8,128], index: 3, kind: output, shape index: {}]  }
   0x1 LB: > { %s283_s13 = sadd.s32 4294967295, %s327_s12   ;;  %p287_p0 = scmp.ge.s32.totalorder %s327_s12, 1  ;;  %s327_s12 = sphi %s349_s12, %s13_s12  }
   0x2   : > { %p137_p1 = scmp.lt.s32.totalorder %s327_s12, 3 }
   0x4   : > { %p138_p2 = pnand %p287_p0, %p137_p1 }
   0x5   : > { %p161_p3 = scmp.lt.s32.totalorder (!%p138_p2), %s283_s13, 1 }
   0x6   : > { %141 = sbr.rel (%p138_p2) target bundleno = 30 (0x1e), region = 32 }
   0xb   : > { %s381_s13 = smov (!%p161_p3, %s283_s13), 1  ;;  %v319_v0 = vld [vmem:[%s377_s1] ss:$0 sm:$0xff] }
   0xc   : > { %s309_s14 = smul.u32 56, %s381_s13  ;;  %v320_v1 = vld [vmem:[%s378_s2] ss:$0 sm:$0xff] }
   0xd   : > { %s310_s22 = smul.u32 28, %s381_s13 }
   0xe   : > { %s165_s19 = scalar_lea.vmem %s376_s0, %s309_s14 }
   0xf   : > { %v171_v2 = vld [vmem:[%s165_s19] sm:$0xff]  ;;  %v172_v3 = vld [vmem:[%s165_s19 + $0x8] sm:$0xff]  ;;  %v173_v4 = vld [vmem:[%s165_s19 + $0x10] sm:$0xff]  ;;  %s170_s25 = scalar_lea.vmem %s379_s3, %s310_s22 }
  0x10   : > { %v182_v5 = vmul.f32 %v319_v0, %v171_v2  ;;  %v183_v6 = vmul.f32 %v319_v0, %v172_v3  ;;  %v174_v7 = vld [vmem:[%s165_s19 + $0x18] sm:$0xff]  ;;  %v184_v8 = vmul.f32 %v319_v0, %v173_v4  ;;  %v175_v9 = vld [vmem:[%s165_s19 + $0x20] sm:$0xff]  ;;  %v176_v10 = vld [vmem:[%s165_s19 + $0x28] sm:$0xff] }
  0x11   : > { %v185_v11 = vmul.f32 %v319_v0, %v174_v7  ;;  %v186_v12 = vmul.f32 %v319_v0, %v175_v9  ;;  %v187_v13 = vmul.f32 %v319_v0, %v176_v10  ;;  %v177_v14 = vld [vmem:[%s165_s19 + $0x30] sm:$0xff] }
  0x12   : > { %v193_v15 = vadd.f32 %v320_v1, %v182_v5  ;;  %v194_v16 = vadd.f32 %v320_v1, %v183_v6  ;;  %v195_v17 = vadd.f32 %v320_v1, %v184_v8  ;;  %v188_v18 = vmul.f32 %v319_v0, %v177_v14 }
  0x13   : > { %v196_v19 = vadd.f32 %v320_v1, %v185_v11  ;;  %v197_v20 = vadd.f32 %v320_v1, %v186_v12  ;;  %v198_v21 = vadd.f32 %v320_v1, %v187_v13 }
  0x14   : > { %v200_v22 = vmul.f32 0.2, %v193_v15  ;;  %v201_v23 = vmul.f32 0.2, %v194_v16  ;;  %v202_v24 = vmul.f32 0.2, %v195_v17  ;;  %v199_v25 = vadd.f32 %v320_v1, %v188_v18 }
  0x15   : > { %v203_v26 = vmul.f32 0.2, %v196_v19  ;;  %v204_v27 = vmul.f32 0.2, %v197_v20  ;;  %v205_v28 = vmul.f32 0.2, %v198_v21 }
  0x16   : > { %v207_v29 = vmax.f32 %v193_v15, %v200_v22  ;;  %v208_v30 = vmax.f32 %v194_v16, %v201_v23  ;;  %v209_v31 = vmax.f32 %v195_v17, %v202_v24  ;;  %v206_v32 = vmul.f32 0.2, %v199_v25 }
  0x17   : > { %v210_v33 = vmax.f32 %v196_v19, %v203_v26  ;;  %v211_v34 = vmax.f32 %v197_v20, %v204_v27  ;;  %v212_v35 = vmax.f32 %v198_v21, %v205_v28 }
  0x18   : > { %v295_v36 = vpack.c.bf16 %v208_v30, %v207_v29  ;;  %v213_v37 = vmax.f32 %v199_v25, %v206_v32 }
  0x19   : > { %v300_v38 = vpack.c.bf16 %v210_v33, %v209_v31  ;;  %v305_v39 = vpack.c.bf16 %v212_v35, %v211_v34 }
  0x1a   : > { %296 = vst [vmem:[%s170_s25] sm:$0xff] %v295_v36   ;;  %v220_v40 = vpack.c.bf16 %v213_v37, %v213_v37 }
  0x1b   : > { %307 = vst [vmem:[%s170_s25 + $0x8] sm:$0xff] %v300_v38  }
  0x1c   : > { %308 = vst [vmem:[%s170_s25 + $0x10] sm:$0xff] %v305_v39  }
  0x1d   : > { %227 = vst [vmem:[%s170_s25 + $0x18] sm:$0xf] %v220_v40 }
  0x1e PF: > { %s13_s12 = sadd.s32 1, %s327_s12  }
  0x1f   : > { %p10_p4 = scmp.ge.s32.totalorder %s13_s12, 4  }
  0x21   :  { %12 = sbr.rel (!%p10_p4) target bundleno = 1 (0x1), region = 62 }

// kernel: _lambda_.9
= control target key start
LH: loop header
LB: loop body
LE: loop exit
PB: predicated region body
PF: predicated region fallthrough
CT: control target
= control target key end

     0   :  { %s1049_s15 = smov 0   ;;  %s1174_s0 = inlined_call_operand.vmem [shape: f32[2,1,56], index: 0, kind: input, shape index: {}]   ;;  %s1175_s1 = inlined_call_operand.vmem [shape: bf16[2,10,8,64], index: 1, kind: input, shape index: {}]   ;;  %s1176_s2 = inlined_call_operand.vmem [shape: bf16[4,64,128], index: 2, kind: input, shape index: {}]   ;;  %s1177_s3 = inlined_call_operand.vmem [shape: f32[2,7,8,128], index: 3, kind: output, shape index: {0}]   ;;  %s1178_s4 = inlined_call_operand.vmem [shape: f32[2,2,128], index: 4, kind: output, shape index: {1}]  }
   0x1 LB: > { %s793_s16 = sadd.s32 4294967295, %s1022_s15   ;;  %p797_p0 = scmp.ge.s32.totalorder %s1022_s15, 1  ;;  %s1022_s15 = sphi %s1049_s15, %s15_s15  }
   0x2   : > { %p173_p1 = scmp.lt.s32.totalorder %s1022_s15, 3 }
   0x4   : > { %p174_p2 = pnand %p797_p0, %p173_p1 }
   0x5   : > { %p206_p3 = scmp.lt.s32.totalorder (!%p174_p2), %s793_s16, 1 }
   0x6   : > { %177 = sbr.rel (%p174_p2) target bundleno = 358 (0x166), region = 32 }
   0xb   : > { %v991_v0 = vld [vmem:[%s1176_s2 + $0x38] sm:$0xff]  ;;  %v990_v4 = vld [vmem:[%s1176_s2 + $0x30] sm:$0xff]  ;;  %s1180_s16 = smov (!%p206_p3, %s793_s16), 1  ;;  %v989_v8 = vld [vmem:[%s1176_s2 + $0x28] sm:$0xff]  ;;  %vm298_vm0 = vcmask 523264   ;;  %vm634_vm1 = vcmask 457728  }
   0xc   : > { %v984_v1 = vld [vmem:[%s1176_s2 + $0x18] sm:$0xff]  ;;  %315 = vmatpush.bf16.msra.mxu0 %v991_v0  ;;  %v983_v5 = vld [vmem:[%s1176_s2 + $0x10] sm:$0xff]  ;;  %v982_v9 = vld [vmem:[%s1176_s2 + $0x8] sm:$0xff]  ;;  %s1006_s11 = smul.u32 40, %s1180_s16  ;;  %s208_s9 = scalar_lea.vmem %s1174_s0, %s1180_s16  ;;  %vm688_vm2 = vcmask 1040384  }
   0xd   : > { %v998_v2 = vld [vmem:[%s1176_s2 + $0x58] sm:$0xff]  ;;  %397 = vmatpush.bf16.msra.mxu1 %v984_v1  ;;  %v997_v6 = vld [vmem:[%s1176_s2 + $0x50] sm:$0xff]  ;;  %v996_v10 = vld [vmem:[%s1176_s2 + $0x48] sm:$0xff]  ;;  %s1007_s29 = smul.u32 56, %s1180_s16  ;;  %s800_s10 = sshll.u32 %s1180_s16, 1 }
   0xe   : > { %v1005_v3 = vld [vmem:[%s1176_s2 + $0x78] sm:$0xff]  ;;  %496 = vmatpush.bf16.msra.mxu2 %v998_v2  ;;  %v1004_v7 = vld [vmem:[%s1176_s2 + $0x70] sm:$0xff]  ;;  %v1003_v11 = vld [vmem:[%s1176_s2 + $0x68] sm:$0xff]  ;;  %s1105_s24 = scalar_lea.vmem %s1175_s1, %s1006_s11  ;;  %s222_s13 = scalar_lea.vmem %s1178_s4, %s800_s10 }
   0xf   : > { %602 = vmatpush.bf16.msra.mxu3 %v1005_v3  ;;  %v988_v12 = vld [vmem:[%s1176_s2 + $0x20] sm:$0xff]  ;;  %v992_v18 = vld [vmem:[%s1105_s24 + $0x8] sm:$0xff]  ;;  %v993_v22 = vld [vmem:[%s1105_s24 + $0x10] sm:$0xff]  ;;  %s1148_s6 = scalar_lea.vmem %s1177_s3, %s1007_s29 }
  0x10   : > { %316 = vmatpush.bf16.msra.mxu0 %v990_v4  ;;  %v981_v13 = vld [vmem:[%s1176_s2] sm:$0xff]  ;;  %v999_v19 = vld [vmem:[%s1105_s24 + $0xc] sm:$0xff]  ;;  %v1000_v23 = vld [vmem:[%s1105_s24 + $0x14] sm:$0xff] }
  0x11   : > { %398 = vmatpush.bf16.msra.mxu1 %v983_v5  ;;  %v995_v14 = vld [vmem:[%s1176_s2 + $0x40] sm:$0xff]  ;;  %v986_v20 = vld [vmem:[%s1105_s24 + $0xc] sm:$0xff]  ;;  %v987_v24 = vld [vmem:[%s1105_s24 + $0x14] sm:$0xff] }
  0x12   : > { %497 = vmatpush.bf16.msra.mxu2 %v997_v6  ;;  %v1002_v15 = vld [vmem:[%s1176_s2 + $0x60] sm:$0xff]  ;;  %v979_v21 = vld [vmem:[%s1105_s24 + $0x8] sm:$0xff]  ;;  %v980_v25 = vld [vmem:[%s1105_s24 + $0x10] sm:$0xff] }
  0x13   : > { %603 = vmatpush.bf16.msra.mxu3 %v1004_v7  ;;  %v985_v16 = vld [vmem:[%s1105_s24 + $0x4] sm:$0xff]  ;;  %v994_v26 = vld [vmem:[%s1105_s24 + $0x18] sm:$0xff] }
  0x14   : > { %317 = vmatpush.bf16.msra.mxu0 %v989_v8  ;;  %v978_v17 = vld [vmem:[%s1105_s24] sm:$0xff]  ;;  %v230_v29 = vld [vmem:[%s1105_s24 + $0x18] sm:$0xf] }
  0x15   : > { %399 = vmatpush.bf16.msra.mxu1 %v982_v9  ;;  %v1001_v27 = vld [vmem:[%s1105_s24 + $0x1c] sm:$0xff]  ;;  %v933_v30 = vld [vmem:[%s1105_s24 + $0x24] sm:$0xf]  ;;  %v352_v32 = vunpack.c.l.b16 %v230_v29 }
  0x16   : > { %498 = vmatpush.bf16.msra.mxu2 %v996_v10  ;;  %v807_v28 = vld [vmem:[%s1105_s24 + $0x1c] sm:$0xff]   ;;  %v557_v34 = vunpack.c.l.b16 %v933_v30 }
  0x17   : > { %604 = vmatpush.bf16.msra.mxu3 %v1003_v11  ;;  %v269_v31 = vunpack.c.l.b16 %v807_v28  ;;  %v451_v33 = vunpack.c.h.b16 %v807_v28  ;;  %v356_v36 = vpack.c.b16 %v352_v32, %v352_v32 }
  0x18   : > { %318 = vmatpush.bf16.msra.mxu0 %v988_v12  ;;  %v561_v38 = vpack.c.b16 %v557_v34, %v557_v34 }
  0x19   : > { %400 = vmatpush.bf16.msra.mxu1 %v981_v13  ;;  %v273_v35 = vpack.c.b16 %v269_v31, %v269_v31  ;;  %v455_v37 = vpack.c.b16 %v451_v33, %v451_v33 }
  0x1a   : > { %499 = vmatpush.bf16.msra.mxu2 %v995_v14 }
  0x1b   : > { %605 = vmatpush.bf16.msra.mxu3 %v1002_v15  ;;  %844 = vmatmul.msk.bf16.vlgmr.msra.gmra.mxu0 %vm298_vm0, %v985_v16 }
  0x1c   : > { %876 = vmatmul.msk.bf16.vlgmr.msra.gmra.mxu1 %vm298_vm0, %v978_v17 }
  0x1d   : > { %923 = vmatmul.msk.bf16.vlgmr.msra.gmra.mxu2 %vm298_vm0, %v992_v18 }
  0x1e   : > { %970 = vmatmul.msk.bf16.vlgmr.msra.gmra.mxu3 %vm298_vm0, %v999_v19 }
  0x2b   : > { %845 = vmatmul.msk.bf16.gmra.mxu0 %vm298_vm0, %v986_v20 }
  0x2c   : > { %877 = vmatmul.msk.bf16.gmra.mxu1 %vm298_vm0, %v979_v21 }
  0x2d   : > { %924 = vmatmul.msk.bf16.gmra.mxu2 %vm298_vm0, %v993_v22 }
  0x2e   : > { %971 = vmatmul.msk.bf16.gmra.mxu3 %vm298_vm0, %v1000_v23 }
  0x3b   : > { %846 = vmatmul.msk.bf16.gmra.mxu0 %vm298_vm0, %v987_v24 }
  0x3c   : > { %878 = vmatmul.msk.bf16.gmra.mxu1 %vm298_vm0, %v980_v25 }
  0x3d   : > { %925 = vmatmul.msk.bf16.gmra.mxu2 %vm298_vm0, %v994_v26 }
  0x3e   : > { %972 = vmatmul.msk.bf16.gmra.mxu3 %vm298_vm0, %v1001_v27 }
  0x4b   : > { %847 = vmatmul.msk.bf16.gmra.mxu0 %vm298_vm0, %v273_v35  ;;  %v633_v35 = vld [vmem:[%s208_s9] sm:$0x1] }
  0x4c   : > { %879 = vmatmul.msk.bf16.gmra.mxu1 %vm298_vm0, %v356_v36 }
  0x4d   : > { %926 = vmatmul.msk.bf16.gmra.mxu2 %vm298_vm0, %v455_v37 }
  0x4e   : > { %973 = vmatmul.msk.bf16.gmra.mxu3 %vm298_vm0, %v561_v38 }
  0x98   : > { %v320_v39 = vpop.f32.mrf.mxu0 }
  0x99   : > { %v402_v40 = vpop.f32.mrf.mxu1 }
  0x9a   : > { %v403_v41 = vadd.f32 %v402_v40, %v320_v39 }
  0xa0   : > { %v501_v42 = vpop.f32.mrf.mxu2  ;;  %v322_v45 = vpop.f32.mrf.mxu0 }
  0xa1   : > { %v607_v43 = vpop.f32.mrf.mxu3  ;;  %v520_v44 = vadd.f32 %v501_v42, %v403_v41  ;;  %v404_v46 = vpop.f32.mrf.mxu1 }
  0xa2   : > { %v405_v48 = vadd.f32 %v404_v46, %v322_v45 }
  0xa3   : > { %v1150_v47 = vadd.f32 %v607_v43, %v520_v44 }
  0xa5   : > { %691 = vst [vmem:[%s1148_s6] sm:$0xff] %v1150_v47  ;;  %v658_v34 = vmul.f32 %v1150_v47, %v1150_v47 }
  0xa8   : > { %v503_v49 = vpop.f32.mrf.mxu2  ;;  %v325_v52 = vpop.f32.mrf.mxu0 }
  0xa9   : > { %v609_v50 = vpop.f32.mrf.mxu3  ;;  %v521_v51 = vadd.f32 %v503_v49, %v405_v48  ;;  %v407_v53 = vpop.f32.mrf.mxu1 }
  0xaa   : > { %v408_v55 = vadd.f32 %v407_v53, %v325_v52 }
  0xab   : > { %v627_v54 = vadd.f32 %v609_v50, %v521_v51 }
  0xad   : > { %692 = vst [vmem:[%s1148_s6 + $0x8] sm:$0xff] %v627_v54  ;;  %v659_v33 = vmul.f32 %v627_v54, %v627_v54 }
  0xb0   : > { %v506_v56 = vpop.f32.mrf.mxu2  ;;  %v327_v59 = vpop.f32.mrf.mxu0 }
  0xb1   : > { %v612_v57 = vpop.f32.mrf.mxu3  ;;  %v522_v58 = vadd.f32 %v506_v56, %v408_v55  ;;  %v409_v60 = vpop.f32.mrf.mxu1 }
  0xb2   : > { %v410_v62 = vadd.f32 %v409_v60, %v327_v59 }
  0xb3   : > { %v628_v61 = vadd.f32 %v612_v57, %v522_v58 }
  0xb5   : > { %693 = vst [vmem:[%s1148_s6 + $0x10] sm:$0xff] %v628_v61  ;;  %v660_v32 = vmul.f32 %v628_v61, %v628_v61 }
  0xb8   : > { %v508_v63 = vpop.f32.mrf.mxu2  ;;  %v330_v2 = vpop.f32.mrf.mxu0 }
  0xb9   : > { %v614_v0 = vpop.f32.mrf.mxu3  ;;  %v523_v1 = vadd.f32 %v508_v63, %v410_v62  ;;  %v412_v3 = vpop.f32.mrf.mxu1 }
  0xba   : > { %v413_v5 = vadd.f32 %v412_v3, %v330_v2 }
  0xbb   : > { %v629_v4 = vadd.f32 %v614_v0, %v523_v1 }
  0xbd   : > { %694 = vst [vmem:[%s1148_s6 + $0x18] sm:$0xff] %v629_v4  ;;  %v661_v31 = vmul.f32 %v629_v4, %v629_v4 }
  0xc0   : > { %v511_v6 = vpop.f32.mrf.mxu2  ;;  %v332_v9 = vpop.f32.mrf.mxu0 }
  0xc1   : > { %v617_v7 = vpop.f32.mrf.mxu3  ;;  %v524_v8 = vadd.f32 %v511_v6, %v413_v5  ;;  %v414_v10 = vpop.f32.mrf.mxu1 }
  0xc2   : > { %v415_v12 = vadd.f32 %v414_v10, %v332_v9 }
  0xc3   : > { %v630_v11 = vadd.f32 %v617_v7, %v524_v8 }
  0xc5   : > { %695 = vst [vmem:[%s1148_s6 + $0x20] sm:$0xff] %v630_v11  ;;  %v662_v30 = vmul.f32 %v630_v11, %v630_v11 }
  0xc8   : > { %v513_v13 = vpop.f32.mrf.mxu2  ;;  %v335_v16 = vpop.f32.mrf.mxu0 }
  0xc9   : > { %v619_v14 = vpop.f32.mrf.mxu3  ;;  %v525_v15 = vadd.f32 %v513_v13, %v415_v12  ;;  %v417_v17 = vpop.f32.mrf.mxu1 }
  0xca   : > { %v418_v19 = vadd.f32 %v417_v17, %v335_v16 }
  0xcb   : > { %v631_v18 = vadd.f32 %v619_v14, %v525_v15 }
  0xcd   : > { %696 = vst [vmem:[%s1148_s6 + $0x28] sm:$0xff] %v631_v18  ;;  %v663_v27 = vmul.f32 %v631_v18, %v631_v18 }
  0xd0   : > { %v516_v20 = vpop.f32.mrf.mxu2  ;;  %v337_v23 = vpop.f32.mrf.mxu0 }
  0xd1   : > { %v622_v21 = vpop.f32.mrf.mxu3  ;;  %v526_v22 = vadd.f32 %v516_v20, %v418_v19  ;;  %v419_v24 = vpop.f32.mrf.mxu1 }
  0xd3   : > { %v632_v25 = vadd.f32 %v622_v21, %v526_v22 }
  0xd5   : > { %697 = vst [vmem:[%s1148_s6 + $0x30] sm:$0xff] %v632_v25  ;;  %647 = vmatpush.msrb.mxu0 %v632_v25  ;;  %v664_v26 = vmul.f32 %v632_v25, %v632_v25 }
  0xd7   : > { %648 = vmatpush.msrb.mxu0 %v631_v18  ;;  %674 = vmatpush.msrb.mxu1 %v664_v26 }
  0xd8   : > { %v518_v28 = vpop.f32.mrf.mxu2 }
  0xd9   : > { %v624_v29 = vpop.f32.mrf.mxu3  ;;  %649 = vmatpush.msrb.mxu0 %v630_v11  ;;  %675 = vmatpush.msrb.mxu1 %v663_v27 }
  0xdb   : > { %650 = vmatpush.msrb.mxu0 %v629_v4  ;;  %676 = vmatpush.msrb.mxu1 %v662_v30 }
  0xdd   : > { %651 = vmatpush.msrb.mxu0 %v628_v61  ;;  %677 = vmatpush.msrb.mxu1 %v661_v31 }
  0xdf   : > { %652 = vmatpush.msrb.mxu0 %v627_v54  ;;  %678 = vmatpush.msrb.mxu1 %v660_v32 }
  0xe1   : > { %653 = vmatpush.msrb.mxu0 %v1150_v47  ;;  %679 = vmatpush.msrb.mxu1 %v659_v33 }
  0xe2   : > { %974 = vmatmul.msk.f32.vlgmr.msrb.gmra.mxu0 %vm634_vm1, %v633_v35 }
  0xe3   : > { %680 = vmatpush.msrb.mxu1 %v658_v34 }
  0xe4   : > { %975 = vmatmul.msk.f32.vlgmr.msrb.gmra.mxu1 %vm634_vm1, %v633_v35 }
 0x15f   : > { %v655_v37 = vpop.f32.mrf.mxu0 }
 0x161   : > { %v682_v36 = vpop.f32.mrf.mxu1 }
 0x162   : > { %v686_v38 = vrot.slane %v682_v36, 7 }
 0x164   : > { %v689_v39 = vsel %vm688_vm2, %v655_v37, %v686_v38 }
 0x165   : > { %690 = vst [vmem:[%s222_s13] sm:$0x3] %v689_v39 }
 0x166 PF: > { %s15_s15 = sadd.s32 1, %s1022_s15  }
 0x167   : > { %p12_p4 = scmp.ge.s32.totalorder %s15_s15, 4  }
 0x169   :  { %14 = sbr.rel (!%p12_p4) target bundleno = 1 (0x1), region = 83 }

// kernel: _lambda_.12
= control target key start
LH: loop header
LB: loop body
LE: loop exit
PB: predicated region body
PF: predicated region fallthrough
CT: control target
= control target key end

     0   :  { %s342_s12 = smov 0   ;;  %s369_s0 = inlined_call_operand.vmem [shape: f32[2,6,8,128], index: 0, kind: input, shape index: {}]   ;;  %s370_s1 = inlined_call_operand.vmem [shape: f32[1,128], index: 1, kind: input, shape index: {}]   ;;  %s371_s2 = inlined_call_operand.vmem [shape: f32[1,128], index: 2, kind: input, shape index: {}]   ;;  %s372_s3 = inlined_call_operand.vmem [shape: bf16[2,6,8,128], index: 3, kind: output, shape index: {}]  }
   0x1 LB: > { %s276_s13 = sadd.s32 4294967295, %s320_s12   ;;  %p280_p0 = scmp.ge.s32.totalorder %s320_s12, 1  ;;  %s320_s12 = sphi %s342_s12, %s13_s12  }
   0x2   : > { %p137_p1 = scmp.lt.s32.totalorder %s320_s12, 3 }
   0x4   : > { %p138_p2 = pnand %p280_p0, %p137_p1 }
   0x5   : > { %p161_p3 = scmp.lt.s32.totalorder (!%p138_p2), %s276_s13, 1 }
   0x6   : > { %141 = sbr.rel (%p138_p2) target bundleno = 29 (0x1d), region = 32 }
   0xb   : > { %s374_s13 = smov (!%p161_p3, %s276_s13), 1  ;;  %v312_v0 = vld [vmem:[%s370_s1] ss:$0 sm:$0xff] }
   0xc   : > { %s302_s14 = smul.u32 48, %s374_s13  ;;  %v313_v1 = vld [vmem:[%s371_s2] ss:$0 sm:$0xff] }
   0xd   : > { %s303_s22 = smul.u32 24, %s374_s13 }
   0xe   : > { %s165_s19 = scalar_lea.vmem %s369_s0, %s302_s14 }
   0xf   : > { %v171_v2 = vld [vmem:[%s165_s19] sm:$0xff]  ;;  %v172_v3 = vld [vmem:[%s165_s19 + $0x8] sm:$0xff]  ;;  %v173_v4 = vld [vmem:[%s165_s19 + $0x10] sm:$0xff]  ;;  %s170_s25 = scalar_lea.vmem %s372_s3, %s303_s22 }
  0x10   : > { %v181_v5 = vmul.f32 %v312_v0, %v171_v2  ;;  %v182_v6 = vmul.f32 %v312_v0, %v172_v3  ;;  %v174_v7 = vld [vmem:[%s165_s19 + $0x18] sm:$0xff]  ;;  %v183_v8 = vmul.f32 %v312_v0, %v173_v4  ;;  %v175_v9 = vld [vmem:[%s165_s19 + $0x20] sm:$0xff]  ;;  %v176_v10 = vld [vmem:[%s165_s19 + $0x28] sm:$0xff] }
  0x11   : > { %v184_v11 = vmul.f32 %v312_v0, %v174_v7  ;;  %v185_v12 = vmul.f32 %v312_v0, %v175_v9  ;;  %v186_v13 = vmul.f32 %v312_v0, %v176_v10 }
  0x12   : > { %v191_v14 = vadd.f32 %v313_v1, %v181_v5  ;;  %v192_v15 = vadd.f32 %v313_v1, %v182_v6  ;;  %v193_v16 = vadd.f32 %v313_v1, %v183_v8 }
  0x13   : > { %v194_v17 = vadd.f32 %v313_v1, %v184_v11  ;;  %v195_v18 = vadd.f32 %v313_v1, %v185_v12  ;;  %v196_v19 = vadd.f32 %v313_v1, %v186_v13 }
  0x14   : > { %v197_v20 = vmul.f32 0.2, %v191_v14  ;;  %v198_v21 = vmul.f32 0.2, %v192_v15  ;;  %v199_v22 = vmul.f32 0.2, %v193_v16 }
  0x15   : > { %v200_v23 = vmul.f32 0.2, %v194_v17  ;;  %v201_v24 = vmul.f32 0.2, %v195_v18  ;;  %v202_v25 = vmul.f32 0.2, %v196_v19 }
  0x16   : > { %v203_v26 = vmax.f32 %v191_v14, %v197_v20  ;;  %v204_v27 = vmax.f32 %v192_v15, %v198_v21  ;;  %v205_v28 = vmax.f32 %v193_v16, %v199_v22 }
  0x17   : > { %v206_v29 = vmax.f32 %v194_v17, %v200_v23  ;;  %v207_v30 = vmax.f32 %v195_v18, %v201_v24  ;;  %v208_v31 = vmax.f32 %v196_v19, %v202_v25 }
  0x18   : > { %v288_v32 = vpack.c.bf16 %v204_v27, %v203_v26 }
  0x19   : > { %v293_v33 = vpack.c.bf16 %v206_v29, %v205_v28  ;;  %v298_v34 = vpack.c.bf16 %v208_v31, %v207_v30 }
  0x1a   : > { %289 = vst [vmem:[%s170_s25] sm:$0xff] %v288_v32  }
  0x1b   : > { %300 = vst [vmem:[%s170_s25 + $0x8] sm:$0xff] %v293_v33  }
  0x1c   : > { %301 = vst [vmem:[%s170_s25 + $0x10] sm:$0xff] %v298_v34  }
  0x1d PF: > { %s13_s12 = sadd.s32 1, %s320_s12  }
  0x1e   : > { %p10_p4 = scmp.ge.s32.totalorder %s13_s12, 4  }
  0x20   :  { %12 = sbr.rel (!%p10_p4) target bundleno = 1 (0x1), region = 62 }

// kernel: _lambda_.11
= control target key start
LH: loop header
LB: loop body
LE: loop exit
PB: predicated region body
PF: predicated region fallthrough
CT: control target
= control target key end

     0   :  { %s1188_s15 = smov 0   ;;  %s1325_s0 = inlined_call_operand.vmem [shape: f32[2,1,48], index: 0, kind: input, shape index: {}]   ;;  %s1326_s1 = inlined_call_operand.vmem [shape: bf16[2,9,8,128], index: 1, kind: input, shape index: {}]   ;;  %s1327_s2 = inlined_call_operand.vmem [shape: bf16[4,128,128], index: 2, kind: input, shape index: {}]   ;;  %s1328_s3 = inlined_call_operand.vmem [shape: f32[2,6,8,128], index: 3, kind: output, shape index: {0}]   ;;  %s1329_s4 = inlined_call_operand.vmem [shape: f32[2,2,128], index: 4, kind: output, shape index: {1}]  }
   0x1 LB: > { %s847_s16 = sadd.s32 4294967295, %s1161_s15   ;;  %p851_p0 = scmp.ge.s32.totalorder %s1161_s15, 1  ;;  %s1161_s15 = sphi %s1188_s15, %s15_s15  }
   0x2   : > { %p173_p1 = scmp.lt.s32.totalorder %s1161_s15, 3 }
   0x4   : > { %p174_p2 = pnand %p851_p0, %p173_p1 }
   0x5   : > { %p206_p3 = scmp.lt.s32.totalorder (!%p174_p2), %s847_s16, 1 }
   0x6   : > { %177 = sbr.rel (%p174_p2) target bundleno = 364 (0x16c), region = 32 }
   0xb   : > { %v1122_v0 = vld [vmem:[%s1327_s2 + $0x78] sm:$0xff]  ;;  %v1121_v4 = vld [vmem:[%s1327_s2 + $0x70] sm:$0xff]  ;;  %v1120_v8 = vld [vmem:[%s1327_s2 + $0x68] sm:$0xff]  ;;  %s1331_s16 = smov (!%p206_p3, %s847_s16), 1  ;;  %vm690_vm0 = vcmask 392192   ;;  %vm743_vm1 = vcmask 1040384  }
   0xc   : > { %v1111_v1 = vld [vmem:[%s1327_s2 + $0x38] sm:$0xff]  ;;  %335 = vmatpush.bf16.msra.mxu0 %v1122_v0  ;;  %v1110_v5 = vld [vmem:[%s1327_s2 + $0x30] sm:$0xff]  ;;  %v1109_v9 = vld [vmem:[%s1327_s2 + $0x28] sm:$0xff]  ;;  %s1145_s21 = smul.u32 36, %s1331_s16  ;;  %s208_s19 = scalar_lea.vmem %s1325_s0, %s1331_s16 }
   0xd   : > { %v1133_v2 = vld [vmem:[%s1327_s2 + $0xb8] sm:$0xff]  ;;  %425 = vmatpush.bf16.msra.mxu1 %v1111_v1  ;;  %v1132_v6 = vld [vmem:[%s1327_s2 + $0xb0] sm:$0xff]  ;;  %v1131_v10 = vld [vmem:[%s1327_s2 + $0xa8] sm:$0xff]  ;;  %s1146_s11 = smul.u32 48, %s1331_s16  ;;  %s854_s20 = sshll.u32 %s1331_s16, 1 }
   0xe   : > { %v1144_v3 = vld [vmem:[%s1327_s2 + $0xf8] sm:$0xff]  ;;  %539 = vmatpush.bf16.msra.mxu2 %v1133_v2  ;;  %v1143_v7 = vld [vmem:[%s1327_s2 + $0xf0] sm:$0xff]  ;;  %v1142_v11 = vld [vmem:[%s1327_s2 + $0xe8] sm:$0xff]  ;;  %s213_s6 = scalar_lea.vmem %s1326_s1, %s1145_s21  ;;  %s222_s23 = scalar_lea.vmem %s1329_s4, %s854_s20 }
   0xf   : > { %659 = vmatpush.bf16.msra.mxu3 %v1144_v3  ;;  %v1119_v12 = vld [vmem:[%s1327_s2 + $0x60] sm:$0xff]  ;;  %v1118_v16 = vld [vmem:[%s1327_s2 + $0x58] sm:$0xff]  ;;  %v1117_v20 = vld [vmem:[%s1327_s2 + $0x50] sm:$0xff]  ;;  %s1306_s14 = scalar_lea.vmem %s1328_s3, %s1146_s11 }
  0x10   : > { %336 = vmatpush.bf16.msra.mxu0 %v1121_v4  ;;  %v1108_v13 = vld [vmem:[%s1327_s2 + $0x20] sm:$0xff]  ;;  %v1107_v17 = vld [vmem:[%s1327_s2 + $0x18] sm:$0xff]  ;;  %v1106_v21 = vld [vmem:[%s1327_s2 + $0x10] sm:$0xff] }
  0x11   : > { %426 = vmatpush.bf16.msra.mxu1 %v1110_v5  ;;  %v1130_v14 = vld [vmem:[%s1327_s2 + $0xa0] sm:$0xff]  ;;  %v1129_v18 = vld [vmem:[%s1327_s2 + $0x98] sm:$0xff]  ;;  %v1128_v22 = vld [vmem:[%s1327_s2 + $0x90] sm:$0xff] }
  0x12   : > { %540 = vmatpush.bf16.msra.mxu2 %v1132_v6  ;;  %v1141_v15 = vld [vmem:[%s1327_s2 + $0xe0] sm:$0xff]  ;;  %v1140_v19 = vld [vmem:[%s1327_s2 + $0xd8] sm:$0xff]  ;;  %v1139_v23 = vld [vmem:[%s1327_s2 + $0xd0] sm:$0xff] }
  0x13   : > { %660 = vmatpush.bf16.msra.mxu3 %v1143_v7  ;;  %v1116_v24 = vld [vmem:[%s1327_s2 + $0x48] sm:$0xff]  ;;  %v1115_v28 = vld [vmem:[%s1327_s2 + $0x40] sm:$0xff]  ;;  %v1124_v38 = vld [vmem:[%s213_s6 + $0x10] sm:$0xff] }
  0x14   : > { %337 = vmatpush.bf16.msra.mxu0 %v1120_v8  ;;  %v1105_v25 = vld [vmem:[%s1327_s2 + $0x8] sm:$0xff]  ;;  %v1104_v29 = vld [vmem:[%s1327_s2] sm:$0xff]  ;;  %v1135_v39 = vld [vmem:[%s213_s6 + $0x14] sm:$0xff] }
  0x15   : > { %427 = vmatpush.bf16.msra.mxu1 %v1109_v9  ;;  %v1127_v26 = vld [vmem:[%s1327_s2 + $0x88] sm:$0xff]  ;;  %v1126_v30 = vld [vmem:[%s1327_s2 + $0x80] sm:$0xff]  ;;  %v1114_v40 = vld [vmem:[%s213_s6 + $0x14] sm:$0xff] }
  0x16   : > { %541 = vmatpush.bf16.msra.mxu2 %v1131_v10  ;;  %v1138_v27 = vld [vmem:[%s1327_s2 + $0xc8] sm:$0xff]  ;;  %v1137_v31 = vld [vmem:[%s1327_s2 + $0xc0] sm:$0xff]  ;;  %v1103_v41 = vld [vmem:[%s213_s6 + $0x10] sm:$0xff] }
  0x17   : > { %661 = vmatpush.bf16.msra.mxu3 %v1142_v11  ;;  %v1112_v32 = vld [vmem:[%s213_s6 + $0x4] sm:$0xff]  ;;  %v1134_v35 = vld [vmem:[%s213_s6 + $0xc] sm:$0xff]  ;;  %v1125_v42 = vld [vmem:[%s213_s6 + $0x18] sm:$0xff] }
  0x18   : > { %338 = vmatpush.bf16.msra.mxu0 %v1119_v12  ;;  %v1101_v33 = vld [vmem:[%s213_s6] sm:$0xff]  ;;  %v1123_v34 = vld [vmem:[%s213_s6 + $0x8] sm:$0xff] }
  0x19   : > { %428 = vmatpush.bf16.msra.mxu1 %v1108_v13  ;;  %v1113_v36 = vld [vmem:[%s213_s6 + $0xc] sm:$0xff]  ;;  %v1136_v43 = vld [vmem:[%s213_s6 + $0x1c] sm:$0xff] }
  0x1a   : > { %542 = vmatpush.bf16.msra.mxu2 %v1130_v14  ;;  %v1102_v37 = vld [vmem:[%s213_s6 + $0x8] sm:$0xff] }
  0x1b   : > { %662 = vmatpush.bf16.msra.mxu3 %v1141_v15 }
  0x1c   : > { %339 = vmatpush.bf16.msra.mxu0 %v1118_v16 }
  0x1d   : > { %429 = vmatpush.bf16.msra.mxu1 %v1107_v17 }
  0x1e   : > { %543 = vmatpush.bf16.msra.mxu2 %v1129_v18 }
  0x1f   : > { %663 = vmatpush.bf16.msra.mxu3 %v1140_v19 }
  0x20   : > { %340 = vmatpush.bf16.msra.mxu0 %v1117_v20 }
  0x21   : > { %430 = vmatpush.bf16.msra.mxu1 %v1106_v21 }
  0x22   : > { %544 = vmatpush.bf16.msra.mxu2 %v1128_v22 }
  0x23   : > { %664 = vmatpush.bf16.msra.mxu3 %v1139_v23 }
  0x24   : > { %341 = vmatpush.bf16.msra.mxu0 %v1116_v24 }
  0x25   : > { %431 = vmatpush.bf16.msra.mxu1 %v1105_v25 }
  0x26   : > { %545 = vmatpush.bf16.msra.mxu2 %v1127_v26 }
  0x27   : > { %665 = vmatpush.bf16.msra.mxu3 %v1138_v27 }
  0x28   : > { %342 = vmatpush.bf16.msra.mxu0 %v1115_v28  ;;  %v689_v28 = vld [vmem:[%s208_s19] sm:$0x1] }
  0x29   : > { %432 = vmatpush.bf16.msra.mxu1 %v1104_v29 }
  0x2a   : > { %546 = vmatpush.bf16.msra.mxu2 %v1126_v30 }
  0x2b   : > { %666 = vmatpush.bf16.msra.mxu3 %v1137_v31  ;;  %343 = vmatmul.bf16.vlgmr.msra.gmra.mxu0 %v1112_v32 }
  0x2c   : > { %433 = vmatmul.bf16.vlgmr.msra.gmra.mxu1 %v1101_v33 }
  0x2d   : > { %547 = vmatmul.bf16.vlgmr.msra.gmra.mxu2 %v1123_v34 }
  0x2e   : > { %667 = vmatmul.bf16.vlgmr.msra.gmra.mxu3 %v1134_v35 }
  0x3b   : > { %348 = vmatmul.bf16.gmra.mxu0 %v1113_v36 }
  0x3c   : > { %438 = vmatmul.bf16.gmra.mxu1 %v1102_v37 }
  0x3d   : > { %552 = vmatmul.bf16.gmra.mxu2 %v1124_v38 }
  0x3e   : > { %672 = vmatmul.bf16.gmra.mxu3 %v1135_v39 }
  0x4b   : > { %353 = vmatmul.bf16.gmra.mxu0 %v1114_v40 }
  0x4c   : > { %443 = vmatmul.bf16.gmra.mxu1 %v1103_v41 }
  0x4d   : > { %557 = vmatmul.bf16.gmra.mxu2 %v1125_v42 }
  0x4e   : > { %677 = vmatmul.bf16.gmra.mxu3 %v1136_v43 }
  0xa8   : > { %v344_v44 = vpop.f32.mrf.mxu0 }
  0xa9   : > { %v434_v45 = vpop.f32.mrf.mxu1 }
  0xaa   : > { %v435_v46 = vadd.f32 %v434_v45, %v344_v44 }
  0xb0   : > { %v548_v47 = vpop.f32.mrf.mxu2  ;;  %v346_v50 = vpop.f32.mrf.mxu0 }
  0xb1   : > { %v668_v48 = vpop.f32.mrf.mxu3  ;;  %v563_v49 = vadd.f32 %v548_v47, %v435_v46  ;;  %v436_v51 = vpop.f32.mrf.mxu1 }
  0xb2   : > { %v437_v53 = vadd.f32 %v436_v51, %v346_v50 }
  0xb3   : > { %v683_v52 = vadd.f32 %v668_v48, %v563_v49 }
  0xb5   : > { %746 = vst [vmem:[%s1306_s14] sm:$0xff] %v683_v52  ;;  %v714_v27 = vmul.f32 %v683_v52, %v683_v52 }
  0xb8   : > { %v550_v54 = vpop.f32.mrf.mxu2  ;;  %v349_v57 = vpop.f32.mrf.mxu0 }
  0xb9   : > { %v670_v55 = vpop.f32.mrf.mxu3  ;;  %v564_v56 = vadd.f32 %v550_v54, %v437_v53  ;;  %v439_v58 = vpop.f32.mrf.mxu1 }
  0xba   : > { %v440_v60 = vadd.f32 %v439_v58, %v349_v57 }
  0xbb   : > { %v684_v59 = vadd.f32 %v670_v55, %v564_v56 }
  0xbd   : > { %747 = vst [vmem:[%s1306_s14 + $0x8] sm:$0xff] %v684_v59  ;;  %v715_v26 = vmul.f32 %v684_v59, %v684_v59 }
  0xc0   : > { %v553_v61 = vpop.f32.mrf.mxu2  ;;  %v351_v0 = vpop.f32.mrf.mxu0 }
  0xc1   : > { %v673_v62 = vpop.f32.mrf.mxu3  ;;  %v565_v63 = vadd.f32 %v553_v61, %v440_v60  ;;  %v441_v1 = vpop.f32.mrf.mxu1 }
  0xc2   : > { %v442_v3 = vadd.f32 %v441_v1, %v351_v0 }
  0xc3   : > { %v685_v2 = vadd.f32 %v673_v62, %v565_v63 }
  0xc5   : > { %748 = vst [vmem:[%s1306_s14 + $0x10] sm:$0xff] %v685_v2  ;;  %v716_v25 = vmul.f32 %v685_v2, %v685_v2 }
  0xc8   : > { %v555_v4 = vpop.f32.mrf.mxu2  ;;  %v354_v7 = vpop.f32.mrf.mxu0 }
  0xc9   : > { %v675_v5 = vpop.f32.mrf.mxu3  ;;  %v566_v6 = vadd.f32 %v555_v4, %v442_v3  ;;  %v444_v8 = vpop.f32.mrf.mxu1 }
  0xca   : > { %v445_v10 = vadd.f32 %v444_v8, %v354_v7 }
  0xcb   : > { %v686_v9 = vadd.f32 %v675_v5, %v566_v6 }
  0xcd   : > { %749 = vst [vmem:[%s1306_s14 + $0x18] sm:$0xff] %v686_v9  ;;  %v717_v24 = vmul.f32 %v686_v9, %v686_v9 }
  0xd0   : > { %v558_v11 = vpop.f32.mrf.mxu2  ;;  %v356_v15 = vpop.f32.mrf.mxu0 }
  0xd1   : > { %v678_v12 = vpop.f32.mrf.mxu3  ;;  %v567_v13 = vadd.f32 %v558_v11, %v445_v10  ;;  %v446_v16 = vpop.f32.mrf.mxu1 }
  0xd2   : > { %v447_v17 = vadd.f32 %v446_v16, %v356_v15 }
  0xd3   : > { %v687_v14 = vadd.f32 %v678_v12, %v567_v13 }
  0xd5   : > { %750 = vst [vmem:[%s1306_s14 + $0x20] sm:$0xff] %v687_v14  ;;  %v718_v23 = vmul.f32 %v687_v14, %v687_v14 }
  0xd8   : > { %v560_v18 = vpop.f32.mrf.mxu2 }
  0xd9   : > { %v568_v19 = vadd.f32 %v560_v18, %v447_v17  ;;  %v680_v20 = vpop.f32.mrf.mxu3 }
  0xdb   : > { %v688_v21 = vadd.f32 %v680_v20, %v568_v19 }
  0xdd   : > { %751 = vst [vmem:[%s1306_s14 + $0x28] sm:$0xff] %v688_v21  ;;  %704 = vmatpush.msrb.mxu0 %v688_v21  ;;  %v719_v22 = vmul.f32 %v688_v21, %v688_v21 }
  0xdf   : > { %705 = vmatpush.msrb.mxu0 %v687_v14  ;;  %730 = vmatpush.msrb.mxu1 %v719_v22 }
  0xe1   : > { %706 = vmatpush.msrb.mxu0 %v686_v9  ;;  %731 = vmatpush.msrb.mxu1 %v718_v23 }
  0xe3   : > { %707 = vmatpush.msrb.mxu0 %v685_v2  ;;  %732 = vmatpush.msrb.mxu1 %v717_v24 }
  0xe5   : > { %708 = vmatpush.msrb.mxu0 %v684_v59  ;;  %733 = vmatpush.msrb.mxu1 %v716_v25 }
  0xe7   : > { %709 = vmatpush.msrb.mxu0 %v683_v52  ;;  %734 = vmatpush.msrb.mxu1 %v715_v26 }
  0xe8   : > { %1097 = vmatmul.msk.f32.vlgmr.msrb.gmra.mxu0 %vm690_vm0, %v689_v28 }
  0xe9   : > { %735 = vmatpush.msrb.mxu1 %v714_v27 }
  0xea   : > { %1098 = vmatmul.msk.f32.vlgmr.msrb.gmra.mxu1 %vm690_vm0, %v689_v28 }
 0x165   : > { %v711_v30 = vpop.f32.mrf.mxu0 }
 0x167   : > { %v737_v29 = vpop.f32.mrf.mxu1 }
 0x168   : > { %v741_v31 = vrot.slane %v737_v29, 7 }
 0x16a   : > { %v744_v32 = vsel %vm743_vm1, %v711_v30, %v741_v31 }
 0x16b   : > { %745 = vst [vmem:[%s222_s23] sm:$0x3] %v744_v32 }
 0x16c PF: > { %s15_s15 = sadd.s32 1, %s1161_s15  }
 0x16d   : > { %p12_p4 = scmp.ge.s32.totalorder %s15_s15, 4  }
 0x16f   :  { %14 = sbr.rel (!%p12_p4) target bundleno = 1 (0x1), region = 83 }

// kernel: _lambda_.14
= control target key start
LH: loop header
LB: loop body
LE: loop exit
PB: predicated region body
PF: predicated region fallthrough
CT: control target
= control target key end

     0   :  { %s329_s12 = smov 0   ;;  %s356_s0 = inlined_call_operand.vmem [shape: f32[2,5,8,128], index: 0, kind: input, shape index: {}]   ;;  %s357_s1 = inlined_call_operand.vmem [shape: f32[1,128], index: 1, kind: input, shape index: {}]   ;;  %s358_s2 = inlined_call_operand.vmem [shape: f32[1,128], index: 2, kind: input, shape index: {}]   ;;  %s359_s3 = inlined_call_operand.vmem [shape: bf16[2,5,8,128], index: 3, kind: output, shape index: {}]  }
   0x1 LB: > { %s269_s13 = sadd.s32 4294967295, %s307_s12   ;;  %p273_p0 = scmp.ge.s32.totalorder %s307_s12, 1  ;;  %s307_s12 = sphi %s329_s12, %s13_s12  }
   0x2   : > { %p137_p1 = scmp.lt.s32.totalorder %s307_s12, 3 }
   0x4   : > { %p138_p2 = pnand %p273_p0, %p137_p1 }
   0x5   : > { %p161_p3 = scmp.lt.s32.totalorder (!%p138_p2), %s269_s13, 1 }
   0x6   : > { %141 = sbr.rel (%p138_p2) target bundleno = 29 (0x1d), region = 32 }
   0xb   : > { %s361_s13 = smov (!%p161_p3, %s269_s13), 1  ;;  %v299_v0 = vld [vmem:[%s357_s1] ss:$0 sm:$0xff] }
   0xc   : > { %s289_s14 = smul.u32 40, %s361_s13  ;;  %v300_v1 = vld [vmem:[%s358_s2] ss:$0 sm:$0xff] }
   0xd   : > { %s290_s22 = smul.u32 20, %s361_s13 }
   0xe   : > { %s165_s19 = scalar_lea.vmem %s356_s0, %s289_s14 }
   0xf   : > { %v171_v2 = vld [vmem:[%s165_s19] sm:$0xff]  ;;  %v172_v3 = vld [vmem:[%s165_s19 + $0x8] sm:$0xff]  ;;  %v173_v4 = vld [vmem:[%s165_s19 + $0x10] sm:$0xff]  ;;  %s170_s25 = scalar_lea.vmem %s359_s3, %s290_s22 }
  0x10   : > { %v180_v5 = vmul.f32 %v299_v0, %v171_v2  ;;  %v181_v6 = vmul.f32 %v299_v0, %v172_v3  ;;  %v174_v7 = vld [vmem:[%s165_s19 + $0x18] sm:$0xff]  ;;  %v182_v8 = vmul.f32 %v299_v0, %v173_v4  ;;  %v175_v9 = vld [vmem:[%s165_s19 + $0x20] sm:$0xff] }
  0x11   : > { %v183_v10 = vmul.f32 %v299_v0, %v174_v7  ;;  %v184_v11 = vmul.f32 %v299_v0, %v175_v9 }
  0x12   : > { %v189_v12 = vadd.f32 %v300_v1, %v180_v5  ;;  %v190_v13 = vadd.f32 %v300_v1, %v181_v6  ;;  %v191_v14 = vadd.f32 %v300_v1, %v182_v8 }
  0x13   : > { %v192_v15 = vadd.f32 %v300_v1, %v183_v10  ;;  %v193_v16 = vadd.f32 %v300_v1, %v184_v11 }
  0x14   : > { %v194_v17 = vmul.f32 0.2, %v189_v12  ;;  %v195_v18 = vmul.f32 0.2, %v190_v13  ;;  %v196_v19 = vmul.f32 0.2, %v191_v14 }
  0x15   : > { %v197_v20 = vmul.f32 0.2, %v192_v15  ;;  %v198_v21 = vmul.f32 0.2, %v193_v16 }
  0x16   : > { %v199_v22 = vmax.f32 %v189_v12, %v194_v17  ;;  %v200_v23 = vmax.f32 %v190_v13, %v195_v18  ;;  %v201_v24 = vmax.f32 %v191_v14, %v196_v19 }
  0x17   : > { %v202_v25 = vmax.f32 %v192_v15, %v197_v20  ;;  %v203_v26 = vmax.f32 %v193_v16, %v198_v21 }
  0x18   : > { %v281_v27 = vpack.c.bf16 %v200_v23, %v199_v22 }
  0x19   : > { %v286_v28 = vpack.c.bf16 %v202_v25, %v201_v24  ;;  %v208_v29 = vpack.c.bf16 %v203_v26, %v203_v26 }
  0x1a   : > { %282 = vst [vmem:[%s170_s25] sm:$0xff] %v281_v27  }
  0x1b   : > { %288 = vst [vmem:[%s170_s25 + $0x8] sm:$0xff] %v286_v28  }
  0x1c   : > { %213 = vst [vmem:[%s170_s25 + $0x10] sm:$0xf] %v208_v29 }
  0x1d PF: > { %s13_s12 = sadd.s32 1, %s307_s12  }
  0x1e   : > { %p10_p4 = scmp.ge.s32.totalorder %s13_s12, 4  }
  0x20   :  { %12 = sbr.rel (!%p10_p4) target bundleno = 1 (0x1), region = 62 }

// kernel: _lambda_.13
= control target key start
LH: loop header
LB: loop body
LE: loop exit
PB: predicated region body
PF: predicated region fallthrough
CT: control target
= control target key end

     0   :  { %s1786_s15 = smov 0   ;;  %s2062_s0 = inlined_call_operand.vmem [shape: f32[2,1,40], index: 0, kind: input, shape index: {}]   ;;  %s2063_s1 = inlined_call_operand.vmem [shape: bf16[2,8,8,256], index: 1, kind: input, shape index: {}]   ;;  %s2064_s2 = inlined_call_operand.vmem [shape: bf16[4,256,128], index: 2, kind: input, shape index: {}]   ;;  %s2065_s3 = inlined_call_operand.vmem [shape: f32[2,5,8,128], index: 3, kind: output, shape index: {0}]   ;;  %s2066_s4 = inlined_call_operand.vmem [shape: f32[2,2,128], index: 4, kind: output, shape index: {1}]  }
   0x1 LB: > { %s1219_s16 = sadd.s32 4294967295, %s1759_s15   ;;  %p1223_p0 = scmp.ge.s32.totalorder %s1759_s15, 1  ;;  %s1759_s15 = sphi %s1786_s15, %s15_s15  }
   0x2   : > { %p173_p1 = scmp.lt.s32.totalorder %s1759_s15, 3 }
   0x4   : > { %p174_p2 = pnand %p1223_p0, %p173_p1 }
   0x5   : > { %p206_p3 = scmp.lt.s32.totalorder (!%p174_p2), %s1219_s16, 1 }
   0x6   : > { %177 = sbr.rel (%p174_p2) target bundleno = 403 (0x193), region = 32 }
   0xb   : > { %v1695_v0 = vld [vmem:[%s2064_s2 + $0xb8] sm:$0xff]  ;;  %v1694_v4 = vld [vmem:[%s2064_s2 + $0xb0] sm:$0xff]  ;;  %v1693_v8 = vld [vmem:[%s2064_s2 + $0xa8] sm:$0xff]  ;;  %s2068_s16 = smov (!%p206_p3, %s1219_s16), 1  ;;  %vm1064_vm0 = vcmask 326656   ;;  %vm1116_vm1 = vcmask 1040384  }
   0xc   : > { %v1703_v1 = vld [vmem:[%s2064_s2 + $0xf8] sm:$0xff]  ;;  %422 = vmatpush.bf16.msra.mxu0 %v1695_v0  ;;  %v1702_v5 = vld [vmem:[%s2064_s2 + $0xf0] sm:$0xff]  ;;  %v1701_v9 = vld [vmem:[%s2064_s2 + $0xe8] sm:$0xff]  ;;  %s1663_s17 = sshll.u32 %s2068_s16, 6  ;;  %s208_s11 = scalar_lea.vmem %s2062_s0, %s2068_s16 }
   0xd   : > { %v1675_v2 = vld [vmem:[%s2064_s2 + $0x38] sm:$0xff]  ;;  %445 = vmatpush.bf16.msra.mxu1 %v1703_v1  ;;  %v1674_v6 = vld [vmem:[%s2064_s2 + $0x30] sm:$0xff]  ;;  %v1673_v10 = vld [vmem:[%s2064_s2 + $0x28] sm:$0xff]  ;;  %s1882_s24 = scalar_lea.vmem %s2063_s1, %s1663_s17  ;;  %s1227_s12 = sshll.u32 %s2068_s16, 1 }
   0xe   : > { %v1683_v3 = vld [vmem:[%s2064_s2 + $0x78] sm:$0xff]  ;;  %591 = vmatpush.bf16.msra.mxu2 %v1675_v2  ;;  %v1682_v7 = vld [vmem:[%s2064_s2 + $0x70] sm:$0xff]  ;;  %v1681_v11 = vld [vmem:[%s2064_s2 + $0x68] sm:$0xff]  ;;  %s222_s17 = scalar_lea.vmem %s2066_s4, %s1227_s12 }
   0xf   : > { %614 = vmatpush.bf16.msra.mxu3 %v1683_v3  ;;  %v1692_v12 = vld [vmem:[%s2064_s2 + $0xa0] sm:$0xff]  ;;  %v1691_v16 = vld [vmem:[%s2064_s2 + $0x98] sm:$0xff]  ;;  %v1690_v20 = vld [vmem:[%s2064_s2 + $0x90] sm:$0xff] }
  0x10   : > { %423 = vmatpush.bf16.msra.mxu0 %v1694_v4  ;;  %v1700_v13 = vld [vmem:[%s2064_s2 + $0xe0] sm:$0xff]  ;;  %v1699_v17 = vld [vmem:[%s2064_s2 + $0xd8] sm:$0xff]  ;;  %v1698_v21 = vld [vmem:[%s2064_s2 + $0xd0] sm:$0xff] }
  0x11   : > { %446 = vmatpush.bf16.msra.mxu1 %v1702_v5  ;;  %v1672_v14 = vld [vmem:[%s2064_s2 + $0x20] sm:$0xff]  ;;  %v1671_v18 = vld [vmem:[%s2064_s2 + $0x18] sm:$0xff]  ;;  %v1670_v22 = vld [vmem:[%s2064_s2 + $0x10] sm:$0xff] }
  0x12   : > { %592 = vmatpush.bf16.msra.mxu2 %v1674_v6  ;;  %v1680_v15 = vld [vmem:[%s2064_s2 + $0x60] sm:$0xff]  ;;  %v1679_v19 = vld [vmem:[%s2064_s2 + $0x58] sm:$0xff]  ;;  %v1678_v23 = vld [vmem:[%s2064_s2 + $0x50] sm:$0xff] }
  0x13   : > { %615 = vmatpush.bf16.msra.mxu3 %v1682_v7  ;;  %v1689_v24 = vld [vmem:[%s2064_s2 + $0x88] sm:$0xff]  ;;  %v1688_v28 = vld [vmem:[%s2064_s2 + $0x80] sm:$0xff]  ;;  %v1685_v33 = vld [vmem:[%s1882_s24 + $0xc] sm:$0xf0] }
  0x14   : > { %424 = vmatpush.bf16.msra.mxu0 %v1693_v8  ;;  %v1697_v25 = vld [vmem:[%s2064_s2 + $0xc8] sm:$0xff]  ;;  %v1696_v29 = vld [vmem:[%s2064_s2 + $0xc0] sm:$0xff]  ;;  %v1269_v35 = vld [vmem:[%s1882_s24 + $0x10] sm:$0xf0] }
  0x15   : > { %447 = vmatpush.bf16.msra.mxu1 %v1701_v9  ;;  %v1669_v26 = vld [vmem:[%s2064_s2 + $0x8] sm:$0xff]  ;;  %v1668_v30 = vld [vmem:[%s2064_s2] sm:$0xff]  ;;  %v1715_v40 = vld [vmem:[%s2064_s2 + $0x138] sm:$0xff] }
  0x16   : > { %593 = vmatpush.bf16.msra.mxu2 %v1673_v10  ;;  %v1677_v27 = vld [vmem:[%s2064_s2 + $0x48] sm:$0xff]  ;;  %v1676_v31 = vld [vmem:[%s2064_s2 + $0x40] sm:$0xff]  ;;  %v1723_v41 = vld [vmem:[%s2064_s2 + $0x178] sm:$0xff] }
  0x17   : > { %616 = vmatpush.bf16.msra.mxu3 %v1681_v11  ;;  %v1267_v32 = vld [vmem:[%s1882_s24 + $0x8] sm:$0xf]  ;;  %v1684_v34 = vld [vmem:[%s1882_s24 + $0xc] sm:$0xf]  ;;  %v1347_v36 = vld [vmem:[%s1882_s24] sm:$0xf] }
  0x18   : > { %425 = vmatpush.bf16.msra.mxu0 %v1692_v12  ;;  %v1665_v37 = vld [vmem:[%s1882_s24 + $0x4] sm:$0xf0]  ;;  %v1664_v38 = vld [vmem:[%s1882_s24 + $0x4] sm:$0xf]  ;;  %v1349_v39 = vld [vmem:[%s1882_s24 + $0x8] sm:$0xf0]  ;;  %v1268_v42 = vor.u32 %v1685_v33, %v1267_v32  ;;  %v1272_v43 = vor.u32 %v1684_v34, %v1269_v35 }
  0x19   : > { %448 = vmatpush.bf16.msra.mxu1 %v1700_v13  ;;  %v1348_v44 = vor.u32 %v1665_v37, %v1347_v36  ;;  %v1352_v45 = vor.u32 %v1664_v38, %v1349_v39  ;;  %v1735_v46 = vld [vmem:[%s2064_s2 + $0x1b8] sm:$0xff]  ;;  %v1714_v48 = vld [vmem:[%s2064_s2 + $0x130] sm:$0xff]  ;;  %v1713_v52 = vld [vmem:[%s2064_s2 + $0x128] sm:$0xff] }
  0x1a   : > { %594 = vmatpush.bf16.msra.mxu2 %v1672_v14  ;;  %v1743_v47 = vld [vmem:[%s2064_s2 + $0x1f8] sm:$0xff]  ;;  %v1722_v49 = vld [vmem:[%s2064_s2 + $0x170] sm:$0xff]  ;;  %v1721_v53 = vld [vmem:[%s2064_s2 + $0x168] sm:$0xff] }
  0x1b   : > { %617 = vmatpush.bf16.msra.mxu3 %v1680_v15  ;;  %v1734_v50 = vld [vmem:[%s2064_s2 + $0x1b0] sm:$0xff]  ;;  %v1733_v54 = vld [vmem:[%s2064_s2 + $0x1a8] sm:$0xff]  ;;  %v1275_v56 = vld [vmem:[%s1882_s24 + $0x18] sm:$0xf] }
  0x1c   : > { %426 = vmatpush.bf16.msra.mxu0 %v1691_v16  ;;  %v1742_v51 = vld [vmem:[%s2064_s2 + $0x1f0] sm:$0xff]  ;;  %v1741_v55 = vld [vmem:[%s2064_s2 + $0x1e8] sm:$0xff]  ;;  %v1712_v57 = vld [vmem:[%s2064_s2 + $0x120] sm:$0xff] }
  0x1d   : > { %449 = vmatpush.bf16.msra.mxu1 %v1699_v17  ;;  %v1720_v58 = vld [vmem:[%s2064_s2 + $0x160] sm:$0xff]  ;;  %v1686_v60 = vld [vmem:[%s1882_s24 + $0x1c] sm:$0xf]  ;;  %v1355_v62 = vld [vmem:[%s1882_s24 + $0x10] sm:$0xf] }
  0x1e   : > { %595 = vmatpush.bf16.msra.mxu2 %v1671_v18  ;;  %v1687_v59 = vld [vmem:[%s1882_s24 + $0x1c] sm:$0xf0]  ;;  %v1277_v61 = vld [vmem:[%s1882_s24 + $0x20] sm:$0xf0]  ;;  %v1667_v63 = vld [vmem:[%s1882_s24 + $0x14] sm:$0xf0] }
  0x1f   : > { %618 = vmatpush.bf16.msra.mxu3 %v1679_v19  ;;  %v1666_v0 = vld [vmem:[%s1882_s24 + $0x14] sm:$0xf]  ;;  %v1357_v1 = vld [vmem:[%s1882_s24 + $0x18] sm:$0xf0]  ;;  %v1732_v2 = vld [vmem:[%s2064_s2 + $0x1a0] sm:$0xff]  ;;  %v1276_v6 = vor.u32 %v1687_v59, %v1275_v56  ;;  %v1280_v7 = vor.u32 %v1686_v60, %v1277_v61  ;;  %v1356_v8 = vor.u32 %v1667_v63, %v1355_v62 }
  0x20   : > { %427 = vmatpush.bf16.msra.mxu0 %v1690_v20  ;;  %v1740_v3 = vld [vmem:[%s2064_s2 + $0x1e0] sm:$0xff]  ;;  %v1711_v4 = vld [vmem:[%s2064_s2 + $0x118] sm:$0xff]  ;;  %v1360_v9 = vor.u32 %v1666_v0, %v1357_v1  ;;  %v1710_v12 = vld [vmem:[%s2064_s2 + $0x110] sm:$0xff] }
  0x21   : > { %450 = vmatpush.bf16.msra.mxu1 %v1698_v21  ;;  %v1719_v5 = vld [vmem:[%s2064_s2 + $0x158] sm:$0xff]  ;;  %v1718_v13 = vld [vmem:[%s2064_s2 + $0x150] sm:$0xff]  ;;  %v1709_v16 = vld [vmem:[%s2064_s2 + $0x108] sm:$0xff] }
  0x22   : > { %596 = vmatpush.bf16.msra.mxu2 %v1670_v22  ;;  %v1731_v10 = vld [vmem:[%s2064_s2 + $0x198] sm:$0xff]  ;;  %v1730_v14 = vld [vmem:[%s2064_s2 + $0x190] sm:$0xff]  ;;  %v1717_v17 = vld [vmem:[%s2064_s2 + $0x148] sm:$0xff] }
  0x23   : > { %619 = vmatpush.bf16.msra.mxu3 %v1678_v23  ;;  %v1739_v11 = vld [vmem:[%s2064_s2 + $0x1d8] sm:$0xff]  ;;  %v1738_v15 = vld [vmem:[%s2064_s2 + $0x1d0] sm:$0xff]  ;;  %v1232_v18 = vld [vmem:[%s1882_s24 + $0x28] sm:$0xff] }
  0x24   : > { %428 = vmatpush.bf16.msra.mxu0 %v1689_v24  ;;  %v227_v19 = vld [vmem:[%s1882_s24 + $0x20] sm:$0xff]  ;;  %v1729_v20 = vld [vmem:[%s2064_s2 + $0x188] sm:$0xff]  ;;  %v312_v24 = vunpack.c.l.b16 %v1232_v18  ;;  %v1464_v34 = vld [vmem:[%s1882_s24 + $0x10] sm:$0xf] }
  0x25   : > { %451 = vmatpush.bf16.msra.mxu1 %v1697_v25  ;;  %v1737_v21 = vld [vmem:[%s2064_s2 + $0x1c8] sm:$0xff]  ;;  %v1708_v22 = vld [vmem:[%s2064_s2 + $0x100] sm:$0xff]  ;;  %v313_v25 = vunpack.c.h.b16 %v1232_v18  ;;  %v1705_v35 = vld [vmem:[%s1882_s24 + $0x14] sm:$0xf0] }
  0x26   : > { %597 = vmatpush.bf16.msra.mxu2 %v1669_v26  ;;  %v1716_v23 = vld [vmem:[%s2064_s2 + $0x140] sm:$0xff]  ;;  %v481_v26 = vunpack.c.l.b16 %v227_v19  ;;  %v1704_v36 = vld [vmem:[%s1882_s24 + $0x14] sm:$0xf]  ;;  %v1466_v37 = vld [vmem:[%s1882_s24 + $0x18] sm:$0xf0] }
  0x27   : > { %620 = vmatpush.bf16.msra.mxu3 %v1677_v27  ;;  %v482_v27 = vunpack.c.h.b16 %v227_v19  ;;  %v1581_v38 = vld [vmem:[%s1882_s24 + $0x18] sm:$0xf]  ;;  %v1725_v39 = vld [vmem:[%s1882_s24 + $0x1c] sm:$0xf0] }
  0x28   : > { %429 = vmatpush.bf16.msra.mxu0 %v1688_v28  ;;  %v1728_v28 = vld [vmem:[%s2064_s2 + $0x180] sm:$0xff]  ;;  %v487_v32 = vpack.c.b16 %v481_v26, %v481_v26  ;;  %v1546_v59 = vld [vmem:[%s1882_s24 + $0x38] sm:$0xff] }
  0x29   : > { %452 = vmatpush.bf16.msra.mxu1 %v1696_v29  ;;  %v1736_v29 = vld [vmem:[%s2064_s2 + $0x1c0] sm:$0xff]  ;;  %v488_v33 = vpack.c.b16 %v482_v27, %v482_v27  ;;  %v902_v62 = vunpack.c.l.b16 %v1546_v59  ;;  %v903_v63 = vunpack.c.h.b16 %v1546_v59 }
  0x2a   : > { %598 = vmatpush.bf16.msra.mxu2 %v1668_v30  ;;  %v318_v30 = vpack.c.b16 %v312_v24, %v312_v24 }
  0x2b   : > { %621 = vmatpush.bf16.msra.mxu3 %v1676_v31  ;;  %430 = vmatmul.bf16.vlgmr.msra.gmra.mxu0 %v1268_v42  ;;  %v319_v31 = vpack.c.b16 %v313_v25, %v313_v25  ;;  %v1465_v42 = vor.u32 %v1705_v35, %v1464_v34 }
  0x2c   : > { %799 = vmatpush.bf16.msrb.mxu0 %v1715_v40  ;;  %453 = vmatmul.bf16.vlgmr.msra.gmra.mxu1 %v1272_v43  ;;  %v1724_v40 = vld [vmem:[%s1882_s24 + $0x1c] sm:$0xf]  ;;  %v1469_v43 = vor.u32 %v1704_v36, %v1466_v37 }
  0x2d   : > { %822 = vmatpush.bf16.msrb.mxu1 %v1723_v41  ;;  %599 = vmatmul.bf16.vlgmr.msra.gmra.mxu2 %v1348_v44  ;;  %v1583_v41 = vld [vmem:[%s1882_s24 + $0x20] sm:$0xf0]  ;;  %v1582_v44 = vor.u32 %v1725_v39, %v1581_v38 }
  0x2e   : > { %622 = vmatmul.bf16.vlgmr.msra.gmra.mxu3 %v1352_v45  ;;  %1012 = vmatpush.bf16.msrb.mxu2 %v1735_v46  ;;  %v1586_v45 = vor.u32 %v1724_v40, %v1583_v41  ;;  %v1472_v46 = vld [vmem:[%s1882_s24 + $0x20] sm:$0xf] }
  0x2f   : > { %1035 = vmatpush.bf16.msrb.mxu3 %v1743_v47  ;;  %v1707_v47 = vld [vmem:[%s1882_s24 + $0x24] sm:$0xf0] }
  0x30   : > { %800 = vmatpush.bf16.msrb.mxu0 %v1714_v48  ;;  %v1706_v48 = vld [vmem:[%s1882_s24 + $0x24] sm:$0xf] }
  0x31   : > { %823 = vmatpush.bf16.msrb.mxu1 %v1722_v49  ;;  %v1474_v49 = vld [vmem:[%s1882_s24 + $0x28] sm:$0xf0] }
  0x32   : > { %1013 = vmatpush.bf16.msrb.mxu2 %v1734_v50  ;;  %v1589_v50 = vld [vmem:[%s1882_s24 + $0x28] sm:$0xf] }
  0x33   : > { %1036 = vmatpush.bf16.msrb.mxu3 %v1742_v51  ;;  %v1727_v51 = vld [vmem:[%s1882_s24 + $0x2c] sm:$0xf0] }
  0x34   : > { %801 = vmatpush.bf16.msrb.mxu0 %v1713_v52  ;;  %v1726_v52 = vld [vmem:[%s1882_s24 + $0x2c] sm:$0xf]  ;;  %v1590_v56 = vor.u32 %v1727_v51, %v1589_v50 }
  0x35   : > { %824 = vmatpush.bf16.msrb.mxu1 %v1721_v53  ;;  %v1591_v53 = vld [vmem:[%s1882_s24 + $0x30] sm:$0xf0] }
  0x36   : > { %1014 = vmatpush.bf16.msrb.mxu2 %v1733_v54  ;;  %v1473_v54 = vor.u32 %v1707_v47, %v1472_v46 }
  0x37   : > { %1037 = vmatpush.bf16.msrb.mxu3 %v1741_v55  ;;  %v1477_v55 = vor.u32 %v1706_v48, %v1474_v49 }
  0x38   : > { %802 = vmatpush.bf16.msrb.mxu0 %v1712_v57  ;;  %v1594_v57 = vor.u32 %v1726_v52, %v1591_v53 }
  0x39   : > { %825 = vmatpush.bf16.msrb.mxu1 %v1720_v58  ;;  %v1429_v58 = vld [vmem:[%s1882_s24 + $0x30] sm:$0xff]  ;;  %s1744_s24 = smul.u32 40, %s2068_s16 }
  0x3a   : > { %1015 = vmatpush.bf16.msrb.mxu2 %v1732_v2  ;;  %v689_v60 = vunpack.c.l.b16 %v1429_v58  ;;  %v690_v61 = vunpack.c.h.b16 %v1429_v58  ;;  %v908_v2 = vpack.c.b16 %v902_v62, %v902_v62 }
  0x3b   : > { %1038 = vmatpush.bf16.msrb.mxu3 %v1740_v3  ;;  %435 = vmatmul.bf16.gmra.mxu0 %v1276_v6  ;;  %v909_v3 = vpack.c.b16 %v903_v63, %v903_v63  ;;  %s2038_s8 = scalar_lea.vmem %s2065_s3, %s1744_s24 }
  0x3c   : > { %803 = vmatpush.bf16.msrb.mxu0 %v1711_v4  ;;  %458 = vmatmul.bf16.gmra.mxu1 %v1280_v7  ;;  %v695_v0 = vpack.c.b16 %v689_v60, %v689_v60  ;;  %v696_v1 = vpack.c.b16 %v690_v61, %v690_v61 }
  0x3d   : > { %826 = vmatpush.bf16.msrb.mxu1 %v1719_v5  ;;  %604 = vmatmul.bf16.gmra.mxu2 %v1356_v8 }
  0x3e   : > { %627 = vmatmul.bf16.gmra.mxu3 %v1360_v9  ;;  %1016 = vmatpush.bf16.msrb.mxu2 %v1731_v10 }
  0x3f   : > { %1039 = vmatpush.bf16.msrb.mxu3 %v1739_v11 }
  0x40   : > { %804 = vmatpush.bf16.msrb.mxu0 %v1710_v12 }
  0x41   : > { %827 = vmatpush.bf16.msrb.mxu1 %v1718_v13 }
  0x42   : > { %1017 = vmatpush.bf16.msrb.mxu2 %v1730_v14 }
  0x43   : > { %1040 = vmatpush.bf16.msrb.mxu3 %v1738_v15 }
  0x44   : > { %805 = vmatpush.bf16.msrb.mxu0 %v1709_v16 }
  0x45   : > { %828 = vmatpush.bf16.msrb.mxu1 %v1717_v17 }
  0x46   : > { %1018 = vmatpush.bf16.msrb.mxu2 %v1729_v20 }
  0x47   : > { %1041 = vmatpush.bf16.msrb.mxu3 %v1737_v21 }
  0x48   : > { %806 = vmatpush.bf16.msrb.mxu0 %v1708_v22 }
  0x49   : > { %829 = vmatpush.bf16.msrb.mxu1 %v1716_v23 }
  0x4a   : > { %1019 = vmatpush.bf16.msrb.mxu2 %v1728_v28 }
  0x4b   : > { %1042 = vmatpush.bf16.msrb.mxu3 %v1736_v29  ;;  %440 = vmatmul.bf16.gmra.mxu0 %v318_v30 }
  0x4c   : > { %463 = vmatmul.bf16.gmra.mxu1 %v319_v31 }
  0x4d   : > { %609 = vmatmul.bf16.gmra.mxu2 %v487_v32 }
  0x4e   : > { %632 = vmatmul.bf16.gmra.mxu3 %v488_v33 }
  0x5b   : > { %807 = vmatmul.bf16.vlgmr.msrb.gmra.mxu0 %v1465_v42 }
  0x5c   : > { %830 = vmatmul.bf16.vlgmr.msrb.gmra.mxu1 %v1469_v43 }
  0x5d   : > { %1020 = vmatmul.bf16.vlgmr.msrb.gmra.mxu2 %v1582_v44 }
  0x5e   : > { %1043 = vmatmul.bf16.vlgmr.msrb.gmra.mxu3 %v1586_v45 }
  0x6b   : > { %812 = vmatmul.bf16.gmra.mxu0 %v1473_v54 }
  0x6c   : > { %835 = vmatmul.bf16.gmra.mxu1 %v1477_v55 }
  0x6d   : > { %1025 = vmatmul.bf16.gmra.mxu2 %v1590_v56 }
  0x6e   : > { %1048 = vmatmul.bf16.gmra.mxu3 %v1594_v57 }
  0x7b   : > { %817 = vmatmul.bf16.gmra.mxu0 %v695_v0 }
  0x7c   : > { %840 = vmatmul.bf16.gmra.mxu1 %v696_v1 }
  0x7d   : > { %1030 = vmatmul.bf16.gmra.mxu2 %v908_v2 }
  0x7e   : > { %1053 = vmatmul.bf16.gmra.mxu3 %v909_v3 }
  0xa8   : > { %v431_v4 = vpop.f32.mrf.mxu0 }
  0xa9   : > { %v454_v5 = vpop.f32.mrf.mxu1 }
  0xaa   : > { %v455_v26 = vadd.f32 %v454_v5, %v431_v4 }
  0xb0   : > { %v600_v6 = vpop.f32.mrf.mxu2  ;;  %v433_v8 = vpop.f32.mrf.mxu0 }
  0xb1   : > { %v623_v7 = vpop.f32.mrf.mxu3  ;;  %v456_v9 = vpop.f32.mrf.mxu1  ;;  %v601_v31 = vadd.f32 %v600_v6, %v455_v26 }
  0xb2   : > { %v457_v36 = vadd.f32 %v456_v9, %v433_v8 }
  0xb3   : > { %v624_v33 = vadd.f32 %v623_v7, %v601_v31 }
  0xb8   : > { %v602_v10 = vpop.f32.mrf.mxu2  ;;  %v436_v12 = vpop.f32.mrf.mxu0 }
  0xb9   : > { %v625_v11 = vpop.f32.mrf.mxu3  ;;  %v459_v13 = vpop.f32.mrf.mxu1  ;;  %v603_v41 = vadd.f32 %v602_v10, %v457_v36 }
  0xba   : > { %v460_v45 = vadd.f32 %v459_v13, %v436_v12 }
  0xbb   : > { %v626_v44 = vadd.f32 %v625_v11, %v603_v41 }
  0xc0   : > { %v605_v14 = vpop.f32.mrf.mxu2  ;;  %v438_v16 = vpop.f32.mrf.mxu0 }
  0xc1   : > { %v628_v15 = vpop.f32.mrf.mxu3  ;;  %v461_v17 = vpop.f32.mrf.mxu1  ;;  %v606_v52 = vadd.f32 %v605_v14, %v460_v45 }
  0xc2   : > { %v462_v58 = vadd.f32 %v461_v17, %v438_v16 }
  0xc3   : > { %v629_v55 = vadd.f32 %v628_v15, %v606_v52 }
  0xc8   : > { %v607_v18 = vpop.f32.mrf.mxu2  ;;  %v441_v20 = vpop.f32.mrf.mxu0 }
  0xc9   : > { %v630_v19 = vpop.f32.mrf.mxu3  ;;  %v464_v21 = vpop.f32.mrf.mxu1  ;;  %v608_v63 = vadd.f32 %v607_v18, %v462_v58 }
  0xca   : > { %v465_v3 = vadd.f32 %v464_v21, %v441_v20 }
  0xcb   : > { %v631_v2 = vadd.f32 %v630_v19, %v608_v63 }
  0xd0   : > { %v610_v22 = vpop.f32.mrf.mxu2  ;;  %v443_v24 = vpop.f32.mrf.mxu0 }
  0xd1   : > { %v633_v23 = vpop.f32.mrf.mxu3  ;;  %v466_v25 = vpop.f32.mrf.mxu1  ;;  %v611_v10 = vadd.f32 %v610_v22, %v465_v3 }
  0xd3   : > { %v634_v13 = vadd.f32 %v633_v23, %v611_v10 }
  0xd8   : > { %v612_v27 = vpop.f32.mrf.mxu2  ;;  %v808_v29 = vpop.f32.mrf.mxu0 }
  0xd9   : > { %v635_v28 = vpop.f32.mrf.mxu3  ;;  %v831_v30 = vpop.f32.mrf.mxu1 }
  0xda   : > { %v832_v32 = vadd.f32 %v831_v30, %v808_v29  ;;  %v1063_v28 = vld [vmem:[%s208_s11] sm:$0x1] }
  0xdc   : > { %v845_v37 = vadd.f32 %v832_v32, %v624_v33 }
  0xe0   : > { %v1021_v34 = vpop.f32.mrf.mxu2  ;;  %v810_v39 = vpop.f32.mrf.mxu0 }
  0xe1   : > { %v1044_v35 = vpop.f32.mrf.mxu3  ;;  %v833_v40 = vpop.f32.mrf.mxu1 }
  0xe2   : > { %v1045_v38 = vadd.f32 %v1044_v35, %v1021_v34  ;;  %v834_v43 = vadd.f32 %v833_v40, %v810_v39 }
  0xe4   : > { %v2040_v42 = vadd.f32 %v1045_v38, %v845_v37  ;;  %v846_v48 = vadd.f32 %v834_v43, %v626_v44 }
  0xe6   : > { %1119 = vst [vmem:[%s2038_s8] sm:$0xff] %v2040_v42  ;;  %v1088_v27 = vmul.f32 %v2040_v42, %v2040_v42 }
  0xe8   : > { %v1023_v46 = vpop.f32.mrf.mxu2  ;;  %v813_v50 = vpop.f32.mrf.mxu0 }
  0xe9   : > { %v1046_v47 = vpop.f32.mrf.mxu3  ;;  %v836_v51 = vpop.f32.mrf.mxu1 }
  0xea   : > { %v1047_v49 = vadd.f32 %v1046_v47, %v1023_v46  ;;  %v837_v54 = vadd.f32 %v836_v51, %v813_v50 }
  0xec   : > { %v1059_v53 = vadd.f32 %v1047_v49, %v846_v48  ;;  %v847_v59 = vadd.f32 %v837_v54, %v629_v55 }
  0xee   : > { %1120 = vst [vmem:[%s2038_s8 + $0x8] sm:$0xff] %v1059_v53  ;;  %v1089_v26 = vmul.f32 %v1059_v53, %v1059_v53 }
  0xf0   : > { %v1026_v56 = vpop.f32.mrf.mxu2  ;;  %v815_v61 = vpop.f32.mrf.mxu0 }
  0xf1   : > { %v1049_v57 = vpop.f32.mrf.mxu3  ;;  %v838_v62 = vpop.f32.mrf.mxu1 }
  0xf2   : > { %v1050_v60 = vadd.f32 %v1049_v57, %v1026_v56  ;;  %v839_v1 = vadd.f32 %v838_v62, %v815_v61 }
  0xf4   : > { %v1060_v0 = vadd.f32 %v1050_v60, %v847_v59  ;;  %v848_v6 = vadd.f32 %v839_v1, %v631_v2 }
  0xf6   : > { %1121 = vst [vmem:[%s2038_s8 + $0x10] sm:$0xff] %v1060_v0  ;;  %v1090_v23 = vmul.f32 %v1060_v0, %v1060_v0 }
  0xf8   : > { %v1028_v4 = vpop.f32.mrf.mxu2  ;;  %v818_v8 = vpop.f32.mrf.mxu0 }
  0xf9   : > { %v1051_v5 = vpop.f32.mrf.mxu3  ;;  %v841_v9 = vpop.f32.mrf.mxu1 }
  0xfa   : > { %v1052_v7 = vadd.f32 %v1051_v5, %v1028_v4  ;;  %v842_v12 = vadd.f32 %v841_v9, %v818_v8 }
  0xfc   : > { %v1061_v11 = vadd.f32 %v1052_v7, %v848_v6  ;;  %v849_v16 = vadd.f32 %v842_v12, %v634_v13 }
  0xfe   : > { %1122 = vst [vmem:[%s2038_s8 + $0x18] sm:$0xff] %v1061_v11  ;;  %v1091_v24 = vmul.f32 %v1061_v11, %v1061_v11 }
 0x100   : > { %v1031_v14 = vpop.f32.mrf.mxu2  ;;  %v820_v18 = vpop.f32.mrf.mxu0 }
 0x101   : > { %v1054_v15 = vpop.f32.mrf.mxu3  ;;  %v843_v19 = vpop.f32.mrf.mxu1 }
 0x102   : > { %v1055_v17 = vadd.f32 %v1054_v15, %v1031_v14 }
 0x104   : > { %v1062_v20 = vadd.f32 %v1055_v17, %v849_v16 }
 0x106   : > { %v1092_v21 = vmul.f32 %v1062_v20, %v1062_v20  ;;  %1123 = vst [vmem:[%s2038_s8 + $0x20] sm:$0xff] %v1062_v20  ;;  %1079 = vmatpush.msra.mxu0 %v1062_v20 }
 0x108   : > { %1080 = vmatpush.msra.mxu0 %v1061_v11  ;;  %1104 = vmatpush.msra.mxu1 %v1092_v21  ;;  %v1033_v25 = vpop.f32.mrf.mxu2 }
 0x109   : > { %v1056_v22 = vpop.f32.mrf.mxu3 }
 0x10a   : > { %1081 = vmatpush.msra.mxu0 %v1060_v0  ;;  %1105 = vmatpush.msra.mxu1 %v1091_v24 }
 0x10c   : > { %1082 = vmatpush.msra.mxu0 %v1059_v53  ;;  %1106 = vmatpush.msra.mxu1 %v1090_v23 }
 0x10e   : > { %1083 = vmatpush.msra.mxu0 %v2040_v42  ;;  %1107 = vmatpush.msra.mxu1 %v1089_v26 }
 0x10f   : > { %1659 = vmatmul.msk.f32.vlgmr.msra.gmra.mxu0 %vm1064_vm0, %v1063_v28 }
 0x110   : > { %1108 = vmatpush.msra.mxu1 %v1088_v27 }
 0x111   : > { %1660 = vmatmul.msk.f32.vlgmr.msra.gmra.mxu1 %vm1064_vm0, %v1063_v28 }
 0x18c   : > { %v1085_v30 = vpop.f32.mrf.mxu0 }
 0x18e   : > { %v1110_v29 = vpop.f32.mrf.mxu1 }
 0x18f   : > { %v1114_v31 = vrot.slane %v1110_v29, 7 }
 0x191   : > { %v1117_v32 = vsel %vm1116_vm1, %v1085_v30, %v1114_v31 }
 0x192   : > { %1118 = vst [vmem:[%s222_s17] sm:$0x3] %v1117_v32 }
 0x193 PF: > { %s15_s15 = sadd.s32 1, %s1759_s15  }
 0x194   : > { %p12_p4 = scmp.ge.s32.totalorder %s15_s15, 4  }
 0x196   :  { %14 = sbr.rel (!%p12_p4) target bundleno = 1 (0x1), region = 83 }

// kernel: _lambda_.15
= control target key start
LH: loop header
LB: loop body
LE: loop exit
PB: predicated region body
PF: predicated region fallthrough
CT: control target
= control target key end

     0   :  { %s2837_s12 = smov 0   ;;  %s3342_s0 = inlined_call_operand.vmem [shape: bf16[2,7,8,512], index: 0, kind: input, shape index: {}]   ;;  %s3343_s1 = inlined_call_operand.vmem [shape: bf16[4,512,128], index: 1, kind: input, shape index: {}]   ;;  %s3344_s2 = inlined_call_operand.vmem [shape: f32[1,128], index: 2, kind: input, shape index: {}]   ;;  %s3345_s3 = inlined_call_operand.vmem [shape: f32[2,4,8,128], index: 3, kind: output, shape index: {}]  }
   0x1 LB: > { %s1772_s13 = sadd.s32 4294967295, %s2815_s12   ;;  %p1776_p0 = scmp.ge.s32.totalorder %s2815_s12, 1  ;;  %s2815_s12 = sphi %s2837_s12, %s13_s12  }
   0x2   : > { %p137_p1 = scmp.lt.s32.totalorder %s2815_s12, 3 }
   0x4   : > { %p138_p2 = pnand %p1776_p0, %p137_p1 }
   0x5   : > { %p161_p3 = scmp.lt.s32.totalorder (!%p138_p2), %s1772_s13, 1 }
   0x6   : > { %141 = sbr.rel (%p138_p2) target bundleno = 306 (0x132), region = 32 }
   0xb   : > { %v2694_v0 = vld [vmem:[%s3343_s1 + $0x138] sm:$0xff]  ;;  %v2693_v4 = vld [vmem:[%s3343_s1 + $0x130] sm:$0xff]  ;;  %v2692_v8 = vld [vmem:[%s3343_s1 + $0x128] sm:$0xff]  ;;  %s3347_s13 = smov (!%p161_p3, %s1772_s13), 1 }
   0xc   : > { %v2702_v1 = vld [vmem:[%s3343_s1 + $0x178] sm:$0xff]  ;;  %549 = vmatpush.bf16.msra.mxu0 %v2694_v0  ;;  %v2701_v5 = vld [vmem:[%s3343_s1 + $0x170] sm:$0xff]  ;;  %v2700_v9 = vld [vmem:[%s3343_s1 + $0x168] sm:$0xff]  ;;  %s2799_s6 = smul.u32 112, %s3347_s13 }
   0xd   : > { %v2710_v2 = vld [vmem:[%s3343_s1 + $0x1b8] sm:$0xff]  ;;  %568 = vmatpush.bf16.msra.mxu1 %v2702_v1  ;;  %v2709_v6 = vld [vmem:[%s3343_s1 + $0x1b0] sm:$0xff]  ;;  %v2708_v10 = vld [vmem:[%s3343_s1 + $0x1a8] sm:$0xff] }
   0xe   : > { %v2718_v3 = vld [vmem:[%s3343_s1 + $0x1f8] sm:$0xff]  ;;  %587 = vmatpush.bf16.msra.mxu2 %v2710_v2  ;;  %v2717_v7 = vld [vmem:[%s3343_s1 + $0x1f0] sm:$0xff]  ;;  %v2716_v11 = vld [vmem:[%s3343_s1 + $0x1e8] sm:$0xff]  ;;  %s2933_s19 = scalar_lea.vmem %s3342_s0, %s2799_s6 }
   0xf   : > { %606 = vmatpush.bf16.msra.mxu3 %v2718_v3  ;;  %v2691_v12 = vld [vmem:[%s3343_s1 + $0x120] sm:$0xff]  ;;  %v2690_v16 = vld [vmem:[%s3343_s1 + $0x118] sm:$0xff]  ;;  %v2689_v20 = vld [vmem:[%s3343_s1 + $0x110] sm:$0xff] }
  0x10   : > { %550 = vmatpush.bf16.msra.mxu0 %v2693_v4  ;;  %v2699_v13 = vld [vmem:[%s3343_s1 + $0x160] sm:$0xff]  ;;  %v2698_v17 = vld [vmem:[%s3343_s1 + $0x158] sm:$0xff]  ;;  %v2697_v21 = vld [vmem:[%s3343_s1 + $0x150] sm:$0xff] }
  0x11   : > { %569 = vmatpush.bf16.msra.mxu1 %v2701_v5  ;;  %v2707_v14 = vld [vmem:[%s3343_s1 + $0x1a0] sm:$0xff]  ;;  %v2706_v18 = vld [vmem:[%s3343_s1 + $0x198] sm:$0xff]  ;;  %v2705_v22 = vld [vmem:[%s3343_s1 + $0x190] sm:$0xff] }
  0x12   : > { %588 = vmatpush.bf16.msra.mxu2 %v2709_v6  ;;  %v2715_v15 = vld [vmem:[%s3343_s1 + $0x1e0] sm:$0xff]  ;;  %v2714_v19 = vld [vmem:[%s3343_s1 + $0x1d8] sm:$0xff]  ;;  %v2713_v23 = vld [vmem:[%s3343_s1 + $0x1d0] sm:$0xff] }
  0x13   : > { %607 = vmatpush.bf16.msra.mxu3 %v2717_v7  ;;  %v2688_v24 = vld [vmem:[%s3343_s1 + $0x108] sm:$0xff]  ;;  %v2687_v28 = vld [vmem:[%s3343_s1 + $0x100] sm:$0xff]  ;;  %v1854_v32 = vld [vmem:[%s2933_s19 + $0x10] sm:$0xf] }
  0x14   : > { %551 = vmatpush.bf16.msra.mxu0 %v2692_v8  ;;  %v2696_v25 = vld [vmem:[%s3343_s1 + $0x148] sm:$0xff]  ;;  %v2695_v29 = vld [vmem:[%s3343_s1 + $0x140] sm:$0xff]  ;;  %v2679_v34 = vld [vmem:[%s2933_s19 + $0x14] sm:$0xf] }
  0x15   : > { %570 = vmatpush.bf16.msra.mxu1 %v2700_v9  ;;  %v2704_v26 = vld [vmem:[%s3343_s1 + $0x188] sm:$0xff]  ;;  %v2703_v30 = vld [vmem:[%s3343_s1 + $0x180] sm:$0xff]  ;;  %v1862_v36 = vld [vmem:[%s2933_s19 + $0x18] sm:$0xf] }
  0x16   : > { %589 = vmatpush.bf16.msra.mxu2 %v2708_v10  ;;  %v2712_v27 = vld [vmem:[%s3343_s1 + $0x1c8] sm:$0xff]  ;;  %v2711_v31 = vld [vmem:[%s3343_s1 + $0x1c0] sm:$0xff]  ;;  %v2680_v38 = vld [vmem:[%s2933_s19 + $0x1c] sm:$0xf] }
  0x17   : > { %608 = vmatpush.bf16.msra.mxu3 %v2716_v11  ;;  %v2681_v33 = vld [vmem:[%s2933_s19 + $0x1c] sm:$0xf0]  ;;  %v1856_v35 = vld [vmem:[%s2933_s19 + $0x20] sm:$0xf0]  ;;  %v2682_v37 = vld [vmem:[%s2933_s19 + $0x24] sm:$0xf0] }
  0x18   : > { %552 = vmatpush.bf16.msra.mxu0 %v2691_v12  ;;  %v1864_v39 = vld [vmem:[%s2933_s19 + $0x28] sm:$0xf0]  ;;  %v2670_v40 = vld [vmem:[%s3343_s1 + $0xb8] sm:$0xff]  ;;  %v1855_v42 = vor.u32 %v2681_v33, %v1854_v32  ;;  %v1859_v43 = vor.u32 %v2679_v34, %v1856_v35  ;;  %v1863_v44 = vor.u32 %v2682_v37, %v1862_v36  ;;  %v2669_v48 = vld [vmem:[%s3343_s1 + $0xb0] sm:$0xff] }
  0x19   : > { %571 = vmatpush.bf16.msra.mxu1 %v2699_v13  ;;  %v2654_v41 = vld [vmem:[%s3343_s1 + $0x38] sm:$0xff]  ;;  %v1867_v45 = vor.u32 %v2680_v38, %v1864_v39  ;;  %v2653_v49 = vld [vmem:[%s3343_s1 + $0x30] sm:$0xff]  ;;  %v2668_v52 = vld [vmem:[%s3343_s1 + $0xa8] sm:$0xff] }
  0x1a   : > { %590 = vmatpush.bf16.msra.mxu2 %v2707_v14  ;;  %v2662_v46 = vld [vmem:[%s3343_s1 + $0x78] sm:$0xff]  ;;  %v2661_v50 = vld [vmem:[%s3343_s1 + $0x70] sm:$0xff]  ;;  %v2652_v53 = vld [vmem:[%s3343_s1 + $0x28] sm:$0xff] }
  0x1b   : > { %609 = vmatpush.bf16.msra.mxu3 %v2715_v15  ;;  %v2678_v47 = vld [vmem:[%s3343_s1 + $0xf8] sm:$0xff]  ;;  %v2677_v51 = vld [vmem:[%s3343_s1 + $0xf0] sm:$0xff]  ;;  %v2660_v54 = vld [vmem:[%s3343_s1 + $0x68] sm:$0xff] }
  0x1c   : > { %553 = vmatpush.bf16.msra.mxu0 %v2690_v16  ;;  %v2676_v55 = vld [vmem:[%s3343_s1 + $0xe8] sm:$0xff]  ;;  %v2667_v56 = vld [vmem:[%s3343_s1 + $0xa0] sm:$0xff]  ;;  %v1870_v60 = vld [vmem:[%s2933_s19 + $0x30] sm:$0xf] }
  0x1d   : > { %572 = vmatpush.bf16.msra.mxu1 %v2698_v17  ;;  %v2651_v57 = vld [vmem:[%s3343_s1 + $0x20] sm:$0xff]  ;;  %v2683_v62 = vld [vmem:[%s2933_s19 + $0x34] sm:$0xf]  ;;  %v1878_v0 = vld [vmem:[%s2933_s19 + $0x38] sm:$0xf] }
  0x1e   : > { %591 = vmatpush.bf16.msra.mxu2 %v2706_v18  ;;  %v2659_v58 = vld [vmem:[%s3343_s1 + $0x60] sm:$0xff]  ;;  %v2686_v1 = vld [vmem:[%s2933_s19 + $0x44] sm:$0xf0]  ;;  %v2684_v2 = vld [vmem:[%s2933_s19 + $0x3c] sm:$0xf] }
  0x1f   : > { %610 = vmatpush.bf16.msra.mxu3 %v2714_v19  ;;  %v2675_v59 = vld [vmem:[%s3343_s1 + $0xe0] sm:$0xff]  ;;  %v1880_v3 = vld [vmem:[%s2933_s19 + $0x48] sm:$0xf0]  ;;  %v2666_v4 = vld [vmem:[%s3343_s1 + $0x98] sm:$0xff]  ;;  %v1879_v8 = vor.u32 %v2686_v1, %v1878_v0 }
  0x20   : > { %554 = vmatpush.bf16.msra.mxu0 %v2689_v20  ;;  %v2685_v61 = vld [vmem:[%s2933_s19 + $0x3c] sm:$0xf0]  ;;  %v1872_v63 = vld [vmem:[%s2933_s19 + $0x40] sm:$0xf0]  ;;  %v2650_v5 = vld [vmem:[%s3343_s1 + $0x18] sm:$0xff]  ;;  %v1883_v9 = vor.u32 %v2684_v2, %v1880_v3 }
  0x21   : > { %573 = vmatpush.bf16.msra.mxu1 %v2697_v21  ;;  %v1871_v6 = vor.u32 %v2685_v61, %v1870_v60  ;;  %v1875_v7 = vor.u32 %v2683_v62, %v1872_v63  ;;  %v2658_v10 = vld [vmem:[%s3343_s1 + $0x58] sm:$0xff]  ;;  %v2665_v12 = vld [vmem:[%s3343_s1 + $0x90] sm:$0xff]  ;;  %v2664_v16 = vld [vmem:[%s3343_s1 + $0x88] sm:$0xff] }
  0x22   : > { %592 = vmatpush.bf16.msra.mxu2 %v2705_v22  ;;  %v2674_v11 = vld [vmem:[%s3343_s1 + $0xd8] sm:$0xff]  ;;  %v2649_v13 = vld [vmem:[%s3343_s1 + $0x10] sm:$0xff]  ;;  %v2648_v17 = vld [vmem:[%s3343_s1 + $0x8] sm:$0xff] }
  0x23   : > { %611 = vmatpush.bf16.msra.mxu3 %v2713_v23  ;;  %v2657_v14 = vld [vmem:[%s3343_s1 + $0x50] sm:$0xff]  ;;  %v2656_v18 = vld [vmem:[%s3343_s1 + $0x48] sm:$0xff]  ;;  %v2663_v20 = vld [vmem:[%s3343_s1 + $0x80] sm:$0xff] }
  0x24   : > { %555 = vmatpush.bf16.msra.mxu0 %v2688_v24  ;;  %v2673_v15 = vld [vmem:[%s3343_s1 + $0xd0] sm:$0xff]  ;;  %v2672_v19 = vld [vmem:[%s3343_s1 + $0xc8] sm:$0xff]  ;;  %v2647_v21 = vld [vmem:[%s3343_s1] sm:$0xff] }
  0x25   : > { %574 = vmatpush.bf16.msra.mxu1 %v2696_v25  ;;  %v2655_v22 = vld [vmem:[%s3343_s1 + $0x40] sm:$0xff]  ;;  %v2750_v25 = vld [vmem:[%s3343_s1 + $0x2b8] sm:$0xff]  ;;  %v2640_v32 = vld [vmem:[%s2933_s19 + $0xc] sm:$0xf] }
  0x26   : > { %593 = vmatpush.bf16.msra.mxu2 %v2704_v26  ;;  %v2671_v23 = vld [vmem:[%s3343_s1 + $0xc0] sm:$0xff]  ;;  %v2734_v26 = vld [vmem:[%s3343_s1 + $0x238] sm:$0xff]  ;;  %v2749_v37 = vld [vmem:[%s3343_s1 + $0x2b0] sm:$0xff] }
  0x27   : > { %612 = vmatpush.bf16.msra.mxu3 %v2712_v27  ;;  %v2014_v24 = vld [vmem:[%s2933_s19] sm:$0xf]  ;;  %v2641_v27 = vld [vmem:[%s2933_s19 + $0xc] sm:$0xf0]  ;;  %v2024_v33 = vld [vmem:[%s2933_s19 + $0x18] sm:$0xf0] }
  0x28   : > { %556 = vmatpush.bf16.msra.mxu0 %v2687_v28  ;;  %v2639_v28 = vld [vmem:[%s2933_s19 + $0x4] sm:$0xf]  ;;  %v2742_v34 = vld [vmem:[%s3343_s1 + $0x278] sm:$0xff]  ;;  %v2015_v36 = vor.u32 %v2641_v27, %v2014_v24  ;;  %v2745_v1 = vld [vmem:[%s3343_s1 + $0x290] sm:$0xff] }
  0x29   : > { %575 = vmatpush.bf16.msra.mxu1 %v2695_v29  ;;  %v2016_v29 = vld [vmem:[%s2933_s19 + $0x10] sm:$0xf0]  ;;  %v2758_v35 = vld [vmem:[%s3343_s1 + $0x2f8] sm:$0xff]  ;;  %v2720_v27 = vld [vmem:[%s2933_s19 + $0x2c] sm:$0xf] }
  0x2a   : > { %594 = vmatpush.bf16.msra.mxu2 %v2703_v30  ;;  %v2022_v30 = vld [vmem:[%s2933_s19 + $0x8] sm:$0xf]  ;;  %v2019_v38 = vor.u32 %v2639_v28, %v2016_v29  ;;  %v2730_v60 = vld [vmem:[%s3343_s1 + $0x218] sm:$0xff]  ;;  %v2248_v24 = vld [vmem:[%s2933_s19 + $0x30] sm:$0xf0] }
  0x2b   : > { %613 = vmatpush.bf16.msra.mxu3 %v2711_v31  ;;  %557 = vmatmul.bf16.vlgmr.msra.gmra.mxu0 %v1855_v42  ;;  %v2642_v31 = vld [vmem:[%s2933_s19 + $0x14] sm:$0xf0]  ;;  %v2741_v42 = vld [vmem:[%s3343_s1 + $0x270] sm:$0xff]  ;;  %v2040_v61 = vld [vmem:[%s2933_s19 + $0x38] sm:$0xf0] }
  0x2c   : > { %857 = vmatpush.bf16.msrb.mxu0 %v2654_v41  ;;  %576 = vmatmul.bf16.vlgmr.msra.gmra.mxu1 %v1859_v43  ;;  %v2023_v39 = vor.u32 %v2642_v31, %v2022_v30  ;;  %v2733_v41 = vld [vmem:[%s3343_s1 + $0x230] sm:$0xff]  ;;  %v2738_v62 = vld [vmem:[%s3343_s1 + $0x258] sm:$0xff] }
  0x2d   : > { %595 = vmatmul.bf16.vlgmr.msra.gmra.mxu2 %v1863_v44  ;;  %876 = vmatpush.bf16.msrb.mxu1 %v2662_v46  ;;  %v2757_v43 = vld [vmem:[%s3343_s1 + $0x2f0] sm:$0xff]  ;;  %v2748_v44 = vld [vmem:[%s3343_s1 + $0x2a8] sm:$0xff]  ;;  %v2754_v63 = vld [vmem:[%s3343_s1 + $0x2d8] sm:$0xff] }
  0x2e   : > { %895 = vmatpush.bf16.msrb.mxu2 %v2670_v40  ;;  %614 = vmatmul.bf16.vlgmr.msra.gmra.mxu3 %v1867_v45  ;;  %v2027_v40 = vor.u32 %v2640_v32, %v2024_v33  ;;  %v2732_v45 = vld [vmem:[%s3343_s1 + $0x228] sm:$0xff]  ;;  %v2256_v28 = vld [vmem:[%s2933_s19 + $0x38] sm:$0xf0]  ;;  %v2781_v30 = vld [vmem:[%s3343_s1 + $0x370] sm:$0xff] }
  0x2f   : > { %914 = vmatpush.bf16.msrb.mxu3 %v2678_v47  ;;  %v2740_v46 = vld [vmem:[%s3343_s1 + $0x268] sm:$0xff]  ;;  %v2259_v33 = vor.u32 %v2720_v27, %v2256_v28 }
  0x30   : > { %858 = vmatpush.bf16.msrb.mxu0 %v2653_v49  ;;  %v2756_v47 = vld [vmem:[%s3343_s1 + $0x2e8] sm:$0xff]  ;;  %v2731_v49 = vld [vmem:[%s3343_s1 + $0x220] sm:$0xff] }
  0x31   : > { %877 = vmatpush.bf16.msrb.mxu1 %v2661_v50  ;;  %v2739_v50 = vld [vmem:[%s3343_s1 + $0x260] sm:$0xff]  ;;  %v2504_v27 = vld [vmem:[%s2933_s19 + $0x68] sm:$0xf0] }
  0x32   : > { %896 = vmatpush.bf16.msrb.mxu2 %v2669_v48  ;;  %v2747_v48 = vld [vmem:[%s3343_s1 + $0x2a0] sm:$0xff] }
  0x33   : > { %915 = vmatpush.bf16.msrb.mxu3 %v2677_v51  ;;  %v2755_v51 = vld [vmem:[%s3343_s1 + $0x2e0] sm:$0xff] }
  0x34   : > { %859 = vmatpush.bf16.msrb.mxu0 %v2652_v53  ;;  %v2645_v53 = vld [vmem:[%s2933_s19 + $0x2c] sm:$0xf0] }
  0x35   : > { %878 = vmatpush.bf16.msrb.mxu1 %v2660_v54  ;;  %v2746_v54 = vld [vmem:[%s3343_s1 + $0x298] sm:$0xff] }
  0x36   : > { %897 = vmatpush.bf16.msrb.mxu2 %v2668_v52  ;;  %v2030_v52 = vld [vmem:[%s2933_s19 + $0x20] sm:$0xf] }
  0x37   : > { %916 = vmatpush.bf16.msrb.mxu3 %v2676_v55  ;;  %v2643_v55 = vld [vmem:[%s2933_s19 + $0x24] sm:$0xf]  ;;  %v2031_v0 = vor.u32 %v2645_v53, %v2030_v52  ;;  %v2724_v52 = vld [vmem:[%s2933_s19 + $0x4c] sm:$0xf]  ;;  %v2770_v53 = vld [vmem:[%s3343_s1 + $0x318] sm:$0xff] }
  0x38   : > { %860 = vmatpush.bf16.msrb.mxu0 %v2651_v57  ;;  %v2038_v57 = vld [vmem:[%s2933_s19 + $0x28] sm:$0xf] }
  0x39   : > { %879 = vmatpush.bf16.msrb.mxu1 %v2659_v58  ;;  %v2646_v58 = vld [vmem:[%s2933_s19 + $0x34] sm:$0xf0] }
  0x3a   : > { %898 = vmatpush.bf16.msrb.mxu2 %v2667_v56  ;;  %v2032_v56 = vld [vmem:[%s2933_s19 + $0x30] sm:$0xf0]  ;;  %v2039_v3 = vor.u32 %v2646_v58, %v2038_v57 }
  0x3b   : > { %917 = vmatpush.bf16.msrb.mxu3 %v2675_v59  ;;  %562 = vmatmul.bf16.gmra.mxu0 %v1871_v6  ;;  %v2644_v59 = vld [vmem:[%s2933_s19 + $0x2c] sm:$0xf]  ;;  %v2035_v2 = vor.u32 %v2643_v55, %v2032_v56  ;;  %v2737_v6 = vld [vmem:[%s3343_s1 + $0x250] sm:$0xff]  ;;  %v2794_v55 = vld [vmem:[%s3343_s1 + $0x3d8] sm:$0xff] }
  0x3c   : > { %861 = vmatpush.bf16.msrb.mxu0 %v2650_v5  ;;  %581 = vmatmul.bf16.gmra.mxu1 %v1875_v7  ;;  %v2729_v5 = vld [vmem:[%s3343_s1 + $0x210] sm:$0xff] }
  0x3d   : > { %600 = vmatmul.bf16.gmra.mxu2 %v1879_v8  ;;  %880 = vmatpush.bf16.msrb.mxu1 %v2658_v10  ;;  %v2753_v7 = vld [vmem:[%s3343_s1 + $0x2d0] sm:$0xff]  ;;  %v2744_v8 = vld [vmem:[%s3343_s1 + $0x288] sm:$0xff] }
  0x3e   : > { %899 = vmatpush.bf16.msrb.mxu2 %v2666_v4  ;;  %619 = vmatmul.bf16.gmra.mxu3 %v1883_v9  ;;  %v2043_v4 = vor.u32 %v2644_v59, %v2040_v61  ;;  %v2728_v9 = vld [vmem:[%s3343_s1 + $0x208] sm:$0xff]  ;;  %v2785_v56 = vld [vmem:[%s3343_s1 + $0x390] sm:$0xff] }
  0x3f   : > { %918 = vmatpush.bf16.msrb.mxu3 %v2674_v11  ;;  %v2736_v10 = vld [vmem:[%s3343_s1 + $0x248] sm:$0xff]  ;;  %v2777_v58 = vld [vmem:[%s3343_s1 + $0x350] sm:$0xff] }
  0x40   : > { %862 = vmatpush.bf16.msrb.mxu0 %v2649_v13  ;;  %v2752_v11 = vld [vmem:[%s3343_s1 + $0x2c8] sm:$0xff]  ;;  %v2790_v13 = vld [vmem:[%s3343_s1 + $0x3b8] sm:$0xff] }
  0x41   : > { %881 = vmatpush.bf16.msrb.mxu1 %v2657_v14  ;;  %v2727_v14 = vld [vmem:[%s3343_s1 + $0x200] sm:$0xff] }
  0x42   : > { %900 = vmatpush.bf16.msrb.mxu2 %v2665_v12  ;;  %v2743_v12 = vld [vmem:[%s3343_s1 + $0x280] sm:$0xff] }
  0x43   : > { %919 = vmatpush.bf16.msrb.mxu3 %v2673_v15  ;;  %v2735_v15 = vld [vmem:[%s3343_s1 + $0x240] sm:$0xff] }
  0x44   : > { %863 = vmatpush.bf16.msrb.mxu0 %v2648_v17  ;;  %v2246_v17 = vld [vmem:[%s2933_s19 + $0x20] sm:$0xf] }
  0x45   : > { %882 = vmatpush.bf16.msrb.mxu1 %v2656_v18  ;;  %v2721_v18 = vld [vmem:[%s2933_s19 + $0x2c] sm:$0xf0] }
  0x46   : > { %901 = vmatpush.bf16.msrb.mxu2 %v2664_v16  ;;  %v2751_v16 = vld [vmem:[%s3343_s1 + $0x2c0] sm:$0xff]  ;;  %v2247_v29 = vor.u32 %v2721_v18, %v2246_v17 }
  0x47   : > { %920 = vmatpush.bf16.msrb.mxu3 %v2672_v19  ;;  %v2774_v19 = vld [vmem:[%s3343_s1 + $0x338] sm:$0xff] }
  0x48   : > { %864 = vmatpush.bf16.msrb.mxu0 %v2647_v21  ;;  %v2719_v21 = vld [vmem:[%s2933_s19 + $0x24] sm:$0xf] }
  0x49   : > { %883 = vmatpush.bf16.msrb.mxu1 %v2655_v22  ;;  %v2798_v22 = vld [vmem:[%s3343_s1 + $0x3f8] sm:$0xff]  ;;  %v2251_v31 = vor.u32 %v2719_v21, %v2248_v24  ;;  %v2765_v21 = vld [vmem:[%s2933_s19 + $0x5c] sm:$0xf0] }
  0x4a   : > { %902 = vmatpush.bf16.msrb.mxu2 %v2663_v20  ;;  %v2782_v20 = vld [vmem:[%s3343_s1 + $0x378] sm:$0xff] }
  0x4b   : > { %921 = vmatpush.bf16.msrb.mxu3 %v2671_v23  ;;  %865 = vmatmul.bf16.vlgmr.msrb.gmra.mxu0 %v2015_v36  ;;  %v2789_v23 = vld [vmem:[%s3343_s1 + $0x3b0] sm:$0xff]  ;;  %v2788_v36 = vld [vmem:[%s3343_s1 + $0x3a8] sm:$0xff]  ;;  %v2502_v24 = vld [vmem:[%s2933_s19 + $0x58] sm:$0xf] }
  0x4c   : > { %1239 = vmatpush.bf16.msra.mxu0 %v2734_v26  ;;  %884 = vmatmul.bf16.vlgmr.msrb.gmra.mxu1 %v2019_v38  ;;  %v2722_v26 = vld [vmem:[%s2933_s19 + $0x34] sm:$0xf0]  ;;  %v2772_v38 = vld [vmem:[%s3343_s1 + $0x328] sm:$0xff] }
  0x4d   : > { %1258 = vmatpush.bf16.msra.mxu1 %v2742_v34  ;;  %903 = vmatmul.bf16.vlgmr.msrb.gmra.mxu2 %v2023_v39  ;;  %v2773_v34 = vld [vmem:[%s3343_s1 + $0x330] sm:$0xff]  ;;  %v2796_v39 = vld [vmem:[%s3343_s1 + $0x3e8] sm:$0xff] }
  0x4e   : > { %1277 = vmatpush.bf16.msra.mxu2 %v2750_v25  ;;  %922 = vmatmul.bf16.vlgmr.msrb.gmra.mxu3 %v2027_v40  ;;  %v2254_v25 = vld [vmem:[%s2933_s19 + $0x28] sm:$0xf]  ;;  %v2787_v40 = vld [vmem:[%s3343_s1 + $0x3a0] sm:$0xff] }
  0x4f   : > { %1296 = vmatpush.bf16.msra.mxu3 %v2758_v35  ;;  %v2255_v32 = vor.u32 %v2722_v26, %v2254_v25  ;;  %v2797_v35 = vld [vmem:[%s3343_s1 + $0x3f0] sm:$0xff]  ;;  %v2766_v25 = vld [vmem:[%s2933_s19 + $0x64] sm:$0xf0]  ;;  %v2764_v26 = vld [vmem:[%s2933_s19 + $0x5c] sm:$0xf] }
  0x50   : > { %1240 = vmatpush.bf16.msra.mxu0 %v2733_v41  ;;  %v2779_v41 = vld [vmem:[%s3343_s1 + $0x360] sm:$0xff] }
  0x51   : > { %1259 = vmatpush.bf16.msra.mxu1 %v2741_v42  ;;  %v2771_v42 = vld [vmem:[%s3343_s1 + $0x320] sm:$0xff] }
  0x52   : > { %1278 = vmatpush.bf16.msra.mxu2 %v2749_v37  ;;  %v2780_v37 = vld [vmem:[%s3343_s1 + $0x368] sm:$0xff] }
  0x53   : > { %1297 = vmatpush.bf16.msra.mxu3 %v2757_v43  ;;  %v2795_v43 = vld [vmem:[%s3343_s1 + $0x3e0] sm:$0xff] }
  0x54   : > { %1241 = vmatpush.bf16.msra.mxu0 %v2732_v45  ;;  %v2262_v45 = vld [vmem:[%s2933_s19 + $0x40] sm:$0xf] }
  0x55   : > { %1260 = vmatpush.bf16.msra.mxu1 %v2740_v46  ;;  %v2725_v46 = vld [vmem:[%s2933_s19 + $0x4c] sm:$0xf0] }
  0x56   : > { %1279 = vmatpush.bf16.msra.mxu2 %v2748_v44  ;;  %v2786_v44 = vld [vmem:[%s3343_s1 + $0x398] sm:$0xff]  ;;  %v2263_v57 = vor.u32 %v2725_v46, %v2262_v45 }
  0x57   : > { %1298 = vmatpush.bf16.msra.mxu3 %v2756_v47  ;;  %v2778_v47 = vld [vmem:[%s3343_s1 + $0x358] sm:$0xff] }
  0x58   : > { %1242 = vmatpush.bf16.msra.mxu0 %v2731_v49  ;;  %v2264_v49 = vld [vmem:[%s2933_s19 + $0x50] sm:$0xf0] }
  0x59   : > { %1261 = vmatpush.bf16.msra.mxu1 %v2739_v50  ;;  %v2270_v50 = vld [vmem:[%s2933_s19 + $0x48] sm:$0xf] }
  0x5a   : > { %1280 = vmatpush.bf16.msra.mxu2 %v2747_v48  ;;  %v2723_v48 = vld [vmem:[%s2933_s19 + $0x44] sm:$0xf] }
  0x5b   : > { %1299 = vmatpush.bf16.msra.mxu3 %v2755_v51  ;;  %870 = vmatmul.bf16.gmra.mxu0 %v2031_v0  ;;  %v2726_v51 = vld [vmem:[%s2933_s19 + $0x54] sm:$0xf0]  ;;  %v2267_v59 = vor.u32 %v2723_v48, %v2264_v49  ;;  %v2784_v0 = vld [vmem:[%s3343_s1 + $0x388] sm:$0xff] }
  0x5c   : > { %1243 = vmatpush.bf16.msra.mxu0 %v2730_v60  ;;  %889 = vmatmul.bf16.gmra.mxu1 %v2035_v2  ;;  %v2271_v60 = vor.u32 %v2726_v51, %v2270_v50  ;;  %v2768_v2 = vld [vmem:[%s3343_s1 + $0x308] sm:$0xff] }
  0x5d   : > { %1262 = vmatpush.bf16.msra.mxu1 %v2738_v62  ;;  %908 = vmatmul.bf16.gmra.mxu2 %v2039_v3  ;;  %v2769_v62 = vld [vmem:[%s3343_s1 + $0x310] sm:$0xff]  ;;  %v2792_v3 = vld [vmem:[%s3343_s1 + $0x3c8] sm:$0xff] }
  0x5e   : > { %1281 = vmatpush.bf16.msra.mxu2 %v2746_v54  ;;  %927 = vmatmul.bf16.gmra.mxu3 %v2043_v4  ;;  %v2272_v54 = vld [vmem:[%s2933_s19 + $0x58] sm:$0xf0]  ;;  %v2783_v4 = vld [vmem:[%s3343_s1 + $0x380] sm:$0xff] }
  0x5f   : > { %1300 = vmatpush.bf16.msra.mxu3 %v2754_v63  ;;  %v2275_v61 = vor.u32 %v2724_v52, %v2272_v54  ;;  %v2793_v63 = vld [vmem:[%s3343_s1 + $0x3d0] sm:$0xff] }
  0x60   : > { %1244 = vmatpush.bf16.msra.mxu0 %v2729_v5  ;;  %v2775_v5 = vld [vmem:[%s3343_s1 + $0x340] sm:$0xff] }
  0x61   : > { %1263 = vmatpush.bf16.msra.mxu1 %v2737_v6  ;;  %v2767_v6 = vld [vmem:[%s3343_s1 + $0x300] sm:$0xff] }
  0x62   : > { %1282 = vmatpush.bf16.msra.mxu2 %v2745_v1  ;;  %v2776_v1 = vld [vmem:[%s3343_s1 + $0x348] sm:$0xff] }
  0x63   : > { %1301 = vmatpush.bf16.msra.mxu3 %v2753_v7  ;;  %v2791_v7 = vld [vmem:[%s3343_s1 + $0x3c0] sm:$0xff] }
  0x64   : > { %1245 = vmatpush.bf16.msra.mxu0 %v2728_v9  ;;  %v2761_v9 = vld [vmem:[%s2933_s19 + $0x3c] sm:$0xf0] }
  0x65   : > { %1264 = vmatpush.bf16.msra.mxu1 %v2736_v10  ;;  %v2759_v10 = vld [vmem:[%s2933_s19 + $0x34] sm:$0xf] }
  0x66   : > { %1283 = vmatpush.bf16.msra.mxu2 %v2744_v8  ;;  %v2478_v8 = vld [vmem:[%s2933_s19 + $0x30] sm:$0xf] }
  0x67   : > { %1302 = vmatpush.bf16.msra.mxu3 %v2752_v11  ;;  %v2480_v11 = vld [vmem:[%s2933_s19 + $0x40] sm:$0xf0] }
  0x68   : > { %1246 = vmatpush.bf16.msra.mxu0 %v2727_v14  ;;  %v2760_v14 = vld [vmem:[%s2933_s19 + $0x3c] sm:$0xf]  ;;  %v2483_v17 = vor.u32 %v2759_v10, %v2480_v11 }
  0x69   : > { %1265 = vmatpush.bf16.msra.mxu1 %v2735_v15  ;;  %v2488_v15 = vld [vmem:[%s2933_s19 + $0x48] sm:$0xf0] }
  0x6a   : > { %1284 = vmatpush.bf16.msra.mxu2 %v2743_v12  ;;  %v2486_v12 = vld [vmem:[%s2933_s19 + $0x38] sm:$0xf] }
  0x6b   : > { %1303 = vmatpush.bf16.msra.mxu3 %v2751_v16  ;;  %1247 = vmatmul.bf16.vlgmr.msra.gmra.mxu0 %v2247_v29  ;;  %v2479_v16 = vor.u32 %v2761_v9, %v2478_v8 }
  0x6c   : > { %1625 = vmatpush.bf16.msrb.mxu0 %v2774_v19  ;;  %1266 = vmatmul.bf16.vlgmr.msra.gmra.mxu1 %v2251_v31  ;;  %v2491_v19 = vor.u32 %v2760_v14, %v2488_v15  ;;  %v2507_v31 = vor.u32 %v2764_v26, %v2504_v27 }
  0x6d   : > { %1644 = vmatpush.bf16.msrb.mxu1 %v2782_v20  ;;  %1285 = vmatmul.bf16.vlgmr.msra.gmra.mxu2 %v2255_v32  ;;  %v2494_v20 = vld [vmem:[%s2933_s19 + $0x50] sm:$0xf] }
  0x6e   : > { %1663 = vmatpush.bf16.msrb.mxu2 %v2790_v13  ;;  %1304 = vmatmul.bf16.vlgmr.msra.gmra.mxu3 %v2259_v33  ;;  %v2762_v13 = vld [vmem:[%s2933_s19 + $0x44] sm:$0xf0]  ;;  %v2495_v28 = vor.u32 %v2765_v21, %v2494_v20 }
  0x6f   : > { %1682 = vmatpush.bf16.msrb.mxu3 %v2798_v22  ;;  %v2487_v18 = vor.u32 %v2762_v13, %v2486_v12  ;;  %v2763_v22 = vld [vmem:[%s2933_s19 + $0x54] sm:$0xf] }
  0x70   : > { %1626 = vmatpush.bf16.msrb.mxu0 %v2773_v34 }
  0x71   : > { %1645 = vmatpush.bf16.msrb.mxu1 %v2781_v30  ;;  %v2503_v30 = vor.u32 %v2766_v25, %v2502_v24 }
  0x72   : > { %1664 = vmatpush.bf16.msrb.mxu2 %v2789_v23  ;;  %v2496_v23 = vld [vmem:[%s2933_s19 + $0x60] sm:$0xf0]  ;;  %s2638_s19 = sshll.u32 %s3347_s13, 5 }
  0x73   : > { %1683 = vmatpush.bf16.msrb.mxu3 %v2797_v35  ;;  %v2499_v29 = vor.u32 %v2763_v22, %v2496_v23  ;;  %s3326_s9 = scalar_lea.vmem %s3345_s3, %s2638_s19 }
  0x74   : > { %1627 = vmatpush.bf16.msrb.mxu0 %v2772_v38 }
  0x75   : > { %1646 = vmatpush.bf16.msrb.mxu1 %v2780_v37 }
  0x76   : > { %1665 = vmatpush.bf16.msrb.mxu2 %v2788_v36 }
  0x77   : > { %1684 = vmatpush.bf16.msrb.mxu3 %v2796_v39 }
  0x78   : > { %1628 = vmatpush.bf16.msrb.mxu0 %v2771_v42 }
  0x79   : > { %1647 = vmatpush.bf16.msrb.mxu1 %v2779_v41 }
  0x7a   : > { %1666 = vmatpush.bf16.msrb.mxu2 %v2787_v40 }
  0x7b   : > { %1685 = vmatpush.bf16.msrb.mxu3 %v2795_v43  ;;  %1252 = vmatmul.bf16.gmra.mxu0 %v2263_v57 }
  0x7c   : > { %1629 = vmatpush.bf16.msrb.mxu0 %v2770_v53  ;;  %1271 = vmatmul.bf16.gmra.mxu1 %v2267_v59 }
  0x7d   : > { %1648 = vmatpush.bf16.msrb.mxu1 %v2778_v47  ;;  %1290 = vmatmul.bf16.gmra.mxu2 %v2271_v60 }
  0x7e   : > { %1667 = vmatpush.bf16.msrb.mxu2 %v2786_v44  ;;  %1309 = vmatmul.bf16.gmra.mxu3 %v2275_v61 }
  0x7f   : > { %1686 = vmatpush.bf16.msrb.mxu3 %v2794_v55 }
  0x80   : > { %1630 = vmatpush.bf16.msrb.mxu0 %v2769_v62 }
  0x81   : > { %1649 = vmatpush.bf16.msrb.mxu1 %v2777_v58 }
  0x82   : > { %1668 = vmatpush.bf16.msrb.mxu2 %v2785_v56 }
  0x83   : > { %1687 = vmatpush.bf16.msrb.mxu3 %v2793_v63 }
  0x84   : > { %1631 = vmatpush.bf16.msrb.mxu0 %v2768_v2 }
  0x85   : > { %1650 = vmatpush.bf16.msrb.mxu1 %v2776_v1 }
  0x86   : > { %1669 = vmatpush.bf16.msrb.mxu2 %v2784_v0 }
  0x87   : > { %1688 = vmatpush.bf16.msrb.mxu3 %v2792_v3 }
  0x88   : > { %1632 = vmatpush.bf16.msrb.mxu0 %v2767_v6 }
  0x89   : > { %1651 = vmatpush.bf16.msrb.mxu1 %v2775_v5 }
  0x8a   : > { %1670 = vmatpush.bf16.msrb.mxu2 %v2783_v4 }
  0x8b   : > { %1689 = vmatpush.bf16.msrb.mxu3 %v2791_v7  ;;  %1633 = vmatmul.bf16.vlgmr.msrb.gmra.mxu0 %v2479_v16 }
  0x8c   : > { %1652 = vmatmul.bf16.vlgmr.msrb.gmra.mxu1 %v2483_v17 }
  0x8d   : > { %1671 = vmatmul.bf16.vlgmr.msrb.gmra.mxu2 %v2487_v18 }
  0x8e   : > { %1690 = vmatmul.bf16.vlgmr.msrb.gmra.mxu3 %v2491_v19 }
  0x9b   : > { %1638 = vmatmul.bf16.gmra.mxu0 %v2495_v28 }
  0x9c   : > { %1657 = vmatmul.bf16.gmra.mxu1 %v2499_v29 }
  0x9d   : > { %1676 = vmatmul.bf16.gmra.mxu2 %v2503_v30 }
  0x9e   : > { %1695 = vmatmul.bf16.gmra.mxu3 %v2507_v31 }
  0xa8   : > { %v558_v32 = vpop.f32.mrf.mxu0 }
  0xa9   : > { %v577_v33 = vpop.f32.mrf.mxu1 }
  0xaa   : > { %v578_v34 = vadd.f32 %v577_v33, %v558_v32 }
  0xb0   : > { %v596_v35 = vpop.f32.mrf.mxu2  ;;  %v560_v38 = vpop.f32.mrf.mxu0 }
  0xb1   : > { %v615_v36 = vpop.f32.mrf.mxu3  ;;  %v597_v37 = vadd.f32 %v596_v35, %v578_v34  ;;  %v579_v39 = vpop.f32.mrf.mxu1 }
  0xb2   : > { %v580_v40 = vadd.f32 %v579_v39, %v560_v38 }
  0xb3   : > { %v616_v41 = vadd.f32 %v615_v36, %v597_v37 }
  0xb8   : > { %v598_v42 = vpop.f32.mrf.mxu2  ;;  %v563_v45 = vpop.f32.mrf.mxu0 }
  0xb9   : > { %v617_v43 = vpop.f32.mrf.mxu3  ;;  %v599_v44 = vadd.f32 %v598_v42, %v580_v40  ;;  %v582_v46 = vpop.f32.mrf.mxu1 }
  0xba   : > { %v583_v47 = vadd.f32 %v582_v46, %v563_v45 }
  0xbb   : > { %v618_v48 = vadd.f32 %v617_v43, %v599_v44 }
  0xc0   : > { %v601_v49 = vpop.f32.mrf.mxu2  ;;  %v565_v52 = vpop.f32.mrf.mxu0 }
  0xc1   : > { %v620_v50 = vpop.f32.mrf.mxu3  ;;  %v602_v51 = vadd.f32 %v601_v49, %v583_v47  ;;  %v584_v53 = vpop.f32.mrf.mxu1 }
  0xc2   : > { %v585_v54 = vadd.f32 %v584_v53, %v565_v52 }
  0xc3   : > { %v621_v55 = vadd.f32 %v620_v50, %v602_v51  ;;  %v2808_v50 = vld [vmem:[%s3344_s2] ss:$0 sm:$0xff] }
  0xc8   : > { %v603_v56 = vpop.f32.mrf.mxu2  ;;  %v866_v59 = vpop.f32.mrf.mxu0 }
  0xc9   : > { %v622_v57 = vpop.f32.mrf.mxu3  ;;  %v604_v58 = vadd.f32 %v603_v56, %v585_v54  ;;  %v885_v60 = vpop.f32.mrf.mxu1  ;;  %v867_v26 = vadd.f32 %v866_v59, %v616_v41 }
  0xcb   : > { %v3305_v61 = vadd.f32 %v622_v57, %v604_v58  ;;  %v886_v32 = vadd.f32 %v885_v60, %v867_v26 }
  0xd0   : > { %v904_v62 = vpop.f32.mrf.mxu2  ;;  %v868_v0 = vpop.f32.mrf.mxu0 }
  0xd1   : > { %v923_v63 = vpop.f32.mrf.mxu3  ;;  %v887_v1 = vpop.f32.mrf.mxu1  ;;  %v905_v34 = vadd.f32 %v904_v62, %v886_v32  ;;  %v869_v36 = vadd.f32 %v868_v0, %v618_v48 }
  0xd3   : > { %v924_v39 = vadd.f32 %v923_v63, %v905_v34  ;;  %v888_v41 = vadd.f32 %v887_v1, %v869_v36 }
  0xd8   : > { %v906_v2 = vpop.f32.mrf.mxu2  ;;  %v871_v4 = vpop.f32.mrf.mxu0 }
  0xd9   : > { %v925_v3 = vpop.f32.mrf.mxu3  ;;  %v890_v5 = vpop.f32.mrf.mxu1  ;;  %v907_v51 = vadd.f32 %v906_v2, %v888_v41  ;;  %v872_v48 = vadd.f32 %v871_v4, %v621_v55 }
  0xdb   : > { %v926_v59 = vadd.f32 %v925_v3, %v907_v51  ;;  %v891_v1 = vadd.f32 %v890_v5, %v872_v48 }
  0xe0   : > { %v3307_v6 = vpop.f32.mrf.mxu2  ;;  %v3311_v8 = vpop.f32.mrf.mxu0 }
  0xe1   : > { %v3309_v7 = vpop.f32.mrf.mxu3  ;;  %v3313_v9 = vpop.f32.mrf.mxu1 }
  0xe8   : > { %v3315_v10 = vpop.f32.mrf.mxu2  ;;  %v1248_v12 = vpop.f32.mrf.mxu0 }
  0xe9   : > { %v3317_v11 = vpop.f32.mrf.mxu3  ;;  %v1267_v13 = vpop.f32.mrf.mxu1 }
  0xea   : > { %v1268_v27 = vadd.f32 %v1267_v13, %v1248_v12  ;;  %v910_v12 = vadd.f32 %v3307_v6, %v891_v1 }
  0xf0   : > { %v1286_v14 = vpop.f32.mrf.mxu2  ;;  %v1250_v16 = vpop.f32.mrf.mxu0 }
  0xf1   : > { %v1305_v15 = vpop.f32.mrf.mxu3  ;;  %v1269_v17 = vpop.f32.mrf.mxu1  ;;  %v1287_v33 = vadd.f32 %v1286_v14, %v1268_v27 }
  0xf2   : > { %v1270_v40 = vadd.f32 %v1269_v17, %v1250_v16 }
  0xf3   : > { %v1306_v37 = vadd.f32 %v1305_v15, %v1287_v33  ;;  %v874_v15 = vadd.f32 %v3311_v8, %v3305_v61 }
  0xf5   : > { %v1315_v46 = vadd.f32 %v1306_v37, %v924_v39 }
  0xf8   : > { %v1288_v18 = vpop.f32.mrf.mxu2  ;;  %v1253_v20 = vpop.f32.mrf.mxu0 }
  0xf9   : > { %v1307_v19 = vpop.f32.mrf.mxu3  ;;  %v1272_v21 = vpop.f32.mrf.mxu1  ;;  %v1289_v47 = vadd.f32 %v1288_v18, %v1270_v40  ;;  %v929_v18 = vadd.f32 %v3309_v7, %v910_v12 }
  0xfa   : > { %v1273_v54 = vadd.f32 %v1272_v21, %v1253_v20  ;;  %v893_v21 = vadd.f32 %v3313_v9, %v874_v15 }
  0xfb   : > { %v1308_v53 = vadd.f32 %v1307_v19, %v1289_v47 }
  0xfc   : > { %v912_v61 = vadd.f32 %v3315_v10, %v893_v21 }
  0xfd   : > { %v1316_v55 = vadd.f32 %v1308_v53, %v926_v59 }
 0x100   : > { %v1291_v22 = vpop.f32.mrf.mxu2  ;;  %v1255_v24 = vpop.f32.mrf.mxu0 }
 0x101   : > { %v1310_v23 = vpop.f32.mrf.mxu3  ;;  %v1274_v25 = vpop.f32.mrf.mxu1  ;;  %v1292_v2 = vadd.f32 %v1291_v22, %v1273_v54 }
 0x102   : > { %v1275_v19 = vadd.f32 %v1274_v25, %v1255_v24  ;;  %v931_v24 = vadd.f32 %v3317_v11, %v912_v61 }
 0x103   : > { %v1311_v16 = vadd.f32 %v1310_v23, %v1292_v2 }
 0x105   : > { %v1317_v22 = vadd.f32 %v1311_v16, %v929_v18 }
 0x108   : > { %v1293_v28 = vpop.f32.mrf.mxu2  ;;  %v1634_v30 = vpop.f32.mrf.mxu0 }
 0x109   : > { %v1312_v29 = vpop.f32.mrf.mxu3  ;;  %v1653_v31 = vpop.f32.mrf.mxu1  ;;  %v1294_v26 = vadd.f32 %v1293_v28, %v1275_v19 }
 0x10a   : > { %v1654_v35 = vadd.f32 %v1653_v31, %v1634_v30 }
 0x10b   : > { %v1313_v23 = vadd.f32 %v1312_v29, %v1294_v26 }
 0x10d   : > { %v1318_v34 = vadd.f32 %v1313_v23, %v931_v24 }
 0x110   : > { %v1672_v38 = vpop.f32.mrf.mxu2  ;;  %v1636_v44 = vpop.f32.mrf.mxu0 }
 0x111   : > { %v1673_v42 = vadd.f32 %v1672_v38, %v1654_v35  ;;  %v1691_v43 = vpop.f32.mrf.mxu3  ;;  %v1655_v45 = vpop.f32.mrf.mxu1 }
 0x112   : > { %v1656_v57 = vadd.f32 %v1655_v45, %v1636_v44 }
 0x113   : > { %v1692_v49 = vadd.f32 %v1691_v43, %v1673_v42 }
 0x115   : > { %v1701_v52 = vadd.f32 %v1692_v49, %v1315_v46 }
 0x117   : > { %v1709_v56 = vadd.f32 %v2808_v50, %v1701_v52 }
 0x118   : > { %v1674_v58 = vpop.f32.mrf.mxu2  ;;  %v1639_v63 = vpop.f32.mrf.mxu0 }
 0x119   : > { %1713 = vst [vmem:[%s3326_s9] sm:$0xff] %v1709_v56  ;;  %v1675_v60 = vadd.f32 %v1674_v58, %v1656_v57  ;;  %v1693_v62 = vpop.f32.mrf.mxu3  ;;  %v1658_v0 = vpop.f32.mrf.mxu1 }
 0x11a   : > { %v1659_v14 = vadd.f32 %v1658_v0, %v1639_v63 }
 0x11b   : > { %v1694_v4 = vadd.f32 %v1693_v62, %v1675_v60 }
 0x11d   : > { %v1702_v13 = vadd.f32 %v1694_v4, %v1316_v55 }
 0x11f   : > { %v1710_v17 = vadd.f32 %v2808_v50, %v1702_v13 }
 0x120   : > { %v1677_v3 = vpop.f32.mrf.mxu2  ;;  %v1641_v27 = vpop.f32.mrf.mxu0 }
 0x121   : > { %1714 = vst [vmem:[%s3326_s9 + $0x8] sm:$0xff] %v1710_v17  ;;  %v1678_v20 = vadd.f32 %v1677_v3, %v1659_v14  ;;  %v1696_v5 = vpop.f32.mrf.mxu3  ;;  %v1660_v30 = vpop.f32.mrf.mxu1 }
 0x122   : > { %v1661_v32 = vadd.f32 %v1660_v30, %v1641_v27 }
 0x123   : > { %v1697_v6 = vadd.f32 %v1696_v5, %v1678_v20 }
 0x125   : > { %v1703_v8 = vadd.f32 %v1697_v6, %v1317_v22 }
 0x127   : > { %v1711_v31 = vadd.f32 %v2808_v50, %v1703_v8 }
 0x128   : > { %v1679_v7 = vpop.f32.mrf.mxu2 }
 0x129   : > { %1715 = vst [vmem:[%s3326_s9 + $0x10] sm:$0xff] %v1711_v31  ;;  %v1680_v25 = vadd.f32 %v1679_v7, %v1661_v32  ;;  %v1698_v33 = vpop.f32.mrf.mxu3 }
 0x12b   : > { %v1699_v9 = vadd.f32 %v1698_v33, %v1680_v25 }
 0x12d   : > { %v1704_v35 = vadd.f32 %v1699_v9, %v1318_v34 }
 0x12f   : > { %v1712_v28 = vadd.f32 %v2808_v50, %v1704_v35 }
 0x131   : > { %1716 = vst [vmem:[%s3326_s9 + $0x18] sm:$0xff] %v1712_v28 }
 0x132 PF: > { %s13_s12 = sadd.s32 1, %s2815_s12  }
 0x133   : > { %p10_p4 = scmp.ge.s32.totalorder %s13_s12, 4  }
 0x135   :  { %12 = sbr.rel (!%p10_p4) target bundleno = 1 (0x1), region = 68 }

</bundles_post_ra>
